<compile_context>
chip_gen: v7x
topology: tpu7x:2x2x1
jax: 0.10.0
libtpu: 0.0.40
codegen_flags: <defaults>
</compile_context>

<pallas_src>
import jax
import jax.numpy as jnp
import numpy as np
from jax.experimental import pallas as pl
from jax.experimental.pallas import tpu as pltpu


# ----------------------------------------------------------------------------
# Fused per-sample kernel (grid=(N,), one sample per grid step).
# ----------------------------------------------------------------------------
def _fused_cnn_kernel(patch1_ref, w1_ref, b1_ref, w2_ref, b2_ref, w3_ref, b3_ref,
                      w4_ref, b4_ref, bmat_ref, o_ref,
                      pad1_ref, pad2_ref, pad3_ref):
    # Static spatial sizes derived from the scratch shapes.
    Hh, Wh = pad1_ref.shape[0] - 2, pad1_ref.shape[1] - 2
    Hq, Wq = Hh // 2, Wh // 2
    H, W = 2 * Hh, 2 * Wh

    def zero_halo(ref):
        """Zero only the 1-pixel halo strips of a padded (hp, wp, c) scratch."""
        hp, wp, c = ref.shape
        z_row = jnp.zeros((1, wp, c), jnp.float32)
        z_col = jnp.zeros((hp, 1, c), jnp.float32)
        ref[0:1, :, :] = z_row
        ref[hp - 1:hp, :, :] = z_row
        ref[:, 0:1, :] = z_col
        ref[:, wp - 1:wp, :] = z_col

    def conv3x3_tap_accum(pad_ref, w_ref, b_ref, h, w):
        """3x3 SAME conv via 9 per-tap matmuls on (h*w, Cin) ref slices; bias + ReLU."""
        cin = pad_ref.shape[-1]
        cout = w_ref.shape[-1]
        acc = jnp.zeros((h * w, cout), jnp.float32)
        for t in range(9):
            kh, kw = t // 3, t % 3
            x_tap = pad_ref[kh:kh + h, kw:kw + w, :].reshape(h * w, cin)
            acc = acc + jnp.dot(x_tap, w_ref[t * cin:(t + 1) * cin, :],
                                preferred_element_type=jnp.float32)
        return jnp.maximum(acc + b_ref[...], 0.0)                 # (h*w, cout)

    def pool2_into_padded(flat, dst_ref, h, w):
        """2x2/2 maxpool of row-major (h*w, c); one interior store into dst_ref."""
        c = flat.shape[-1]
        a = jnp.max(flat.reshape(h * w // 2, 2, c), axis=1)       # pool along W
        a = jnp.max(a.reshape(h // 2, 2, w // 2, c), axis=1)      # pool along H
        dst_ref[1:1 + h // 2, 1:1 + w // 2, :] = a

    # ---------------- encoder ----------------
    # conv1: one (H*W, 9) @ (9, 32) matmul (patch built wrapper-side), bias + ReLU.
    a1 = jnp.dot(patch1_ref[0], w1_ref[...], preferred_element_type=jnp.float32)
    a1 = jnp.maximum(a1 + b1_ref[...], 0.0)                       # (H*W, 32)
    zero_halo(pad1_ref)
    pool2_into_padded(a1, pad1_ref, H, W)                         # interior (H/2,W/2,32)

    a2 = conv3x3_tap_accum(pad1_ref, w2_ref, b2_ref, Hh, Wh)      # (Hh*Wh, 64)
    zero_halo(pad2_ref)
    pool2_into_padded(a2, pad2_ref, Hh, Wh)                       # interior (H/4,W/4,64)

    a3 = conv3x3_tap_accum(pad2_ref, w3_ref, b3_ref, Hq, Wq)      # (Hq*Wq, 128)
    zero_halo(pad3_ref)
    pad3_ref[1:1 + Hq, 1:1 + Wq, :] = a3.reshape(Hq, Wq, 128)

    # ---------------- decoder ----------------
    # conv4 (Cout=1): 9 VPU broadcast-multiplies + one lane reduction (no Cout=1 matmul).
    c3 = pad3_ref.shape[-1]
    acc4 = jnp.zeros((Hq * Wq, c3), jnp.float32)
    for t in range(9):
        kh, kw = t // 3, t % 3
        x_tap = pad3_ref[kh:kh + Hq, kw:kw + Wq, :].reshape(Hq * Wq, c3)
        acc4 = acc4 + x_tap * w4_ref[t:t + 1, :]
    y_flat = jnp.sum(acc4, axis=1).reshape(1, Hq * Wq) + b4_ref[0]    # (1, Hq*Wq)

    # Both bilinear x2 upsamples composed into one matmul -> lane-dense (1, H*W) slab.
    up = jnp.dot(y_flat, bmat_ref[...], preferred_element_type=jnp.float32)
    o_ref[...] = up.reshape(1, 1, H * W)


# ----------------------------------------------------------------------------
# Host-side constants (compile-time folded).
# ----------------------------------------------------------------------------
def _bilinear_matrix(n_in, n_out):
    """1-D bilinear interpolation matrix, align_corners=True (PyTorch Upsample)."""
    if n_in == 1:
        return np.ones((n_out, 1), np.float32)
    i = np.arange(n_out, dtype=np.float64)
    src = i * (n_in - 1) / (n_out - 1)
    i0 = np.clip(np.floor(src).astype(np.int64), 0, n_in - 2)
    frac = src - i0
    m = np.zeros((n_out, n_in), np.float64)
    rows = np.arange(n_out)
    m[rows, i0] += 1.0 - frac
    m[rows, i0 + 1] += frac
    return m.astype(np.float32)


def _upsample_kron(hq, wq, h, w):
    """Exact composition of the two x2 bilinear upsamples as one (hq*wq, h*w) matrix."""
    mr = _bilinear_matrix(2 * hq, h) @ _bilinear_matrix(hq, 2 * hq)   # (h, hq)
    mc = _bilinear_matrix(2 * wq, w) @ _bilinear_matrix(wq, 2 * wq)   # (w, wq)
    # out_flat = y_flat @ kron(mr^T, mc^T), both flattenings row-major.
    return jnp.asarray(np.kron(mr.T, mc.T).astype(np.float32))        # (hq*wq, h*w)


# ----------------------------------------------------------------------------
# Parameters (deterministic, PyTorch-default-like uniform init), HWIO layout.
# ----------------------------------------------------------------------------
def init_params(key):
    shapes = [(3, 3, 1, 32), (3, 3, 32, 64), (3, 3, 64, 128), (3, 3, 128, 1)]
    params = []
    for s in shapes:
        key, kw, kb = jax.random.split(key, 3)
        fan_in = s[0] * s[1] * s[2]
        bound = 1.0 / float(np.sqrt(fan_in))
        w = jax.random.uniform(kw, s, jnp.float32, -bound, bound)
        b = jax.random.uniform(kb, (s[3],), jnp.float32, -bound, bound)
        params.append((w, b))
    return params


# ----------------------------------------------------------------------------
# Full forward pass (NCHW in / NCHW out, matching the PyTorch module).
# ----------------------------------------------------------------------------
@jax.jit
def cnn_model_forward(x_nchw, params):
    (w1, b1), (w2, b2), (w3, b3), (w4, b4) = params
    N, _, H, W = x_nchw.shape
    Hh, Wh, Hq, Wq = H // 2, W // 2, H // 4, W // 4

    # conv1 im2col patch built wrapper-side (pure layout; removes the lane-sparse C=1
    # padded-input scratch from the kernel).
    x = x_nchw[:, 0]                                               # (N, H, W)
    xp = jnp.pad(x, ((0, 0), (1, 1), (1, 1)))
    patch1 = jnp.stack([xp[:, kh:kh + H, kw:kw + W].reshape(N, H * W)
                        for kh in range(3) for kw in range(3)], axis=-1)   # (N, H*W, 9)

    # im2col-reshaped weights (HWIO) and row biases.
    w1i = w1.reshape(9, 32);        b1r = b1.reshape(1, 32)
    w2i = w2.reshape(9 * 32, 64);   b2r = b2.reshape(1, 64)
    w3i = w3.reshape(9 * 64, 128);  b3r = b3.reshape(1, 128)
    w4r = w4.reshape(9, 128)                                       # per-tap VPU rows
    b4r = b4.reshape(1)                                            # scalar -> SMEM

    bmat = _upsample_kron(Hq, Wq, H, W)                            # (Hq*Wq, H*W) const

    grid_spec = pltpu.PrefetchScalarGridSpec(
        num_scalar_prefetch=0,
        grid=(N,),
        in_specs=[
            pl.BlockSpec((1, H * W, 9), lambda n: (n, 0, 0)),      # per-sample patch
            pl.BlockSpec((9, 32), lambda n: (0, 0)),               # w1
            pl.BlockSpec((1, 32), lambda n: (0, 0)),               # b1
            pl.BlockSpec((9 * 32, 64), lambda n: (0, 0)),          # w2
            pl.BlockSpec((1, 64), lambda n: (0, 0)),               # b2
            pl.BlockSpec((9 * 64, 128), lambda n: (0, 0)),         # w3
            pl.BlockSpec((1, 128), lambda n: (0, 0)),              # b3
            pl.BlockSpec((9, 128), lambda n: (0, 0)),              # w4 (per-tap rows)
            pl.BlockSpec(memory_space=pltpu.MemorySpace.SMEM),     # b4 scalar
            pl.BlockSpec((Hq * Wq, H * W), lambda n: (0, 0)),      # upsample matrix
        ],
        out_specs=pl.BlockSpec((1, 1, H * W), lambda n: (n, 0, 0)),
        scratch_shapes=[
            pltpu.VMEM((Hh + 2, Wh + 2, 32), jnp.float32),         # padded pool1 out
            pltpu.VMEM((Hq + 2, Wq + 2, 64), jnp.float32),         # padded pool2 out
            pltpu.VMEM((Hq + 2, Wq + 2, 128), jnp.float32),        # padded conv3 out
        ],
    )

    out_flat = pl.pallas_call(
        _fused_cnn_kernel,
        out_shape=jax.ShapeDtypeStruct((N, 1, H * W), jnp.float32),
        grid_spec=grid_spec,
        compiler_params=pltpu.CompilerParams(
            dimension_semantics=("parallel",),
            vmem_limit_bytes=32 * 1024 * 1024),
    )(patch1, w1i, b1r, w2i, b2r, w3i, b3r, w4r, b4r, bmat)

    return out_flat.reshape(N, 1, H, W)


# ----------------------------------------------------------------------------
# Pure-JAX reference (XLA ops, HIGHEST precision) for the correctness cross-check.
# ----------------------------------------------------------------------------
@jax.jit
def _reference_forward(x_nchw, params):
    (w1, b1), (w2, b2), (w3, b3), (w4, b4) = params
    hi = jax.lax.Precision.HIGHEST
    x = jnp.transpose(x_nchw, (0, 2, 3, 1))

    def conv(x, w, b):
        y = jax.lax.conv_general_dilated(
            x, w, window_strides=(1, 1), padding="SAME",
            dimension_numbers=("NHWC", "HWIO", "NHWC"), precision=hi)
        return y + b

    def pool(x):
        return jax.lax.reduce_window(x, -jnp.inf, jax.lax.max,
                                     (1, 2, 2, 1), (1, 2, 2, 1), "VALID")

    x = pool(jax.nn.relu(conv(x, w1, b1)))
    x = pool(jax.nn.relu(conv(x, w2, b2)))
    x = jax.nn.relu(conv(x, w3, b3))
    x = conv(x, w4, b4)[..., 0]                                    # (N, H/4, W/4)
    for _ in range(2):                                             # two separate x2 ups
        a = jnp.asarray(_bilinear_matrix(x.shape[1], 2 * x.shape[1]))
        x = jnp.einsum("ph,nhw,qw->npq", a, x, a, precision=hi)
    return x[:, None]


if __name__ == "__main__":
    key = jax.random.PRNGKey(0)
    k_x, k_p = jax.random.split(key)
    x = jax.random.normal(k_x, (2, 1, 16, 16), jnp.float32)
    params = init_params(k_p)

    out = jax.block_until_ready(cnn_model_forward(x, params))
    assert out.shape == (2, 1, 16, 16), out.shape

    ref = jax.block_until_ready(_reference_forward(x, params))
    err = float(jnp.max(jnp.abs(out - ref)))
    scale = float(jnp.max(jnp.abs(ref))) + 1e-6
    assert err <= 0.05 * scale + 1e-3, f"mismatch vs reference: err={err}, scale={scale}"

    print("KERNEL_OK")
</pallas_src>

<mosaic_0001>
module attributes {stable_mosaic.version = 11 : i64} {
  func.func @_fused_cnn_kernel(%arg0: i32, %arg1: memref<1x256x9xf32, #tpu.memory_space<vmem>>, %arg2: memref<9x32xf32, #tpu.memory_space<vmem>>, %arg3: memref<1x32xf32, #tpu.memory_space<vmem>>, %arg4: memref<288x64xf32, #tpu.memory_space<vmem>>, %arg5: memref<1x64xf32, #tpu.memory_space<vmem>>, %arg6: memref<576x128xf32, #tpu.memory_space<vmem>>, %arg7: memref<1x128xf32, #tpu.memory_space<vmem>>, %arg8: memref<9x128xf32, #tpu.memory_space<vmem>>, %arg9: memref<1xf32, #tpu.memory_space<smem>>, %arg10: memref<16x256xf32, #tpu.memory_space<vmem>>, %arg11: memref<1x1x256xf32, #tpu.memory_space<vmem>>, %arg12: memref<10x10x32xf32, #tpu.memory_space<vmem>>, %arg13: memref<6x6x64xf32, #tpu.memory_space<vmem>>, %arg14: memref<6x6x128xf32, #tpu.memory_space<vmem>>) attributes {dimension_semantics = [#tpu.dimension_semantics<parallel>], iteration_bounds = array<i64: 2>, scalar_prefetch = 0 : i64, scratch_operands = 3 : i64, tpu.core_type = #tpu.core_type<tc>, window_params = [{transform_indices = @transform_0, window_bounds = array<i64: 1, 256, 9>}, {pipeline_mode = #tpu.pipeline_mode<synchronous>, transform_indices = @transform_1, window_bounds = array<i64: 9, 32>}, {pipeline_mode = #tpu.pipeline_mode<synchronous>, transform_indices = @transform_2, window_bounds = array<i64: 1, 32>}, {pipeline_mode = #tpu.pipeline_mode<synchronous>, transform_indices = @transform_3, window_bounds = array<i64: 288, 64>}, {pipeline_mode = #tpu.pipeline_mode<synchronous>, transform_indices = @transform_4, window_bounds = array<i64: 1, 64>}, {pipeline_mode = #tpu.pipeline_mode<synchronous>, transform_indices = @transform_5, window_bounds = array<i64: 576, 128>}, {pipeline_mode = #tpu.pipeline_mode<synchronous>, transform_indices = @transform_6, window_bounds = array<i64: 1, 128>}, {pipeline_mode = #tpu.pipeline_mode<synchronous>, transform_indices = @transform_7, window_bounds = array<i64: 9, 128>}, {transform_indices = @transform_8, window_bounds = array<i64: 1>}, {pipeline_mode = #tpu.pipeline_mode<synchronous>, transform_indices = @transform_9, window_bounds = array<i64: 16, 256>}, {transform_indices = @transform_10, window_bounds = array<i64: 1, 1, 256>}]} {
    %c0 = arith.constant 0 : index
    %c0_0 = arith.constant 0 : index
    %c0_1 = arith.constant 0 : index
    %0 = vector.load %arg1[%c0, %c0_0, %c0_1] : memref<1x256x9xf32, #tpu.memory_space<vmem>>, vector<1x256x9xf32>
    %1 = vector.shape_cast %0 : vector<1x256x9xf32> to vector<256x9xf32>
    %c0_2 = arith.constant 0 : index
    %c0_3 = arith.constant 0 : index
    %2 = vector.load %arg2[%c0_2, %c0_3] : memref<9x32xf32, #tpu.memory_space<vmem>>, vector<9x32xf32>
    %cst = arith.constant dense<0.000000e+00> : vector<256x32xf32>
    %3 = tpu.matmul %1, %2, %cst {dimension_numbers = #tpu.dot_dimension_numbers<[1], [0], [0], [1], [0, 0, 1, 1], [], []>} : vector<256x9xf32>, vector<9x32xf32>, vector<256x32xf32> -> vector<256x32xf32>
    %c0_4 = arith.constant 0 : index
    %c0_5 = arith.constant 0 : index
    %4 = vector.load %arg3[%c0_4, %c0_5] : memref<1x32xf32, #tpu.memory_space<vmem>>, vector<1x32xf32>
    %5 = vector.broadcast %4 : vector<1x32xf32> to vector<256x32xf32>
    %6 = arith.addf %3, %5 : vector<256x32xf32>
    %cst_6 = arith.constant 0.000000e+00 : f32
    %7 = vector.broadcast %cst_6 : f32 to vector<256x32xf32>
    %8 = arith.maximumf %6, %7 : vector<256x32xf32>
    %cst_7 = arith.constant 0.000000e+00 : f32
    %9 = vector.broadcast %cst_7 : f32 to vector<1x10x32xf32>
    %cst_8 = arith.constant 0.000000e+00 : f32
    %10 = vector.broadcast %cst_8 : f32 to vector<10x1x32xf32>
    %c0_9 = arith.constant 0 : index
    %c0_10 = arith.constant 0 : index
    %c0_11 = arith.constant 0 : index
    %11 = vector.load %arg12[%c0_9, %c0_10, %c0_11] : memref<10x10x32xf32, #tpu.memory_space<vmem>>, vector<1x10x32xf32>
    tpu.vector_store %arg12[%c0_9, %c0_10, %c0_11], %9 {strides = array<i32>} : memref<10x10x32xf32, #tpu.memory_space<vmem>>, vector<1x10x32xf32>,
    %c9 = arith.constant 9 : index
    %c0_12 = arith.constant 0 : index
    %c0_13 = arith.constant 0 : index
    %12 = vector.load %arg12[%c9, %c0_12, %c0_13] : memref<10x10x32xf32, #tpu.memory_space<vmem>>, vector<1x10x32xf32>
    tpu.vector_store %arg12[%c9, %c0_12, %c0_13], %9 {strides = array<i32>} : memref<10x10x32xf32, #tpu.memory_space<vmem>>, vector<1x10x32xf32>,
    %c0_14 = arith.constant 0 : index
    %c0_15 = arith.constant 0 : index
    %c0_16 = arith.constant 0 : index
    %13 = vector.load %arg12[%c0_14, %c0_15, %c0_16] : memref<10x10x32xf32, #tpu.memory_space<vmem>>, vector<10x1x32xf32>
    tpu.vector_store %arg12[%c0_14, %c0_15, %c0_16], %10 {strides = array<i32>} : memref<10x10x32xf32, #tpu.memory_space<vmem>>, vector<10x1x32xf32>,
    %c0_17 = arith.constant 0 : index
    %c9_18 = arith.constant 9 : index
    %c0_19 = arith.constant 0 : index
    %14 = vector.load %arg12[%c0_17, %c9_18, %c0_19] : memref<10x10x32xf32, #tpu.memory_space<vmem>>, vector<10x1x32xf32>
    tpu.vector_store %arg12[%c0_17, %c9_18, %c0_19], %10 {strides = array<i32>} : memref<10x10x32xf32, #tpu.memory_space<vmem>>, vector<10x1x32xf32>,
    %15 = vector.shape_cast %8 : vector<256x32xf32> to vector<128x2x32xf32>
    %cst_20 = arith.constant dense<0xFF800000> : vector<128x32xf32>
    %16 = vector.multi_reduction <maximumf>, %15, %cst_20 [1] : vector<128x2x32xf32> to vector<128x32xf32>
    %17 = vector.shape_cast %16 : vector<128x32xf32> to vector<8x2x8x32xf32>
    %cst_21 = arith.constant dense<0xFF800000> : vector<8x8x32xf32>
    %18 = vector.multi_reduction <maximumf>, %17, %cst_21 [1] : vector<8x2x8x32xf32> to vector<8x8x32xf32>
    %c1 = arith.constant 1 : index
    %c1_22 = arith.constant 1 : index
    %c0_23 = arith.constant 0 : index
    %19 = vector.load %arg12[%c1, %c1_22, %c0_23] : memref<10x10x32xf32, #tpu.memory_space<vmem>>, vector<8x8x32xf32>
    tpu.vector_store %arg12[%c1, %c1_22, %c0_23], %18 {strides = array<i32>} : memref<10x10x32xf32, #tpu.memory_space<vmem>>, vector<8x8x32xf32>,
    %cst_24 = arith.constant 0.000000e+00 : f32
    %20 = vector.broadcast %cst_24 : f32 to vector<64x64xf32>
    %c0_25 = arith.constant 0 : index
    %c0_26 = arith.constant 0 : index
    %c0_27 = arith.constant 0 : index
    %21 = vector.load %arg12[%c0_25, %c0_26, %c0_27] : memref<10x10x32xf32, #tpu.memory_space<vmem>>, vector<8x8x32xf32>
    %22 = vector.shape_cast %21 : vector<8x8x32xf32> to vector<64x32xf32>
    %c0_28 = arith.constant 0 : index
    %c0_29 = arith.constant 0 : index
    %23 = vector.load %arg4[%c0_28, %c0_29] : memref<288x64xf32, #tpu.memory_space<vmem>>, vector<32x64xf32>
    %cst_30 = arith.constant dense<0.000000e+00> : vector<64x64xf32>
    %24 = tpu.matmul %22, %23, %cst_30 {dimension_numbers = #tpu.dot_dimension_numbers<[1], [0], [0], [1], [0, 0, 1, 1], [], []>} : vector<64x32xf32>, vector<32x64xf32>, vector<64x64xf32> -> vector<64x64xf32>
    %25 = arith.addf %20, %24 : vector<64x64xf32>
    %c0_31 = arith.constant 0 : index
    %c1_32 = arith.constant 1 : index
    %c0_33 = arith.constant 0 : index
    %26 = vector.load %arg12[%c0_31, %c1_32, %c0_33] : memref<10x10x32xf32, #tpu.memory_space<vmem>>, vector<8x8x32xf32>
    %27 = vector.shape_cast %26 : vector<8x8x32xf32> to vector<64x32xf32>
    %c32 = arith.constant 32 : index
    %c0_34 = arith.constant 0 : index
    %28 = vector.load %arg4[%c32, %c0_34] : memref<288x64xf32, #tpu.memory_space<vmem>>, vector<32x64xf32>
    %cst_35 = arith.constant dense<0.000000e+00> : vector<64x64xf32>
    %29 = tpu.matmul %27, %28, %cst_35 {dimension_numbers = #tpu.dot_dimension_numbers<[1], [0], [0], [1], [0, 0, 1, 1], [], []>} : vector<64x32xf32>, vector<32x64xf32>, vector<64x64xf32> -> vector<64x64xf32>
    %30 = arith.addf %25, %29 : vector<64x64xf32>
    %c0_36 = arith.constant 0 : index
    %c2 = arith.constant 2 : index
    %c0_37 = arith.constant 0 : index
    %31 = vector.load %arg12[%c0_36, %c2, %c0_37] : memref<10x10x32xf32, #tpu.memory_space<vmem>>, vector<8x8x32xf32>
    %32 = vector.shape_cast %31 : vector<8x8x32xf32> to vector<64x32xf32>
    %c64 = arith.constant 64 : index
    %c0_38 = arith.constant 0 : index
    %33 = vector.load %arg4[%c64, %c0_38] : memref<288x64xf32, #tpu.memory_space<vmem>>, vector<32x64xf32>
    %cst_39 = arith.constant dense<0.000000e+00> : vector<64x64xf32>
    %34 = tpu.matmul %32, %33, %cst_39 {dimension_numbers = #tpu.dot_dimension_numbers<[1], [0], [0], [1], [0, 0, 1, 1], [], []>} : vector<64x32xf32>, vector<32x64xf32>, vector<64x64xf32> -> vector<64x64xf32>
    %35 = arith.addf %30, %34 : vector<64x64xf32>
    %c1_40 = arith.constant 1 : index
    %c0_41 = arith.constant 0 : index
    %c0_42 = arith.constant 0 : index
    %36 = vector.load %arg12[%c1_40, %c0_41, %c0_42] : memref<10x10x32xf32, #tpu.memory_space<vmem>>, vector<8x8x32xf32>
    %37 = vector.shape_cast %36 : vector<8x8x32xf32> to vector<64x32xf32>
    %c96 = arith.constant 96 : index
    %c0_43 = arith.constant 0 : index
    %38 = vector.load %arg4[%c96, %c0_43] : memref<288x64xf32, #tpu.memory_space<vmem>>, vector<32x64xf32>
    %cst_44 = arith.constant dense<0.000000e+00> : vector<64x64xf32>
    %39 = tpu.matmul %37, %38, %cst_44 {dimension_numbers = #tpu.dot_dimension_numbers<[1], [0], [0], [1], [0, 0, 1, 1], [], []>} : vector<64x32xf32>, vector<32x64xf32>, vector<64x64xf32> -> vector<64x64xf32>
    %40 = arith.addf %35, %39 : vector<64x64xf32>
    %c1_45 = arith.constant 1 : index
    %c1_46 = arith.constant 1 : index
    %c0_47 = arith.constant 0 : index
    %41 = vector.load %arg12[%c1_45, %c1_46, %c0_47] : memref<10x10x32xf32, #tpu.memory_space<vmem>>, vector<8x8x32xf32>
    %42 = vector.shape_cast %41 : vector<8x8x32xf32> to vector<64x32xf32>
    %c128 = arith.constant 128 : index
    %c0_48 = arith.constant 0 : index
    %43 = vector.load %arg4[%c128, %c0_48] : memref<288x64xf32, #tpu.memory_space<vmem>>, vector<32x64xf32>
    %cst_49 = arith.constant dense<0.000000e+00> : vector<64x64xf32>
    %44 = tpu.matmul %42, %43, %cst_49 {dimension_numbers = #tpu.dot_dimension_numbers<[1], [0], [0], [1], [0, 0, 1, 1], [], []>} : vector<64x32xf32>, vector<32x64xf32>, vector<64x64xf32> -> vector<64x64xf32>
    %45 = arith.addf %40, %44 : vector<64x64xf32>
    %c1_50 = arith.constant 1 : index
    %c2_51 = arith.constant 2 : index
    %c0_52 = arith.constant 0 : index
    %46 = vector.load %arg12[%c1_50, %c2_51, %c0_52] : memref<10x10x32xf32, #tpu.memory_space<vmem>>, vector<8x8x32xf32>
    %47 = vector.shape_cast %46 : vector<8x8x32xf32> to vector<64x32xf32>
    %c160 = arith.constant 160 : index
    %c0_53 = arith.constant 0 : index
    %48 = vector.load %arg4[%c160, %c0_53] : memref<288x64xf32, #tpu.memory_space<vmem>>, vector<32x64xf32>
    %cst_54 = arith.constant dense<0.000000e+00> : vector<64x64xf32>
    %49 = tpu.matmul %47, %48, %cst_54 {dimension_numbers = #tpu.dot_dimension_numbers<[1], [0], [0], [1], [0, 0, 1, 1], [], []>} : vector<64x32xf32>, vector<32x64xf32>, vector<64x64xf32> -> vector<64x64xf32>
    %50 = arith.addf %45, %49 : vector<64x64xf32>
    %c2_55 = arith.constant 2 : index
    %c0_56 = arith.constant 0 : index
    %c0_57 = arith.constant 0 : index
    %51 = vector.load %arg12[%c2_55, %c0_56, %c0_57] : memref<10x10x32xf32, #tpu.memory_space<vmem>>, vector<8x8x32xf32>
    %52 = vector.shape_cast %51 : vector<8x8x32xf32> to vector<64x32xf32>
    %c192 = arith.constant 192 : index
    %c0_58 = arith.constant 0 : index
    %53 = vector.load %arg4[%c192, %c0_58] : memref<288x64xf32, #tpu.memory_space<vmem>>, vector<32x64xf32>
    %cst_59 = arith.constant dense<0.000000e+00> : vector<64x64xf32>
    %54 = tpu.matmul %52, %53, %cst_59 {dimension_numbers = #tpu.dot_dimension_numbers<[1], [0], [0], [1], [0, 0, 1, 1], [], []>} : vector<64x32xf32>, vector<32x64xf32>, vector<64x64xf32> -> vector<64x64xf32>
    %55 = arith.addf %50, %54 : vector<64x64xf32>
    %c2_60 = arith.constant 2 : index
    %c1_61 = arith.constant 1 : index
    %c0_62 = arith.constant 0 : index
    %56 = vector.load %arg12[%c2_60, %c1_61, %c0_62] : memref<10x10x32xf32, #tpu.memory_space<vmem>>, vector<8x8x32xf32>
    %57 = vector.shape_cast %56 : vector<8x8x32xf32> to vector<64x32xf32>
    %c224 = arith.constant 224 : index
    %c0_63 = arith.constant 0 : index
    %58 = vector.load %arg4[%c224, %c0_63] : memref<288x64xf32, #tpu.memory_space<vmem>>, vector<32x64xf32>
    %cst_64 = arith.constant dense<0.000000e+00> : vector<64x64xf32>
    %59 = tpu.matmul %57, %58, %cst_64 {dimension_numbers = #tpu.dot_dimension_numbers<[1], [0], [0], [1], [0, 0, 1, 1], [], []>} : vector<64x32xf32>, vector<32x64xf32>, vector<64x64xf32> -> vector<64x64xf32>
    %60 = arith.addf %55, %59 : vector<64x64xf32>
    %c2_65 = arith.constant 2 : index
    %c2_66 = arith.constant 2 : index
    %c0_67 = arith.constant 0 : index
    %61 = vector.load %arg12[%c2_65, %c2_66, %c0_67] : memref<10x10x32xf32, #tpu.memory_space<vmem>>, vector<8x8x32xf32>
    %62 = vector.shape_cast %61 : vector<8x8x32xf32> to vector<64x32xf32>
    %c256 = arith.constant 256 : index
    %c0_68 = arith.constant 0 : index
    %63 = vector.load %arg4[%c256, %c0_68] : memref<288x64xf32, #tpu.memory_space<vmem>>, vector<32x64xf32>
    %cst_69 = arith.constant dense<0.000000e+00> : vector<64x64xf32>
    %64 = tpu.matmul %62, %63, %cst_69 {dimension_numbers = #tpu.dot_dimension_numbers<[1], [0], [0], [1], [0, 0, 1, 1], [], []>} : vector<64x32xf32>, vector<32x64xf32>, vector<64x64xf32> -> vector<64x64xf32>
    %65 = arith.addf %60, %64 : vector<64x64xf32>
    %c0_70 = arith.constant 0 : index
    %c0_71 = arith.constant 0 : index
    %66 = vector.load %arg5[%c0_70, %c0_71] : memref<1x64xf32, #tpu.memory_space<vmem>>, vector<1x64xf32>
    %67 = vector.broadcast %66 : vector<1x64xf32> to vector<64x64xf32>
    %68 = arith.addf %65, %67 : vector<64x64xf32>
    %cst_72 = arith.constant 0.000000e+00 : f32
    %69 = vector.broadcast %cst_72 : f32 to vector<64x64xf32>
    %70 = arith.maximumf %68, %69 : vector<64x64xf32>
    %cst_73 = arith.constant 0.000000e+00 : f32
    %71 = vector.broadcast %cst_73 : f32 to vector<1x6x64xf32>
    %cst_74 = arith.constant 0.000000e+00 : f32
    %72 = vector.broadcast %cst_74 : f32 to vector<6x1x64xf32>
    %c0_75 = arith.constant 0 : index
    %c0_76 = arith.constant 0 : index
    %c0_77 = arith.constant 0 : index
    %73 = vector.load %arg13[%c0_75, %c0_76, %c0_77] : memref<6x6x64xf32, #tpu.memory_space<vmem>>, vector<1x6x64xf32>
    tpu.vector_store %arg13[%c0_75, %c0_76, %c0_77], %71 {strides = array<i32>} : memref<6x6x64xf32, #tpu.memory_space<vmem>>, vector<1x6x64xf32>,
    %c5 = arith.constant 5 : index
    %c0_78 = arith.constant 0 : index
    %c0_79 = arith.constant 0 : index
    %74 = vector.load %arg13[%c5, %c0_78, %c0_79] : memref<6x6x64xf32, #tpu.memory_space<vmem>>, vector<1x6x64xf32>
    tpu.vector_store %arg13[%c5, %c0_78, %c0_79], %71 {strides = array<i32>} : memref<6x6x64xf32, #tpu.memory_space<vmem>>, vector<1x6x64xf32>,
    %c0_80 = arith.constant 0 : index
    %c0_81 = arith.constant 0 : index
    %c0_82 = arith.constant 0 : index
    %75 = vector.load %arg13[%c0_80, %c0_81, %c0_82] : memref<6x6x64xf32, #tpu.memory_space<vmem>>, vector<6x1x64xf32>
    tpu.vector_store %arg13[%c0_80, %c0_81, %c0_82], %72 {strides = array<i32>} : memref<6x6x64xf32, #tpu.memory_space<vmem>>, vector<6x1x64xf32>,
    %c0_83 = arith.constant 0 : index
    %c5_84 = arith.constant 5 : index
    %c0_85 = arith.constant 0 : index
    %76 = vector.load %arg13[%c0_83, %c5_84, %c0_85] : memref<6x6x64xf32, #tpu.memory_space<vmem>>, vector<6x1x64xf32>
    tpu.vector_store %arg13[%c0_83, %c5_84, %c0_85], %72 {strides = array<i32>} : memref<6x6x64xf32, #tpu.memory_space<vmem>>, vector<6x1x64xf32>,
    %77 = vector.shape_cast %70 : vector<64x64xf32> to vector<32x2x64xf32>
    %cst_86 = arith.constant dense<0xFF800000> : vector<32x64xf32>
    %78 = vector.multi_reduction <maximumf>, %77, %cst_86 [1] : vector<32x2x64xf32> to vector<32x64xf32>
    %79 = vector.shape_cast %78 : vector<32x64xf32> to vector<4x2x4x64xf32>
    %cst_87 = arith.constant dense<0xFF800000> : vector<4x4x64xf32>
    %80 = vector.multi_reduction <maximumf>, %79, %cst_87 [1] : vector<4x2x4x64xf32> to vector<4x4x64xf32>
    %c1_88 = arith.constant 1 : index
    %c1_89 = arith.constant 1 : index
    %c0_90 = arith.constant 0 : index
    %81 = vector.load %arg13[%c1_88, %c1_89, %c0_90] : memref<6x6x64xf32, #tpu.memory_space<vmem>>, vector<4x4x64xf32>
    tpu.vector_store %arg13[%c1_88, %c1_89, %c0_90], %80 {strides = array<i32>} : memref<6x6x64xf32, #tpu.memory_space<vmem>>, vector<4x4x64xf32>,
    %cst_91 = arith.constant 0.000000e+00 : f32
    %82 = vector.broadcast %cst_91 : f32 to vector<16x128xf32>
    %c0_92 = arith.constant 0 : index
    %c0_93 = arith.constant 0 : index
    %c0_94 = arith.constant 0 : index
    %83 = vector.load %arg13[%c0_92, %c0_93, %c0_94] : memref<6x6x64xf32, #tpu.memory_space<vmem>>, vector<4x4x64xf32>
    %84 = vector.shape_cast %83 : vector<4x4x64xf32> to vector<16x64xf32>
    %c0_95 = arith.constant 0 : index
    %c0_96 = arith.constant 0 : index
    %85 = vector.load %arg6[%c0_95, %c0_96] : memref<576x128xf32, #tpu.memory_space<vmem>>, vector<64x128xf32>
    %cst_97 = arith.constant dense<0.000000e+00> : vector<16x128xf32>
    %86 = tpu.matmul %84, %85, %cst_97 {dimension_numbers = #tpu.dot_dimension_numbers<[1], [0], [0], [1], [0, 0, 1, 1], [], []>} : vector<16x64xf32>, vector<64x128xf32>, vector<16x128xf32> -> vector<16x128xf32>
    %87 = arith.addf %82, %86 : vector<16x128xf32>
    %c0_98 = arith.constant 0 : index
    %c1_99 = arith.constant 1 : index
    %c0_100 = arith.constant 0 : index
    %88 = vector.load %arg13[%c0_98, %c1_99, %c0_100] : memref<6x6x64xf32, #tpu.memory_space<vmem>>, vector<4x4x64xf32>
    %89 = vector.shape_cast %88 : vector<4x4x64xf32> to vector<16x64xf32>
    %c64_101 = arith.constant 64 : index
    %c0_102 = arith.constant 0 : index
    %90 = vector.load %arg6[%c64_101, %c0_102] : memref<576x128xf32, #tpu.memory_space<vmem>>, vector<64x128xf32>
    %cst_103 = arith.constant dense<0.000000e+00> : vector<16x128xf32>
    %91 = tpu.matmul %89, %90, %cst_103 {dimension_numbers = #tpu.dot_dimension_numbers<[1], [0], [0], [1], [0, 0, 1, 1], [], []>} : vector<16x64xf32>, vector<64x128xf32>, vector<16x128xf32> -> vector<16x128xf32>
    %92 = arith.addf %87, %91 : vector<16x128xf32>
    %c0_104 = arith.constant 0 : index
    %c2_105 = arith.constant 2 : index
    %c0_106 = arith.constant 0 : index
    %93 = vector.load %arg13[%c0_104, %c2_105, %c0_106] : memref<6x6x64xf32, #tpu.memory_space<vmem>>, vector<4x4x64xf32>
    %94 = vector.shape_cast %93 : vector<4x4x64xf32> to vector<16x64xf32>
    %c128_107 = arith.constant 128 : index
    %c0_108 = arith.constant 0 : index
    %95 = vector.load %arg6[%c128_107, %c0_108] : memref<576x128xf32, #tpu.memory_space<vmem>>, vector<64x128xf32>
    %cst_109 = arith.constant dense<0.000000e+00> : vector<16x128xf32>
    %96 = tpu.matmul %94, %95, %cst_109 {dimension_numbers = #tpu.dot_dimension_numbers<[1], [0], [0], [1], [0, 0, 1, 1], [], []>} : vector<16x64xf32>, vector<64x128xf32>, vector<16x128xf32> -> vector<16x128xf32>
    %97 = arith.addf %92, %96 : vector<16x128xf32>
    %c1_110 = arith.constant 1 : index
    %c0_111 = arith.constant 0 : index
    %c0_112 = arith.constant 0 : index
    %98 = vector.load %arg13[%c1_110, %c0_111, %c0_112] : memref<6x6x64xf32, #tpu.memory_space<vmem>>, vector<4x4x64xf32>
    %99 = vector.shape_cast %98 : vector<4x4x64xf32> to vector<16x64xf32>
    %c192_113 = arith.constant 192 : index
    %c0_114 = arith.constant 0 : index
    %100 = vector.load %arg6[%c192_113, %c0_114] : memref<576x128xf32, #tpu.memory_space<vmem>>, vector<64x128xf32>
    %cst_115 = arith.constant dense<0.000000e+00> : vector<16x128xf32>
    %101 = tpu.matmul %99, %100, %cst_115 {dimension_numbers = #tpu.dot_dimension_numbers<[1], [0], [0], [1], [0, 0, 1, 1], [], []>} : vector<16x64xf32>, vector<64x128xf32>, vector<16x128xf32> -> vector<16x128xf32>
    %102 = arith.addf %97, %101 : vector<16x128xf32>
    %c1_116 = arith.constant 1 : index
    %c1_117 = arith.constant 1 : index
    %c0_118 = arith.constant 0 : index
    %103 = vector.load %arg13[%c1_116, %c1_117, %c0_118] : memref<6x6x64xf32, #tpu.memory_space<vmem>>, vector<4x4x64xf32>
    %104 = vector.shape_cast %103 : vector<4x4x64xf32> to vector<16x64xf32>
    %c256_119 = arith.constant 256 : index
    %c0_120 = arith.constant 0 : index
    %105 = vector.load %arg6[%c256_119, %c0_120] : memref<576x128xf32, #tpu.memory_space<vmem>>, vector<64x128xf32>
    %cst_121 = arith.constant dense<0.000000e+00> : vector<16x128xf32>
    %106 = tpu.matmul %104, %105, %cst_121 {dimension_numbers = #tpu.dot_dimension_numbers<[1], [0], [0], [1], [0, 0, 1, 1], [], []>} : vector<16x64xf32>, vector<64x128xf32>, vector<16x128xf32> -> vector<16x128xf32>
    %107 = arith.addf %102, %106 : vector<16x128xf32>
    %c1_122 = arith.constant 1 : index
    %c2_123 = arith.constant 2 : index
    %c0_124 = arith.constant 0 : index
    %108 = vector.load %arg13[%c1_122, %c2_123, %c0_124] : memref<6x6x64xf32, #tpu.memory_space<vmem>>, vector<4x4x64xf32>
    %109 = vector.shape_cast %108 : vector<4x4x64xf32> to vector<16x64xf32>
    %c320 = arith.constant 320 : index
    %c0_125 = arith.constant 0 : index
    %110 = vector.load %arg6[%c320, %c0_125] : memref<576x128xf32, #tpu.memory_space<vmem>>, vector<64x128xf32>
    %cst_126 = arith.constant dense<0.000000e+00> : vector<16x128xf32>
    %111 = tpu.matmul %109, %110, %cst_126 {dimension_numbers = #tpu.dot_dimension_numbers<[1], [0], [0], [1], [0, 0, 1, 1], [], []>} : vector<16x64xf32>, vector<64x128xf32>, vector<16x128xf32> -> vector<16x128xf32>
    %112 = arith.addf %107, %111 : vector<16x128xf32>
    %c2_127 = arith.constant 2 : index
    %c0_128 = arith.constant 0 : index
    %c0_129 = arith.constant 0 : index
    %113 = vector.load %arg13[%c2_127, %c0_128, %c0_129] : memref<6x6x64xf32, #tpu.memory_space<vmem>>, vector<4x4x64xf32>
    %114 = vector.shape_cast %113 : vector<4x4x64xf32> to vector<16x64xf32>
    %c384 = arith.constant 384 : index
    %c0_130 = arith.constant 0 : index
    %115 = vector.load %arg6[%c384, %c0_130] : memref<576x128xf32, #tpu.memory_space<vmem>>, vector<64x128xf32>
    %cst_131 = arith.constant dense<0.000000e+00> : vector<16x128xf32>
    %116 = tpu.matmul %114, %115, %cst_131 {dimension_numbers = #tpu.dot_dimension_numbers<[1], [0], [0], [1], [0, 0, 1, 1], [], []>} : vector<16x64xf32>, vector<64x128xf32>, vector<16x128xf32> -> vector<16x128xf32>
    %117 = arith.addf %112, %116 : vector<16x128xf32>
    %c2_132 = arith.constant 2 : index
    %c1_133 = arith.constant 1 : index
    %c0_134 = arith.constant 0 : index
    %118 = vector.load %arg13[%c2_132, %c1_133, %c0_134] : memref<6x6x64xf32, #tpu.memory_space<vmem>>, vector<4x4x64xf32>
    %119 = vector.shape_cast %118 : vector<4x4x64xf32> to vector<16x64xf32>
    %c448 = arith.constant 448 : index
    %c0_135 = arith.constant 0 : index
    %120 = vector.load %arg6[%c448, %c0_135] : memref<576x128xf32, #tpu.memory_space<vmem>>, vector<64x128xf32>
    %cst_136 = arith.constant dense<0.000000e+00> : vector<16x128xf32>
    %121 = tpu.matmul %119, %120, %cst_136 {dimension_numbers = #tpu.dot_dimension_numbers<[1], [0], [0], [1], [0, 0, 1, 1], [], []>} : vector<16x64xf32>, vector<64x128xf32>, vector<16x128xf32> -> vector<16x128xf32>
    %122 = arith.addf %117, %121 : vector<16x128xf32>
    %c2_137 = arith.constant 2 : index
    %c2_138 = arith.constant 2 : index
    %c0_139 = arith.constant 0 : index
    %123 = vector.load %arg13[%c2_137, %c2_138, %c0_139] : memref<6x6x64xf32, #tpu.memory_space<vmem>>, vector<4x4x64xf32>
    %124 = vector.shape_cast %123 : vector<4x4x64xf32> to vector<16x64xf32>
    %c512 = arith.constant 512 : index
    %c0_140 = arith.constant 0 : index
    %125 = vector.load %arg6[%c512, %c0_140] : memref<576x128xf32, #tpu.memory_space<vmem>>, vector<64x128xf32>
    %cst_141 = arith.constant dense<0.000000e+00> : vector<16x128xf32>
    %126 = tpu.matmul %124, %125, %cst_141 {dimension_numbers = #tpu.dot_dimension_numbers<[1], [0], [0], [1], [0, 0, 1, 1], [], []>} : vector<16x64xf32>, vector<64x128xf32>, vector<16x128xf32> -> vector<16x128xf32>
    %127 = arith.addf %122, %126 : vector<16x128xf32>
    %c0_142 = arith.constant 0 : index
    %c0_143 = arith.constant 0 : index
    %128 = vector.load %arg7[%c0_142, %c0_143] : memref<1x128xf32, #tpu.memory_space<vmem>>, vector<1x128xf32>
    %129 = vector.broadcast %128 : vector<1x128xf32> to vector<16x128xf32>
    %130 = arith.addf %127, %129 : vector<16x128xf32>
    %cst_144 = arith.constant 0.000000e+00 : f32
    %131 = vector.broadcast %cst_144 : f32 to vector<16x128xf32>
    %132 = arith.maximumf %130, %131 : vector<16x128xf32>
    %cst_145 = arith.constant 0.000000e+00 : f32
    %133 = vector.broadcast %cst_145 : f32 to vector<1x6x128xf32>
    %cst_146 = arith.constant 0.000000e+00 : f32
    %134 = vector.broadcast %cst_146 : f32 to vector<6x1x128xf32>
    %c0_147 = arith.constant 0 : index
    %c0_148 = arith.constant 0 : index
    %c0_149 = arith.constant 0 : index
    %135 = vector.load %arg14[%c0_147, %c0_148, %c0_149] : memref<6x6x128xf32, #tpu.memory_space<vmem>>, vector<1x6x128xf32>
    tpu.vector_store %arg14[%c0_147, %c0_148, %c0_149], %133 {strides = array<i32>} : memref<6x6x128xf32, #tpu.memory_space<vmem>>, vector<1x6x128xf32>,
    %c5_150 = arith.constant 5 : index
    %c0_151 = arith.constant 0 : index
    %c0_152 = arith.constant 0 : index
    %136 = vector.load %arg14[%c5_150, %c0_151, %c0_152] : memref<6x6x128xf32, #tpu.memory_space<vmem>>, vector<1x6x128xf32>
    tpu.vector_store %arg14[%c5_150, %c0_151, %c0_152], %133 {strides = array<i32>} : memref<6x6x128xf32, #tpu.memory_space<vmem>>, vector<1x6x128xf32>,
    %c0_153 = arith.constant 0 : index
    %c0_154 = arith.constant 0 : index
    %c0_155 = arith.constant 0 : index
    %137 = vector.load %arg14[%c0_153, %c0_154, %c0_155] : memref<6x6x128xf32, #tpu.memory_space<vmem>>, vector<6x1x128xf32>
    tpu.vector_store %arg14[%c0_153, %c0_154, %c0_155], %134 {strides = array<i32>} : memref<6x6x128xf32, #tpu.memory_space<vmem>>, vector<6x1x128xf32>,
    %c0_156 = arith.constant 0 : index
    %c5_157 = arith.constant 5 : index
    %c0_158 = arith.constant 0 : index
    %138 = vector.load %arg14[%c0_156, %c5_157, %c0_158] : memref<6x6x128xf32, #tpu.memory_space<vmem>>, vector<6x1x128xf32>
    tpu.vector_store %arg14[%c0_156, %c5_157, %c0_158], %134 {strides = array<i32>} : memref<6x6x128xf32, #tpu.memory_space<vmem>>, vector<6x1x128xf32>,
    %139 = vector.shape_cast %132 : vector<16x128xf32> to vector<4x4x128xf32>
    %c1_159 = arith.constant 1 : index
    %c1_160 = arith.constant 1 : index
    %c0_161 = arith.constant 0 : index
    %140 = vector.load %arg14[%c1_159, %c1_160, %c0_161] : memref<6x6x128xf32, #tpu.memory_space<vmem>>, vector<4x4x128xf32>
    tpu.vector_store %arg14[%c1_159, %c1_160, %c0_161], %139 {strides = array<i32>} : memref<6x6x128xf32, #tpu.memory_space<vmem>>, vector<4x4x128xf32>,
    %cst_162 = arith.constant 0.000000e+00 : f32
    %141 = vector.broadcast %cst_162 : f32 to vector<16x128xf32>
    %c0_163 = arith.constant 0 : index
    %c0_164 = arith.constant 0 : index
    %c0_165 = arith.constant 0 : index
    %142 = vector.load %arg14[%c0_163, %c0_164, %c0_165] : memref<6x6x128xf32, #tpu.memory_space<vmem>>, vector<4x4x128xf32>
    %143 = vector.shape_cast %142 : vector<4x4x128xf32> to vector<16x128xf32>
    %c0_166 = arith.constant 0 : index
    %c0_167 = arith.constant 0 : index
    %144 = vector.load %arg8[%c0_166, %c0_167] : memref<9x128xf32, #tpu.memory_space<vmem>>, vector<1x128xf32>
    %145 = vector.broadcast %144 : vector<1x128xf32> to vector<16x128xf32>
    %146 = arith.mulf %143, %145 : vector<16x128xf32>
    %147 = arith.addf %141, %146 : vector<16x128xf32>
    %c0_168 = arith.constant 0 : index
    %c1_169 = arith.constant 1 : index
    %c0_170 = arith.constant 0 : index
    %148 = vector.load %arg14[%c0_168, %c1_169, %c0_170] : memref<6x6x128xf32, #tpu.memory_space<vmem>>, vector<4x4x128xf32>
    %149 = vector.shape_cast %148 : vector<4x4x128xf32> to vector<16x128xf32>
    %c1_171 = arith.constant 1 : index
    %c0_172 = arith.constant 0 : index
    %150 = vector.load %arg8[%c1_171, %c0_172] : memref<9x128xf32, #tpu.memory_space<vmem>>, vector<1x128xf32>
    %151 = vector.broadcast %150 : vector<1x128xf32> to vector<16x128xf32>
    %152 = arith.mulf %149, %151 : vector<16x128xf32>
    %153 = arith.addf %147, %152 : vector<16x128xf32>
    %c0_173 = arith.constant 0 : index
    %c2_174 = arith.constant 2 : index
    %c0_175 = arith.constant 0 : index
    %154 = vector.load %arg14[%c0_173, %c2_174, %c0_175] : memref<6x6x128xf32, #tpu.memory_space<vmem>>, vector<4x4x128xf32>
    %155 = vector.shape_cast %154 : vector<4x4x128xf32> to vector<16x128xf32>
    %c2_176 = arith.constant 2 : index
    %c0_177 = arith.constant 0 : index
    %156 = vector.load %arg8[%c2_176, %c0_177] : memref<9x128xf32, #tpu.memory_space<vmem>>, vector<1x128xf32>
    %157 = vector.broadcast %156 : vector<1x128xf32> to vector<16x128xf32>
    %158 = arith.mulf %155, %157 : vector<16x128xf32>
    %159 = arith.addf %153, %158 : vector<16x128xf32>
    %c1_178 = arith.constant 1 : index
    %c0_179 = arith.constant 0 : index
    %c0_180 = arith.constant 0 : index
    %160 = vector.load %arg14[%c1_178, %c0_179, %c0_180] : memref<6x6x128xf32, #tpu.memory_space<vmem>>, vector<4x4x128xf32>
    %161 = vector.shape_cast %160 : vector<4x4x128xf32> to vector<16x128xf32>
    %c3 = arith.constant 3 : index
    %c0_181 = arith.constant 0 : index
    %162 = vector.load %arg8[%c3, %c0_181] : memref<9x128xf32, #tpu.memory_space<vmem>>, vector<1x128xf32>
    %163 = vector.broadcast %162 : vector<1x128xf32> to vector<16x128xf32>
    %164 = arith.mulf %161, %163 : vector<16x128xf32>
    %165 = arith.addf %159, %164 : vector<16x128xf32>
    %c1_182 = arith.constant 1 : index
    %c1_183 = arith.constant 1 : index
    %c0_184 = arith.constant 0 : index
    %166 = vector.load %arg14[%c1_182, %c1_183, %c0_184] : memref<6x6x128xf32, #tpu.memory_space<vmem>>, vector<4x4x128xf32>
    %167 = vector.shape_cast %166 : vector<4x4x128xf32> to vector<16x128xf32>
    %c4 = arith.constant 4 : index
    %c0_185 = arith.constant 0 : index
    %168 = vector.load %arg8[%c4, %c0_185] : memref<9x128xf32, #tpu.memory_space<vmem>>, vector<1x128xf32>
    %169 = vector.broadcast %168 : vector<1x128xf32> to vector<16x128xf32>
    %170 = arith.mulf %167, %169 : vector<16x128xf32>
    %171 = arith.addf %165, %170 : vector<16x128xf32>
    %c1_186 = arith.constant 1 : index
    %c2_187 = arith.constant 2 : index
    %c0_188 = arith.constant 0 : index
    %172 = vector.load %arg14[%c1_186, %c2_187, %c0_188] : memref<6x6x128xf32, #tpu.memory_space<vmem>>, vector<4x4x128xf32>
    %173 = vector.shape_cast %172 : vector<4x4x128xf32> to vector<16x128xf32>
    %c5_189 = arith.constant 5 : index
    %c0_190 = arith.constant 0 : index
    %174 = vector.load %arg8[%c5_189, %c0_190] : memref<9x128xf32, #tpu.memory_space<vmem>>, vector<1x128xf32>
    %175 = vector.broadcast %174 : vector<1x128xf32> to vector<16x128xf32>
    %176 = arith.mulf %173, %175 : vector<16x128xf32>
    %177 = arith.addf %171, %176 : vector<16x128xf32>
    %c2_191 = arith.constant 2 : index
    %c0_192 = arith.constant 0 : index
    %c0_193 = arith.constant 0 : index
    %178 = vector.load %arg14[%c2_191, %c0_192, %c0_193] : memref<6x6x128xf32, #tpu.memory_space<vmem>>, vector<4x4x128xf32>
    %179 = vector.shape_cast %178 : vector<4x4x128xf32> to vector<16x128xf32>
    %c6 = arith.constant 6 : index
    %c0_194 = arith.constant 0 : index
    %180 = vector.load %arg8[%c6, %c0_194] : memref<9x128xf32, #tpu.memory_space<vmem>>, vector<1x128xf32>
    %181 = vector.broadcast %180 : vector<1x128xf32> to vector<16x128xf32>
    %182 = arith.mulf %179, %181 : vector<16x128xf32>
    %183 = arith.addf %177, %182 : vector<16x128xf32>
    %c2_195 = arith.constant 2 : index
    %c1_196 = arith.constant 1 : index
    %c0_197 = arith.constant 0 : index
    %184 = vector.load %arg14[%c2_195, %c1_196, %c0_197] : memref<6x6x128xf32, #tpu.memory_space<vmem>>, vector<4x4x128xf32>
    %185 = vector.shape_cast %184 : vector<4x4x128xf32> to vector<16x128xf32>
    %c7 = arith.constant 7 : index
    %c0_198 = arith.constant 0 : index
    %186 = vector.load %arg8[%c7, %c0_198] : memref<9x128xf32, #tpu.memory_space<vmem>>, vector<1x128xf32>
    %187 = vector.broadcast %186 : vector<1x128xf32> to vector<16x128xf32>
    %188 = arith.mulf %185, %187 : vector<16x128xf32>
    %189 = arith.addf %183, %188 : vector<16x128xf32>
    %c2_199 = arith.constant 2 : index
    %c2_200 = arith.constant 2 : index
    %c0_201 = arith.constant 0 : index
    %190 = vector.load %arg14[%c2_199, %c2_200, %c0_201] : memref<6x6x128xf32, #tpu.memory_space<vmem>>, vector<4x4x128xf32>
    %191 = vector.shape_cast %190 : vector<4x4x128xf32> to vector<16x128xf32>
    %c8 = arith.constant 8 : index
    %c0_202 = arith.constant 0 : index
    %192 = vector.load %arg8[%c8, %c0_202] : memref<9x128xf32, #tpu.memory_space<vmem>>, vector<1x128xf32>
    %193 = vector.broadcast %192 : vector<1x128xf32> to vector<16x128xf32>
    %194 = arith.mulf %191, %193 : vector<16x128xf32>
    %195 = arith.addf %189, %194 : vector<16x128xf32>
    %cst_203 = arith.constant dense<0.000000e+00> : vector<16xf32>
    %196 = vector.multi_reduction <add>, %195, %cst_203 [1] : vector<16x128xf32> to vector<16xf32>
    %197 = vector.shape_cast %196 : vector<16xf32> to vector<1x16xf32>
    %c0_204 = arith.constant 0 : index
    %198 = memref.load %arg9[%c0_204] : memref<1xf32, #tpu.memory_space<smem>>
    %199 = vector.broadcast %198 : f32 to vector<1x16xf32>
    %200 = arith.addf %197, %199 : vector<1x16xf32>
    %c0_205 = arith.constant 0 : index
    %c0_206 = arith.constant 0 : index
    %201 = vector.load %arg10[%c0_205, %c0_206] : memref<16x256xf32, #tpu.memory_space<vmem>>, vector<16x256xf32>
    %cst_207 = arith.constant dense<0.000000e+00> : vector<1x256xf32>
    %202 = tpu.matmul %200, %201, %cst_207 {dimension_numbers = #tpu.dot_dimension_numbers<[1], [0], [0], [1], [0, 0, 1, 1], [], []>} : vector<1x16xf32>, vector<16x256xf32>, vector<1x256xf32> -> vector<1x256xf32>
    %203 = vector.shape_cast %202 : vector<1x256xf32> to vector<1x1x256xf32>
    %c0_208 = arith.constant 0 : index
    %c0_209 = arith.constant 0 : index
    %c0_210 = arith.constant 0 : index
    %204 = vector.load %arg11[%c0_208, %c0_209, %c0_210] : memref<1x1x256xf32, #tpu.memory_space<vmem>>, vector<1x1x256xf32>
    tpu.vector_store %arg11[%c0_208, %c0_209, %c0_210], %203 {strides = array<i32>} : memref<1x1x256xf32, #tpu.memory_space<vmem>>, vector<1x1x256xf32>,
    return
  }
  func.func @transform_0(%arg0: i32) -> (i32, i32, i32) {
    %c0_i32 = arith.constant 0 : i32
    %c0_i32_0 = arith.constant 0 : i32
    %c0_i32_1 = arith.constant 0 : i32
    return %arg0, %c0_i32, %c0_i32_0 : i32, i32, i32
  }
  func.func @transform_1(%arg0: i32) -> (i32, i32) {
    %c0_i32 = arith.constant 0 : i32
    %c0_i32_0 = arith.constant 0 : i32
    %c0_i32_1 = arith.constant 0 : i32
    return %c0_i32, %c0_i32_0 : i32, i32
  }
  func.func @transform_2(%arg0: i32) -> (i32, i32) {
    %c0_i32 = arith.constant 0 : i32
    %c0_i32_0 = arith.constant 0 : i32
    %c0_i32_1 = arith.constant 0 : i32
    return %c0_i32, %c0_i32_0 : i32, i32
  }
  func.func @transform_3(%arg0: i32) -> (i32, i32) {
    %c0_i32 = arith.constant 0 : i32
    %c0_i32_0 = arith.constant 0 : i32
    %c0_i32_1 = arith.constant 0 : i32
    return %c0_i32, %c0_i32_0 : i32, i32
  }
  func.func @transform_4(%arg0: i32) -> (i32, i32) {
    %c0_i32 = arith.constant 0 : i32
    %c0_i32_0 = arith.constant 0 : i32
    %c0_i32_1 = arith.constant 0 : i32
    return %c0_i32, %c0_i32_0 : i32, i32
  }
  func.func @transform_5(%arg0: i32) -> (i32, i32) {
    %c0_i32 = arith.constant 0 : i32
    %c0_i32_0 = arith.constant 0 : i32
    %c0_i32_1 = arith.constant 0 : i32
    return %c0_i32, %c0_i32_0 : i32, i32
  }
  func.func @transform_6(%arg0: i32) -> (i32, i32) {
    %c0_i32 = arith.constant 0 : i32
    %c0_i32_0 = arith.constant 0 : i32
    %c0_i32_1 = arith.constant 0 : i32
    return %c0_i32, %c0_i32_0 : i32, i32
  }
  func.func @transform_7(%arg0: i32) -> (i32, i32) {
    %c0_i32 = arith.constant 0 : i32
    %c0_i32_0 = arith.constant 0 : i32
    %c0_i32_1 = arith.constant 0 : i32
    return %c0_i32, %c0_i32_0 : i32, i32
  }
  func.func @transform_8(%arg0: i32) -> i32 {
    %c0_i32 = arith.constant 0 : i32
    %c0_i32_0 = arith.constant 0 : i32
    return %c0_i32 : i32
  }
  func.func @transform_9(%arg0: i32) -> (i32, i32) {
    %c0_i32 = arith.constant 0 : i32
    %c0_i32_0 = arith.constant 0 : i32
    %c0_i32_1 = arith.constant 0 : i32
    return %c0_i32, %c0_i32_0 : i32, i32
  }
  func.func @transform_10(%arg0: i32) -> (i32, i32, i32) {
    %c0_i32 = arith.constant 0 : i32
    %c0_i32_0 = arith.constant 0 : i32
    %c0_i32_1 = arith.constant 0 : i32
    return %arg0, %c0_i32, %c0_i32_0 : i32, i32, i32
  }
}

</mosaic_0001>

<bundles_post_ra>
// kernel: cnn_model_forward.1
= control target key start
LH: loop header
LB: loop body
LE: loop exit
PB: predicated region body
PF: predicated region fallthrough
CT: control target
= control target key end

     0   :  { %s7059_s15 = smov 0   ;;  %s8908_s0 = inlined_call_operand.vmem [shape: f32[2,256,9], index: 0, kind: input, shape index: {}]   ;;  %s8909_s1 = inlined_call_operand.vmem [shape: f32[9,32], index: 1, kind: input, shape index: {}]   ;;  %s8910_s2 = inlined_call_operand.vmem [shape: f32[1,32], index: 2, kind: input, shape index: {}]   ;;  %s8911_s3 = inlined_call_operand.vmem [shape: f32[288,64], index: 3, kind: input, shape index: {}]   ;;  %s8912_s4 = inlined_call_operand.vmem [shape: f32[1,64], index: 4, kind: input, shape index: {}]   ;;  %s8913_s5 = inlined_call_operand.vmem [shape: f32[576,128], index: 5, kind: input, shape index: {}]   ;;  %s8914_s6 = inlined_call_operand.vmem [shape: f32[1,128], index: 6, kind: input, shape index: {}]   ;;  %s8915_s7 = inlined_call_operand.vmem [shape: f32[9,128], index: 7, kind: input, shape index: {}]   ;;  %s8916_s8 = inlined_call_operand.<no memory space> [shape: f32[1], index: 8, kind: input, shape index: {}]   ;;  %s8917_s9 = inlined_call_operand.vmem [shape: f32[16,256], index: 9, kind: input, shape index: {}]   ;;  %s8918_s10 = inlined_call_operand.vmem [shape: f32[2,1,256], index: 10, kind: output, shape index: {}]  }
   0x1   :  { %15 = sst [smem:[#allocation5]] %s8916_s8 }
   0x2 LB: > { %s5867_s16 = sadd.s32 4294967295, %s6995_s15   ;;  %p5871_p0 = scmp.ge.s32.totalorder %s6995_s15, 1  ;;  %s6995_s15 = sphi %s7059_s15, %s21_s15  }
   0x3   : > { %p313_p1 = scmp.lt.s32.totalorder %s6995_s15, 3 }
   0x5   : > { %p314_p2 = pnand %p5871_p0, %p313_p1 }
   0x7   : > { %317 = sbr.rel (%p314_p2) target bundleno = 1720 (0x6b8), region = 60 }
   0xe   : > { %v391_v0 = vld [vmem:[%s8909_s1] sm:$0xff]  ;;  %v392_v1 = vld [vmem:[%s8909_s1 + $0x8] sm:$0x1]  ;;  %vm497_vm0 = vcmask 1040384   ;;  %p350_p3 = scmp.lt.s32.totalorder %s5867_s16, 1  ;;  %vm6997_vm1 = vmmov 1   ;;  %v8919_v37 = vlaneseq }
   0xf   : > { %v6649_v2 = vpack.c.bf16 %v392_v1, %v391_v0  ;;  %vm6650_vm2 = vmpackc.low %vm497_vm0, %vm6997_vm1  ;;  %vm400_vm3 = vcmask 72704   ;;  %v6998_v35 = vmov 1983009808   ;;  %v7151_v40 = vld [vmem:[%s8910_s2] ss:$0 sm:$0xff]  ;;  %vm760_vm4 = vcmask 254976  }
  0x10   : > { %s8939_s16 = smov (!%p350_p3, %s5867_s16), 1  ;;  %v820_v36 = vunpack.c.l.s4 %v6998_v35  ;;  %v7146_v39 = vshrl.u32 %v8919_v37, 7  ;;  %vm758_vm5 = vcmask 261120   ;;  %vm2642_vm6 = vcmask 1041409   ;;  %s5694_s29 = sld [smem:[#allocation5]] }
  0x11   : > { %6651 = vmatprep.subr.msk.bf16.mxu0 %vm6650_vm2, %v6649_v2  ;;  %6875 = vmatprep.subr.msk.bf16.mxu1 %vm6650_vm2, %v6649_v2  ;;  %s6013_s20 = sshll.u32 %s8939_s16, 8  ;;  %vm2644_vm7 = vcmask 1042434   ;;  %vm2646_vm8 = vcmask 1043459   ;;  %vm2648_vm9 = vcmask 1044484   ;;  %vm2650_vm10 = vcmask 1045509   ;;  %s5874_s30 = sshll.u32 %s8939_s16, 1 }
  0x12   : > { %6654 = vmatpush3.bf16.msk.msra.mxu0 %vm6650_vm2, %v6649_v2  ;;  %6876 = vmatpush3.bf16.msk.msra.mxu1 %vm6650_vm2, %v6649_v2  ;;  %s7079_s23 = scalar_lea.vmem %s8908_s0, %s6013_s20  ;;  %v821_v38 = vunpack.c.0.s8 %v820_v36  ;;  %8923 = vst [vmem:[#allocation6_spill] sm:$0xff] %v7146_v39  ;;  %vm2652_vm11 = vcmask 1046534   ;;  %vm2654_vm12 = vcmask 1047559   ;;  %vm765_vm13 = vcmask 253952   ;;  %s358_s13 = scalar_lea.vmem %s8918_s10, %s5874_s30 }
  0x13   : > { %v359_v3 = vld [vmem:[%s7079_s23] sm:$0xff]  ;;  %v360_v4 = vld [vmem:[%s7079_s23 + $0x8] sm:$0xff]  ;;  %v361_v5 = vld [vmem:[%s7079_s23 + $0x10] sm:$0xff]  ;;  %vm4071_vm14 = vcmask 521216   ;;  %vm4075_vm15 = vcmask 516096   ;;  %vm4264_vm0 = vcmask 517120  }
  0x14   : > { %6250 = vmatprep.mubr.msk.f32.mxu0 %vm400_vm3, %v359_v3  ;;  %v379_v6 = vld [vmem:[%s7079_s23 + $0xa0] sm:$0xff]  ;;  %v362_v7 = vld [vmem:[%s7079_s23 + $0x18] sm:$0xff]  ;;  %v380_v8 = vld [vmem:[%s7079_s23 + $0xa8] sm:$0xff]  ;;  %v7155_v43 = vsub.s32 %v821_v38, %v7146_v39  ;;  %vm4489_vm1 = vcmask 523264   ;;  %vm4571_vm2 = vcmask 519168  }
  0x15   : > { %6251 = vmatmul.mubr.msk.f32.vlgmr.msra.gmra.mrb[0].mxu0 %vm400_vm3, %v360_v4  ;;  %6280 = vmatprep.mubr.msk.f32.mxu1 %vm400_vm3, %v379_v6  ;;  %v381_v9 = vld [vmem:[%s7079_s23 + $0xb0] sm:$0xff]  ;;  %v363_v10 = vld [vmem:[%s7079_s23 + $0x20] sm:$0xff]  ;;  %v382_v11 = vld [vmem:[%s7079_s23 + $0xb8] sm:$0xff] }
  0x16   : > { %6253 = vmatprep.mubr.msk.f32.mxu0 %vm400_vm3, %v361_v5  ;;  %6281 = vmatmul.mubr.msk.f32.vlgmr.msra.gmra.mrb[0].mxu1 %vm400_vm3, %v380_v8  ;;  %v383_v12 = vld [vmem:[%s7079_s23 + $0xc0] sm:$0xff]  ;;  %v364_v13 = vld [vmem:[%s7079_s23 + $0x28] sm:$0xff]  ;;  %v365_v14 = vld [vmem:[%s7079_s23 + $0x30] sm:$0xff] }
  0x17   : > { %6283 = vmatprep.mubr.msk.f32.mxu1 %vm400_vm3, %v381_v9  ;;  %v384_v15 = vld [vmem:[%s7079_s23 + $0xc8] sm:$0xff]  ;;  %v385_v16 = vld [vmem:[%s7079_s23 + $0xd0] sm:$0xff]  ;;  %v366_v17 = vld [vmem:[%s7079_s23 + $0x38] sm:$0xff] }
  0x18   : > { %v367_v18 = vld [vmem:[%s7079_s23 + $0x40] sm:$0xff]  ;;  %v386_v19 = vld [vmem:[%s7079_s23 + $0xd8] sm:$0xff]  ;;  %v368_v21 = vld [vmem:[%s7079_s23 + $0x48] sm:$0xff] }
  0x19   : > { %6254 = vmatmul.mubr.msk.f32.gmra.mrb[2].mxu0 %vm400_vm3, %v362_v7  ;;  %v387_v20 = vld [vmem:[%s7079_s23 + $0xe0] sm:$0xff]  ;;  %v369_v22 = vld [vmem:[%s7079_s23 + $0x50] sm:$0xff]  ;;  %v388_v23 = vld [vmem:[%s7079_s23 + $0xe8] sm:$0xff] }
  0x1a   : > { %6256 = vmatprep.mubr.msk.f32.mxu0 %vm400_vm3, %v363_v10  ;;  %6284 = vmatmul.mubr.msk.f32.gmra.mrb[2].mxu1 %vm400_vm3, %v382_v11  ;;  %v389_v24 = vld [vmem:[%s7079_s23 + $0xf0] sm:$0xff]  ;;  %v370_v25 = vld [vmem:[%s7079_s23 + $0x58] sm:$0xff]  ;;  %v371_v26 = vld [vmem:[%s7079_s23 + $0x60] sm:$0xff] }
  0x1b   : > { %6286 = vmatprep.mubr.msk.f32.mxu1 %vm400_vm3, %v383_v12  ;;  %v390_v27 = vld [vmem:[%s7079_s23 + $0xf8] sm:$0xff]  ;;  %v372_v28 = vld [vmem:[%s7079_s23 + $0x68] sm:$0xff]  ;;  %v373_v29 = vld [vmem:[%s7079_s23 + $0x70] sm:$0xff] }
  0x1c   : > { %v374_v30 = vld [vmem:[%s7079_s23 + $0x78] sm:$0xff]  ;;  %v375_v31 = vld [vmem:[%s7079_s23 + $0x80] sm:$0xff]  ;;  %v376_v32 = vld [vmem:[%s7079_s23 + $0x88] sm:$0xff] }
  0x1d   : > { %6257 = vmatmul.mubr.msk.f32.gmra.mrb[4].mxu0 %vm400_vm3, %v364_v13  ;;  %v377_v33 = vld [vmem:[%s7079_s23 + $0x90] sm:$0xff]  ;;  %v378_v34 = vld [vmem:[%s7079_s23 + $0x98] sm:$0xff] }
  0x1e   : > { %6259 = vmatprep.mubr.msk.f32.mxu0 %vm400_vm3, %v365_v14  ;;  %6287 = vmatmul.mubr.msk.f32.gmra.mrb[4].mxu1 %vm400_vm3, %v384_v15 }
  0x1f   : > { %6289 = vmatprep.mubr.msk.f32.mxu1 %vm400_vm3, %v385_v16 }
  0x21   : > { %6260 = vmatmul.mubr.msk.f32.gmra.mrb[6].mxu0 %vm400_vm3, %v366_v17 }
  0x22   : > { %6262 = vmatprep.mubr.msk.f32.mxu0 %vm400_vm3, %v367_v18  ;;  %6290 = vmatmul.mubr.msk.f32.gmra.mrb[6].mxu1 %vm400_vm3, %v386_v19 }
  0x23   : > { %6292 = vmatprep.mubr.msk.f32.mxu1 %vm400_vm3, %v387_v20 }
  0x25   : > { %6263 = vmatmul.mubr.msk.f32.gmra.mrb[8].mxu0 %vm400_vm3, %v368_v21 }
  0x26   : > { %6265 = vmatprep.mubr.msk.f32.mxu0 %vm400_vm3, %v369_v22  ;;  %6293 = vmatmul.mubr.msk.f32.gmra.mrb[8].mxu1 %vm400_vm3, %v388_v23 }
  0x27   : > { %6295 = vmatprep.mubr.msk.f32.mxu1 %vm400_vm3, %v389_v24 }
  0x29   : > { %6266 = vmatmul.mubr.msk.f32.gmra.mrb[10].mxu0 %vm400_vm3, %v370_v25 }
  0x2a   : > { %6268 = vmatprep.mubr.msk.f32.mxu0 %vm400_vm3, %v371_v26  ;;  %6296 = vmatmul.mubr.msk.f32.gmra.mrb[10].mxu1 %vm400_vm3, %v390_v27 }
  0x2d   : > { %6269 = vmatmul.mubr.msk.f32.gmra.mrb[12].mxu0 %vm400_vm3, %v372_v28 }
  0x2e   : > { %6271 = vmatprep.mubr.msk.f32.mxu0 %vm400_vm3, %v373_v29 }
  0x31   : > { %6272 = vmatmul.mubr.msk.f32.gmra.mrb[14].mxu0 %vm400_vm3, %v374_v30 }
  0x32   : > { %6274 = vmatprep.mubr.msk.f32.mxu0 %vm400_vm3, %v375_v31 }
  0x35   : > { %6275 = vmatmul.mubr.msk.f32.gmra.mrb[16].mxu0 %vm400_vm3, %v376_v32 }
  0x36   : > { %6277 = vmatprep.mubr.msk.f32.mxu0 %vm400_vm3, %v377_v33 }
  0x39   : > { %6278 = vmatmul.mubr.msk.f32.gmra.mrb[18].mxu0 %vm400_vm3, %v378_v34  ;;  %vm5715_vm3 = vcmask 130112  }
  0xe8   : > { %v6252_v41 = vpop.f32.mrb[0].mxu0 }
  0xe9   : > { %v573_v42 = vadd.f32 %v6252_v41, %v7151_v40  ;;  %v567_v44 = vpop.f32.mrb[1].mxu0  ;;  %v6282_v46 = vpop.f32.mrb[0].mxu1 }
  0xea   : > { %v568_v45 = vadd.f32 %v7151_v40, %v567_v44  ;;  %v673_v48 = vadd.f32 %v6282_v46, %v7151_v40  ;;  %v667_v49 = vpop.f32.mrb[1].mxu1 }
  0xeb   : > { %v727_v47 = vmax.f32 %v573_v42, 0.0  ;;  %v668_v52 = vadd.f32 %v7151_v40, %v667_v49 }
  0xec   : > { %v726_v50 = vmax.f32 %v568_v45, 0.0  ;;  %v6255_v51 = vpop.f32.mrb[2].mxu0  ;;  %v7162_v57 = vmax.f32 %v673_v48, 0.0 }
  0xed   : > { %v835_v53 = vcombine.high %v727_v47, %v727_v47  ;;  %v842_v54 = vrot.slane %v727_v47, %v7155_v43  ;;  %v583_v55 = vadd.f32 %v6255_v51, %v7151_v40  ;;  %v577_v56 = vpop.f32.mrb[3].mxu0  ;;  %v7168_v61 = vmax.f32 %v668_v52, 0.0  ;;  %v7170_v62 = vpop.f32.mrb[2].mxu1 }
  0xee   : > { %v818_v58 = vcombine.high %v726_v50, %v726_v50  ;;  %v825_v59 = vrot.slane %v726_v50, %v7155_v43  ;;  %v7166_v60 = vadd.f32 %v7151_v40, %v577_v56  ;;  %v7176_v3 = vpop.f32.mrb[3].mxu1 }
  0xef   : > { %v849_v63 = vrot.slane %v835_v53, %v7155_v43  ;;  %v850_v0 = vcombine.high %v842_v54, %v842_v54  ;;  %v1518_v1 = vsel %vm760_vm4, %v842_v54, -inf  ;;  %v7174_v2 = vmax.f32 %v583_v55, 0.0 }
  0xf0   : > { %v1519_v4 = vrot.slane %v1518_v1, 4  ;;  %v832_v5 = vrot.slane %v818_v58, %v7155_v43  ;;  %v833_v6 = vcombine.high %v825_v59, %v825_v59  ;;  %v1490_v7 = vsel %vm760_vm4, %v825_v59, -inf  ;;  %v7180_v8 = vpop.f32.mrb[4].mxu0 }
  0xf1   : > { %v851_v9 = vcombine.high %v849_v63, %v849_v63  ;;  %v1525_v10 = vsel %vm760_vm4, %v850_v0, -inf  ;;  %v1532_v11 = vsel %vm760_vm4, %v849_v63, -inf  ;;  %v1491_v12 = vrot.slane %v1490_v7, 4  ;;  %v7184_v13 = vpop.f32.mrb[5].mxu0 }
  0xf2   : > { %v1520_v14 = vmax.f32 %v1518_v1, %v1519_v4  ;;  %v1526_v15 = vrot.slane %v1525_v10, 4  ;;  %v1533_v16 = vrot.slane %v1532_v11, 4  ;;  %v834_v17 = vcombine.high %v832_v5, %v832_v5 }
  0xf3   : > { %v1539_v18 = vsel %vm760_vm4, %v851_v9, -inf  ;;  %v1492_v19 = vmax.f32 %v1490_v7, %v1491_v12  ;;  %v1497_v20 = vsel %vm760_vm4, %v833_v6, -inf  ;;  %v1504_v21 = vsel %vm760_vm4, %v832_v5, -inf }
  0xf4   : > { %v1521_v22 = vrot.slane %v1520_v14, 2  ;;  %v1527_v23 = vmax.f32 %v1525_v10, %v1526_v15  ;;  %v1534_v24 = vmax.f32 %v1532_v11, %v1533_v16  ;;  %v1540_v25 = vrot.slane %v1539_v18, 4  ;;  %v7189_v26 = vpop.f32.mrb[6].mxu0 }
  0xf5   : > { %v1493_v27 = vrot.slane %v1492_v19, 2  ;;  %v1498_v28 = vrot.slane %v1497_v20, 4  ;;  %v1505_v29 = vrot.slane %v1504_v21, 4  ;;  %v1511_v30 = vsel %vm760_vm4, %v834_v17, -inf  ;;  %v7192_v31 = vpop.f32.mrb[7].mxu0 }
  0xf6   : > { %v1522_v32 = vmax.f32 %v1520_v14, %v1521_v22  ;;  %v1528_v33 = vrot.slane %v1527_v23, 2  ;;  %v1535_v34 = vrot.slane %v1534_v24, 2  ;;  %v1541_v35 = vmax.f32 %v1539_v18, %v1540_v25 }
  0xf7   : > { %v1494_v36 = vmax.f32 %v1492_v19, %v1493_v27  ;;  %v1499_v38 = vmax.f32 %v1497_v20, %v1498_v28  ;;  %v1506_v41 = vmax.f32 %v1504_v21, %v1505_v29  ;;  %v1512_v42 = vrot.slane %v1511_v30, 4 }
  0xf8   : > { %v1523_v44 = vrot.slane %v1522_v32, 1  ;;  %v1529_v45 = vmax.f32 %v1527_v23, %v1528_v33  ;;  %v1536_v46 = vmax.f32 %v1534_v24, %v1535_v34  ;;  %v1542_v47 = vrot.slane %v1541_v35, 2  ;;  %v7194_v48 = vpop.f32.mrb[8].mxu0 }
  0xf9   : > { %v1495_v49 = vrot.slane %v1494_v36, 1  ;;  %v1500_v50 = vrot.slane %v1499_v38, 2  ;;  %v1507_v51 = vrot.slane %v1506_v41, 2  ;;  %v1513_v52 = vmax.f32 %v1511_v30, %v1512_v42  ;;  %v7196_v53 = vpop.f32.mrb[9].mxu0 }
  0xfa   : > { %v1524_v54 = vmax.f32 %v1522_v32, %v1523_v44  ;;  %v1530_v55 = vrot.slane %v1529_v45, 1  ;;  %v1537_v56 = vrot.slane %v1536_v46, 1  ;;  %v1543_v58 = vmax.f32 %v1541_v35, %v1542_v47 }
  0xfb   : > { %v1496_v59 = vmax.f32 %v1494_v36, %v1495_v49  ;;  %v1501_v63 = vmax.f32 %v1499_v38, %v1500_v50  ;;  %v1508_v0 = vmax.f32 %v1506_v41, %v1507_v51  ;;  %v1514_v1 = vrot.slane %v1513_v52, 2 }
  0xfc   : > { %v1531_v4 = vmax.f32 %v1529_v45, %v1530_v55  ;;  %v1538_v5 = vmax.f32 %v1536_v46, %v1537_v56  ;;  %v1544_v6 = vrot.slane %v1543_v58, 1  ;;  %v7199_v7 = vsel %vm758_vm5, %v1524_v54, -inf  ;;  %v7201_v9 = vpop.f32.mrb[10].mxu0 }
  0xfd   : > { %v1502_v10 = vrot.slane %v1501_v63, 1  ;;  %v1509_v11 = vrot.slane %v1508_v0, 1  ;;  %v1515_v12 = vmax.f32 %v1513_v52, %v1514_v1  ;;  %v7204_v14 = vsel %vm758_vm5, %v1496_v59, -inf  ;;  %v7206_v15 = vpop.f32.mrb[11].mxu0  ;;  %v7242_v52 = vpop.f32.mrb[4].mxu1 }
  0xfe   : > { %v1545_v16 = vmax.f32 %v1543_v58, %v1544_v6  ;;  %v7209_v17 = vsel %vm758_vm5, %v1531_v4, -inf  ;;  %v7212_v18 = vsel %vm758_vm5, %v1538_v5, -inf  ;;  %v869_v19 = vcombine.high %v7174_v2, %v7174_v2  ;;  %v7245_v59 = vpop.f32.mrb[5].mxu1 }
  0xff   : > { %v1503_v20 = vmax.f32 %v1501_v63, %v1502_v10  ;;  %v1510_v21 = vmax.f32 %v1508_v0, %v1509_v11  ;;  %v1516_v22 = vrot.slane %v1515_v12, 1  ;;  %v876_v23 = vrot.slane %v7174_v2, %v7155_v43 }
 0x100   : > { %v7219_v24 = vsel %vm758_vm5, %v1545_v16, -inf  ;;  %v883_v25 = vrot.slane %v869_v19, %v7155_v43  ;;  %v728_v27 = vmax.f32 %v7166_v60, 0.0  ;;  %v593_v28 = vadd.f32 %v7180_v8, %v7151_v40 }
 0x101   : > { %v1517_v29 = vmax.f32 %v1515_v12, %v1516_v22  ;;  %v7226_v30 = vsel %vm758_vm5, %v1503_v20, -inf  ;;  %v7229_v32 = vsel %vm758_vm5, %v1510_v21, -inf  ;;  %v884_v33 = vcombine.high %v876_v23, %v876_v23 }
 0x102   : > { %v885_v34 = vcombine.high %v883_v25, %v883_v25  ;;  %v1574_v2 = vsel %vm760_vm4, %v876_v23, -inf  ;;  %v1588_v35 = vsel %vm760_vm4, %v883_v25, -inf  ;;  %v852_v36 = vcombine.high %v728_v27, %v728_v27 }
 0x103   : > { %v7234_v38 = vsel %vm758_vm5, %v1517_v29, -inf  ;;  %v1575_v60 = vrot.slane %v1574_v2, 4  ;;  %v1581_v8 = vsel %vm760_vm4, %v884_v33, -inf  ;;  %v1589_v41 = vrot.slane %v1588_v35, 4 }
 0x104   : > { %v1582_v42 = vrot.slane %v1581_v8, 4  ;;  %v1595_v44 = vsel %vm760_vm4, %v885_v34, -inf  ;;  %v859_v45 = vrot.slane %v728_v27, %v7155_v43  ;;  %v866_v46 = vrot.slane %v852_v36, %v7155_v43 }
 0x105   : > { %v1576_v47 = vmax.f32 %v1574_v2, %v1575_v60  ;;  %v1590_v49 = vmax.f32 %v1588_v35, %v1589_v41  ;;  %v1596_v50 = vrot.slane %v1595_v44, 4  ;;  %v7240_v51 = vmax.f32 %v593_v28, 0.0 }
 0x106   : > { %v1583_v54 = vmax.f32 %v1581_v8, %v1582_v42  ;;  %v867_v55 = vcombine.high %v859_v45, %v859_v45  ;;  %v868_v56 = vcombine.high %v866_v46, %v866_v46  ;;  %v1546_v58 = vsel %vm760_vm4, %v859_v45, -inf }
 0x107   : > { %v1577_v63 = vrot.slane %v1576_v47, 2  ;;  %v1591_v0 = vrot.slane %v1590_v49, 2  ;;  %v1597_v1 = vmax.f32 %v1595_v44, %v1596_v50  ;;  %v1547_v4 = vrot.slane %v1546_v58, 4 }
 0x108   : > { %v1584_v5 = vrot.slane %v1583_v54, 2  ;;  %v1553_v6 = vsel %vm760_vm4, %v867_v55, -inf  ;;  %v1560_v10 = vsel %vm760_vm4, %v866_v46, -inf  ;;  %v1567_v11 = vsel %vm760_vm4, %v868_v56, -inf }
 0x109   : > { %v1578_v12 = vmax.f32 %v1576_v47, %v1577_v63  ;;  %v1592_v16 = vmax.f32 %v1590_v49, %v1591_v0  ;;  %v1598_v19 = vrot.slane %v1597_v1, 2  ;;  %v1548_v20 = vmax.f32 %v1546_v58, %v1547_v4 }
 0x10a   : > { %v1585_v21 = vmax.f32 %v1583_v54, %v1584_v5  ;;  %v1554_v22 = vrot.slane %v1553_v6, 4  ;;  %v1561_v23 = vrot.slane %v1560_v10, 4  ;;  %v1568_v25 = vrot.slane %v1567_v11, 4 }
 0x10b   : > { %v1579_v27 = vrot.slane %v1578_v12, 1  ;;  %v1593_v28 = vrot.slane %v1592_v16, 1  ;;  %v1599_v29 = vmax.f32 %v1597_v1, %v1598_v19  ;;  %v1549_v33 = vrot.slane %v1548_v20, 2 }
 0x10c   : > { %v1586_v34 = vrot.slane %v1585_v21, 1  ;;  %v1555_v2 = vmax.f32 %v1553_v6, %v1554_v22  ;;  %v1562_v35 = vmax.f32 %v1560_v10, %v1561_v23  ;;  %v1569_v36 = vmax.f32 %v1567_v11, %v1568_v25 }
 0x10d   : > { %v1580_v60 = vmax.f32 %v1578_v12, %v1579_v27  ;;  %v1594_v8 = vmax.f32 %v1592_v16, %v1593_v28  ;;  %v1600_v41 = vrot.slane %v1599_v29, 1  ;;  %v1550_v42 = vmax.f32 %v1548_v20, %v1549_v33 }
 0x10e   : > { %v1587_v44 = vmax.f32 %v1585_v21, %v1586_v34  ;;  %v1556_v45 = vrot.slane %v1555_v2, 2  ;;  %v1563_v46 = vrot.slane %v1562_v35, 2  ;;  %v1570_v47 = vrot.slane %v1569_v36, 2 }
 0x10f   : > { %v1601_v49 = vmax.f32 %v1599_v29, %v1600_v41  ;;  %v2399_v50 = vsel %vm758_vm5, %v1580_v60, -inf  ;;  %v7252_v54 = vsel %vm758_vm5, %v1594_v8, -inf  ;;  %v1551_v55 = vrot.slane %v1550_v42, 1 }
 0x110   : > { %v2400_v56 = vmax.f32 %v7199_v7, %v2399_v50  ;;  %v2402_v58 = vsel %vm758_vm5, %v1587_v44, -inf  ;;  %v2406_v63 = vmax.f32 %v7212_v18, %v7252_v54  ;;  %v1557_v0 = vmax.f32 %v1555_v2, %v1556_v45 }
 0x111   : > { %v2403_v1 = vmax.f32 %v7209_v17, %v2402_v58  ;;  %v2408_v4 = vsel %vm758_vm5, %v1601_v49, -inf  ;;  %v1552_v5 = vmax.f32 %v1550_v42, %v1551_v55  ;;  %v1564_v6 = vmax.f32 %v1562_v35, %v1563_v46 }
 0x112   : > { %v2409_v10 = vmax.f32 %v7219_v24, %v2408_v4  ;;  %v1558_v11 = vrot.slane %v1557_v0, 1  ;;  %v1571_v12 = vmax.f32 %v1569_v36, %v1570_v47  ;;  %v903_v7 = vcombine.high %v7240_v51, %v7240_v51 }
 0x113   : > { %v1565_v16 = vrot.slane %v1564_v6, 1  ;;  %v2387_v18 = vsel %vm758_vm5, %v1552_v5, -inf  ;;  %v910_v17 = vrot.slane %v7240_v51, %v7155_v43  ;;  %v588_v19 = vadd.f32 %v7151_v40, %v7184_v13 }
 0x114   : > { %v1559_v20 = vmax.f32 %v1557_v0, %v1558_v11  ;;  %v1572_v21 = vrot.slane %v1571_v12, 1  ;;  %v2388_v24 = vmax.f32 %v7204_v14, %v2387_v18  ;;  %v917_v22 = vrot.slane %v903_v7, %v7155_v43 }
 0x115   : > { %v1566_v23 = vmax.f32 %v1564_v6, %v1565_v16  ;;  %v918_v25 = vcombine.high %v910_v17, %v910_v17  ;;  %v1630_v27 = vsel %vm760_vm4, %v910_v17, -inf  ;;  %v730_v28 = vmax.f32 %v588_v19, 0.0 }
 0x116   : > { %v1573_v29 = vmax.f32 %v1571_v12, %v1572_v21  ;;  %v2390_v33 = vsel %vm758_vm5, %v1559_v20, -inf  ;;  %v919_v34 = vcombine.high %v917_v22, %v917_v22  ;;  %v1631_v51 = vrot.slane %v1630_v27, 4 }
 0x117   : > { %v2391_v2 = vmax.f32 %v7226_v30, %v2390_v33  ;;  %v2393_v13 = vsel %vm758_vm5, %v1566_v23, -inf  ;;  %v1637_v35 = vsel %vm760_vm4, %v918_v25, -inf  ;;  %v1644_v14 = vsel %vm760_vm4, %v917_v22, -inf  ;;  %v7281_v30 = vpop.f32.mrb[12].mxu0  ;;  %v7292_v23 = vpop.f32.mrb[6].mxu1 }
 0x118   : > { %v2394_v36 = vmax.f32 %v7229_v32, %v2393_v13  ;;  %v2396_v60 = vsel %vm758_vm5, %v1573_v29, -inf  ;;  %v1632_v8 = vmax.f32 %v1630_v27, %v1631_v51  ;;  %v1638_v41 = vrot.slane %v1637_v35, 4 }
 0x119   : > { %v2397_v42 = vmax.f32 %v7234_v38, %v2396_v60  ;;  %v2643_v44 = vsel %vm2642_vm6, %v2391_v2, %v2388_v24  ;;  %v1645_v45 = vrot.slane %v1644_v14, 4  ;;  %v1651_v46 = vsel %vm760_vm4, %v919_v34, -inf }
 0x11a   : > { %v2645_v47 = vsel %vm2644_vm7, %v2394_v36, %v2643_v44  ;;  %v1633_v49 = vrot.slane %v1632_v8, 2  ;;  %v1639_v50 = vmax.f32 %v1637_v35, %v1638_v41  ;;  %v1652_v54 = vrot.slane %v1651_v46, 4 }
 0x11b   : > { %v2647_v32 = vsel %vm2646_vm8, %v2397_v42, %v2645_v47  ;;  %v1646_v55 = vmax.f32 %v1644_v14, %v1645_v45  ;;  %v886_v58 = vcombine.high %v730_v28, %v730_v28  ;;  %v893_v0 = vrot.slane %v730_v28, %v7155_v43 }
 0x11c   : > { %v2649_v38 = vsel %vm2648_vm9, %v2400_v56, %v2647_v32  ;;  %v1634_v4 = vmax.f32 %v1632_v8, %v1633_v49  ;;  %v1640_v5 = vrot.slane %v1639_v50, 2  ;;  %v1653_v6 = vmax.f32 %v1651_v46, %v1652_v54 }
 0x11d   : > { %v2651_v11 = vsel %vm2650_vm10, %v2403_v1, %v2649_v38  ;;  %v1647_v12 = vrot.slane %v1646_v55, 2  ;;  %v900_v7 = vrot.slane %v886_v58, %v7155_v43  ;;  %v901_v16 = vcombine.high %v893_v0, %v893_v0 }
 0x11e   : > { %v2653_v18 = vsel %vm2652_vm11, %v2406_v63, %v2651_v11  ;;  %v1635_v17 = vrot.slane %v1634_v4, 1  ;;  %v1641_v19 = vmax.f32 %v1639_v50, %v1640_v5  ;;  %v1654_v20 = vrot.slane %v1653_v6, 2 }
 0x11f   : > { %v2655_v21 = vsel %vm2654_vm12, %v2409_v10, %v2653_v18  ;;  %v1648_v24 = vmax.f32 %v1646_v55, %v1647_v12  ;;  %v902_v22 = vcombine.high %v900_v7, %v900_v7  ;;  %v1602_v56 = vsel %vm760_vm4, %v893_v0, -inf }
 0x120   : > { %2714 = vst.msk [vmem:[#allocation2 + $0x11] sm:$0xff] %vm758_vm5, %v2655_v21  ;;  %v1636_v1 = vmax.f32 %v1634_v4, %v1635_v17  ;;  %v1642_v25 = vrot.slane %v1641_v19, 1  ;;  %v1655_v27 = vmax.f32 %v1653_v6, %v1654_v20  ;;  %v1603_v28 = vrot.slane %v1602_v56, 4 }
 0x121   : > { %v1649_v29 = vrot.slane %v1648_v24, 1  ;;  %v1609_v63 = vsel %vm760_vm4, %v901_v16, -inf  ;;  %v1616_v33 = vsel %vm760_vm4, %v900_v7, -inf  ;;  %v1623_v34 = vsel %vm760_vm4, %v902_v22, -inf }
 0x122   : > { %v1643_v10 = vmax.f32 %v1641_v19, %v1642_v25  ;;  %v1656_v51 = vrot.slane %v1655_v27, 1  ;;  %v7299_v2 = vsel %vm758_vm5, %v1636_v1, -inf  ;;  %v1604_v13 = vmax.f32 %v1602_v56, %v1603_v28  ;;  %v7323_v1 = vpop.f32.mrb[13].mxu0 }
 0x123   : > { %v1650_v35 = vmax.f32 %v1648_v24, %v1649_v29  ;;  %v1610_v14 = vrot.slane %v1609_v63, 4  ;;  %v1617_v36 = vrot.slane %v1616_v33, 4  ;;  %v1624_v60 = vrot.slane %v1623_v34, 4 }
 0x124   : > { %v1657_v8 = vmax.f32 %v1655_v27, %v1656_v51  ;;  %v7302_v41 = vsel %vm758_vm5, %v1643_v10, -inf  ;;  %v1605_v42 = vrot.slane %v1604_v13, 2  ;;  %v603_v44 = vadd.f32 %v7189_v26, %v7151_v40 }
 0x125   : > { %v7307_v45 = vsel %vm758_vm5, %v1650_v35, -inf  ;;  %v1611_v46 = vmax.f32 %v1609_v63, %v1610_v14  ;;  %v1618_v47 = vmax.f32 %v1616_v33, %v1617_v36  ;;  %v1625_v49 = vmax.f32 %v1623_v34, %v1624_v60 }
 0x126   : > { %v7310_v50 = vsel %vm758_vm5, %v1657_v8, -inf  ;;  %v1606_v54 = vmax.f32 %v1604_v13, %v1605_v42  ;;  %v733_v32 = vmax.f32 %v603_v44, 0.0  ;;  %v598_v55 = vadd.f32 %v7151_v40, %v7192_v31 }
 0x127   : > { %v1612_v58 = vrot.slane %v1611_v46, 2  ;;  %v1619_v0 = vrot.slane %v1618_v47, 2  ;;  %v1626_v38 = vrot.slane %v1625_v49, 2  ;;  %v1175_v26 = vcombine.high %v7162_v57, %v7162_v57 }
 0x128   : > { %v1607_v4 = vrot.slane %v1606_v54, 1  ;;  %v937_v5 = vcombine.high %v733_v32, %v733_v32  ;;  %v944_v6 = vrot.slane %v733_v32, %v7155_v43  ;;  %v732_v11 = vmax.f32 %v598_v55, 0.0 }
 0x129   : > { %v1613_v12 = vmax.f32 %v1611_v46, %v1612_v58  ;;  %v1620_v7 = vmax.f32 %v1618_v47, %v1619_v0  ;;  %v1627_v16 = vmax.f32 %v1625_v49, %v1626_v38  ;;  %v7319_v18 = vrot.slane %v7162_v57, %v7155_v43 }
 0x12a   : > { %v1608_v17 = vmax.f32 %v1606_v54, %v1607_v4  ;;  %v951_v31 = vrot.slane %v937_v5, %v7155_v43  ;;  %v952_v19 = vcombine.high %v944_v6, %v944_v6  ;;  %v1686_v20 = vsel %vm760_vm4, %v944_v6, -inf }
 0x12b   : > { %v1614_v21 = vrot.slane %v1613_v12, 1  ;;  %v1621_v24 = vrot.slane %v1620_v7, 1  ;;  %v1628_v22 = vrot.slane %v1627_v16, 1  ;;  %v1687_v56 = vrot.slane %v1686_v20, 4 }
 0x12c   : > { %v7326_v25 = vsel %vm758_vm5, %v1608_v17, -inf  ;;  %v953_v27 = vcombine.high %v951_v31, %v951_v31  ;;  %v1693_v28 = vsel %vm760_vm4, %v952_v19, -inf  ;;  %v1700_v57 = vsel %vm760_vm4, %v951_v31, -inf  ;;  %v7349_v19 = vpop.f32.mrb[7].mxu1 }
 0x12d   : > { %v1615_v29 = vmax.f32 %v1613_v12, %v1614_v21  ;;  %v1622_v63 = vmax.f32 %v1620_v7, %v1621_v24  ;;  %v1629_v33 = vmax.f32 %v1627_v16, %v1628_v22  ;;  %v1688_v34 = vmax.f32 %v1686_v20, %v1687_v56 }
 0x12e   : > { %v1694_v10 = vrot.slane %v1693_v28, 4  ;;  %v1701_v51 = vrot.slane %v1700_v57, 4  ;;  %v1707_v13 = vsel %vm760_vm4, %v953_v27, -inf  ;;  %v920_v35 = vcombine.high %v732_v11, %v732_v11 }
 0x12f   : > { %v7332_v14 = vsel %vm758_vm5, %v1615_v29, -inf  ;;  %v7335_v36 = vsel %vm758_vm5, %v1622_v63, -inf  ;;  %v7338_v60 = vsel %vm758_vm5, %v1629_v33, -inf  ;;  %v1689_v8 = vrot.slane %v1688_v34, 2 }
 0x130   : > { %v1695_v42 = vmax.f32 %v1693_v28, %v1694_v10  ;;  %v1702_v44 = vmax.f32 %v1700_v57, %v1701_v51  ;;  %v1708_v46 = vrot.slane %v1707_v13, 4  ;;  %v927_v47 = vrot.slane %v732_v11, %v7155_v43 }
 0x131   : > { %v1690_v49 = vmax.f32 %v1688_v34, %v1689_v8  ;;  %v934_v54 = vrot.slane %v920_v35, %v7155_v43  ;;  %v7343_v32 = vrot.slane %v1175_v26, %v7155_v43  ;;  %v1190_v55 = vcombine.high %v7319_v18, %v7319_v18 }
 0x132   : > { %v1696_v58 = vrot.slane %v1695_v42, 2  ;;  %v1703_v0 = vrot.slane %v1702_v44, 2  ;;  %v1709_v38 = vmax.f32 %v1707_v13, %v1708_v46  ;;  %v935_v4 = vcombine.high %v927_v47, %v927_v47 }
 0x133   : > { %v1691_v5 = vrot.slane %v1690_v49, 1  ;;  %v936_v6 = vcombine.high %v934_v54, %v934_v54  ;;  %v1658_v12 = vsel %vm760_vm4, %v927_v47, -inf  ;;  %v1672_v7 = vsel %vm760_vm4, %v934_v54, -inf }
 0x134   : > { %v1697_v11 = vmax.f32 %v1695_v42, %v1696_v58  ;;  %v1704_v16 = vmax.f32 %v1702_v44, %v1703_v0  ;;  %v1710_v17 = vrot.slane %v1709_v38, 2  ;;  %v1659_v31 = vrot.slane %v1658_v12, 4 }
 0x135   : > { %v1692_v26 = vmax.f32 %v1690_v49, %v1691_v5  ;;  %v1665_v20 = vsel %vm760_vm4, %v935_v4, -inf  ;;  %v1673_v21 = vrot.slane %v1672_v7, 4  ;;  %v1679_v24 = vsel %vm760_vm4, %v936_v6, -inf }
 0x136   : > { %v1698_v22 = vrot.slane %v1697_v11, 1  ;;  %v1705_v56 = vrot.slane %v1704_v16, 1  ;;  %v1711_v27 = vmax.f32 %v1709_v38, %v1710_v17  ;;  %v1660_v28 = vmax.f32 %v1658_v12, %v1659_v31 }
 0x137   : > { %v7354_v57 = vsel %vm758_vm5, %v1692_v26, -inf  ;;  %v1666_v29 = vrot.slane %v1665_v20, 4  ;;  %v1674_v63 = vmax.f32 %v1672_v7, %v1673_v21  ;;  %v1680_v33 = vrot.slane %v1679_v24, 4 }
 0x138   : > { %v1699_v34 = vmax.f32 %v1697_v11, %v1698_v22  ;;  %v1706_v10 = vmax.f32 %v1704_v16, %v1705_v56  ;;  %v1712_v51 = vrot.slane %v1711_v27, 1  ;;  %v2424_v13 = vmax.f32 %v7299_v2, %v7354_v57 }
 0x139   : > { %v1661_v35 = vrot.slane %v1660_v28, 2  ;;  %v1667_v8 = vmax.f32 %v1665_v20, %v1666_v29  ;;  %v1675_v42 = vrot.slane %v1674_v63, 2  ;;  %v1681_v44 = vmax.f32 %v1679_v24, %v1680_v33 }
 0x13a   : > { %v1713_v46 = vmax.f32 %v1711_v27, %v1712_v51  ;;  %v7359_v47 = vsel %vm758_vm5, %v1699_v34, -inf  ;;  %v7362_v49 = vsel %vm758_vm5, %v1706_v10, -inf  ;;  %v1191_v54 = vcombine.high %v7343_v32, %v7343_v32 }
 0x13b   : > { %v2427_v58 = vmax.f32 %v7302_v41, %v7359_v47  ;;  %v2430_v0 = vmax.f32 %v7307_v45, %v7362_v49  ;;  %v1662_v38 = vmax.f32 %v1660_v28, %v1661_v35  ;;  %v1668_v4 = vrot.slane %v1667_v8, 2 }
 0x13c   : > { %v7371_v5 = vsel %vm758_vm5, %v1713_v46, -inf  ;;  %v1676_v6 = vmax.f32 %v1674_v63, %v1675_v42  ;;  %v1682_v12 = vrot.slane %v1681_v44, 2  ;;  %v2078_v7 = vsel %vm760_vm4, %v7319_v18, -inf }
 0x13d   : > { %v2433_v11 = vmax.f32 %v7310_v50, %v7371_v5  ;;  %v1663_v16 = vrot.slane %v1662_v38, 1  ;;  %v1669_v17 = vmax.f32 %v1667_v8, %v1668_v4  ;;  %v2079_v31 = vrot.slane %v2078_v7, 4 }
 0x13e   : > { %v1677_v41 = vrot.slane %v1676_v6, 1  ;;  %v1683_v26 = vmax.f32 %v1681_v44, %v1682_v12  ;;  %v2085_v20 = vsel %vm760_vm4, %v1190_v55, -inf  ;;  %v2092_v21 = vsel %vm760_vm4, %v7343_v32, -inf }
 0x13f   : > { %v1664_v24 = vmax.f32 %v1662_v38, %v1663_v16  ;;  %v1670_v22 = vrot.slane %v1669_v17, 1  ;;  %v2080_v56 = vmax.f32 %v2078_v7, %v2079_v31  ;;  %v2086_v27 = vrot.slane %v2085_v20, 4 }
 0x140   : > { %v1678_v28 = vmax.f32 %v1676_v6, %v1677_v41  ;;  %v1684_v29 = vrot.slane %v1683_v26, 1  ;;  %v2093_v18 = vrot.slane %v2092_v21, 4  ;;  %v2099_v63 = vsel %vm760_vm4, %v1191_v54, -inf }
 0x141   : > { %v1671_v33 = vmax.f32 %v1669_v17, %v1670_v22  ;;  %v2411_v34 = vsel %vm758_vm5, %v1664_v24, -inf  ;;  %v2081_v10 = vrot.slane %v2080_v56, 2  ;;  %v2087_v51 = vmax.f32 %v2085_v20, %v2086_v27 }
 0x142   : > { %v1685_v35 = vmax.f32 %v1683_v26, %v1684_v29  ;;  %v2412_v55 = vmax.f32 %v7326_v25, %v2411_v34  ;;  %v2417_v8 = vsel %vm758_vm5, %v1678_v28, -inf  ;;  %v2094_v32 = vmax.f32 %v2092_v21, %v2093_v18  ;;  %v7394_v26 = vpop.f32.mrb[14].mxu0 }
 0x143   : > { %v2414_v42 = vsel %vm758_vm5, %v1671_v33, -inf  ;;  %v2418_v44 = vmax.f32 %v7335_v36, %v2417_v8  ;;  %v2082_v46 = vmax.f32 %v2080_v56, %v2081_v10  ;;  %v2088_v47 = vrot.slane %v2087_v51, 2 }
 0x144   : > { %v2415_v38 = vmax.f32 %v7332_v14, %v2414_v42  ;;  %v2420_v54 = vsel %vm758_vm5, %v1685_v35, -inf  ;;  %v2095_v4 = vrot.slane %v2094_v32, 2  ;;  %v2100_v6 = vrot.slane %v2099_v63, 4  ;;  %v7416_v35 = vpop.f32.mrb[15].mxu0 }
 0x145   : > { %v2421_v12 = vmax.f32 %v7338_v60, %v2420_v54  ;;  %v2083_v7 = vrot.slane %v2082_v46, 1  ;;  %v2089_v16 = vmax.f32 %v2087_v51, %v2088_v47  ;;  %v1158_v25 = vcombine.high %v7168_v61, %v7168_v61 }
 0x146   : > { %v2656_v17 = vsel %vm2642_vm6, %v2415_v38, %v2412_v55  ;;  %v2096_v31 = vmax.f32 %v2094_v32, %v2095_v4  ;;  %v2101_v41 = vmax.f32 %v2099_v63, %v2100_v6  ;;  %v1165_v36 = vrot.slane %v7168_v61, %v7155_v43 }
 0x147   : > { %v2657_v14 = vsel %vm2644_vm7, %v2418_v44, %v2656_v17  ;;  %v2084_v20 = vmax.f32 %v2082_v46, %v2083_v7  ;;  %v2090_v21 = vrot.slane %v2089_v16, 1  ;;  %v1172_v60 = vrot.slane %v1158_v25, %v7155_v43 }
 0x148   : > { %v2658_v24 = vsel %vm2646_vm8, %v2421_v12, %v2657_v14  ;;  %v2097_v22 = vrot.slane %v2096_v31, 1  ;;  %v2102_v56 = vrot.slane %v2101_v41, 2  ;;  %v1173_v27 = vcombine.high %v1165_v36, %v1165_v36 }
 0x149   : > { %v2659_v28 = vsel %vm2648_vm9, %v2424_v13, %v2658_v24  ;;  %v2091_v29 = vmax.f32 %v2089_v16, %v2090_v21  ;;  %v7404_v61 = vsel %vm758_vm5, %v2084_v20, -inf  ;;  %v1174_v18 = vcombine.high %v1172_v60, %v1172_v60 }
 0x14a   : > { %v2660_v63 = vsel %vm2650_vm10, %v2427_v58, %v2659_v28  ;;  %v2098_v33 = vmax.f32 %v2096_v31, %v2097_v22  ;;  %v2103_v34 = vmax.f32 %v2101_v41, %v2102_v56  ;;  %v2050_v10 = vsel %vm760_vm4, %v1165_v36, -inf }
 0x14b   : > { %v2661_v51 = vsel %vm2652_vm11, %v2430_v0, %v2660_v63  ;;  %v7413_v2 = vsel %vm758_vm5, %v2091_v29, -inf  ;;  %v2051_v57 = vrot.slane %v2050_v10, 4  ;;  %v2057_v13 = vsel %vm760_vm4, %v1173_v27, -inf }
 0x14c   : > { %v2662_v58 = vsel %vm2654_vm12, %v2433_v11, %v2661_v51  ;;  %v2104_v55 = vrot.slane %v2103_v34, 1  ;;  %v7423_v8 = vsel %vm758_vm5, %v2098_v33, -inf  ;;  %v2058_v45 = vrot.slane %v2057_v13, 4 }
 0x14d   : > { %2715 = vst.msk [vmem:[#allocation2 + $0x21] sm:$0xff] %vm758_vm5, %v2662_v58  ;;  %v2052_v49 = vmax.f32 %v2050_v10, %v2051_v57  ;;  %v2064_v0 = vsel %vm760_vm4, %v1172_v60, -inf  ;;  %v2071_v32 = vsel %vm760_vm4, %v1174_v18, -inf  ;;  %v613_v42 = vadd.f32 %v7194_v48, %v7151_v40 }
 0x14e   : > { %v2105_v44 = vmax.f32 %v2103_v34, %v2104_v55  ;;  %v2059_v46 = vmax.f32 %v2057_v13, %v2058_v45  ;;  %v2065_v50 = vrot.slane %v2064_v0, 4  ;;  %v2072_v5 = vrot.slane %v2071_v32, 4 }
 0x14f   : > { %v2053_v11 = vrot.slane %v2052_v49, 2  ;;  %v735_v47 = vmax.f32 %v613_v42, 0.0  ;;  %v683_v38 = vadd.f32 %v7170_v62, %v7151_v40  ;;  %v608_v54 = vadd.f32 %v7151_v40, %v7196_v53 }
 0x150   : > { %v7435_v4 = vsel %vm758_vm5, %v2105_v44, -inf  ;;  %v2060_v6 = vrot.slane %v2059_v46, 2  ;;  %v2066_v12 = vmax.f32 %v2064_v0, %v2065_v50  ;;  %v2073_v7 = vmax.f32 %v2071_v32, %v2072_v5 }
 0x151   : > { %v2054_v16 = vmax.f32 %v2052_v49, %v2053_v11  ;;  %v971_v48 = vcombine.high %v735_v47, %v735_v47  ;;  %v978_v25 = vrot.slane %v735_v47, %v7155_v43  ;;  %v749_v17 = vmax.f32 %v683_v38, 0.0 }
 0x152   : > { %v2061_v31 = vmax.f32 %v2059_v46, %v2060_v6  ;;  %v2067_v41 = vrot.slane %v2066_v12, 2  ;;  %v2074_v36 = vrot.slane %v2073_v7, 2  ;;  %v7438_v14 = vmax.f32 %v608_v54, 0.0 }
 0x153   : > { %v2055_v62 = vrot.slane %v2054_v16, 1  ;;  %v985_v20 = vrot.slane %v971_v48, %v7155_v43  ;;  %v986_v40 = vcombine.high %v978_v25, %v978_v25  ;;  %v1742_v53 = vsel %vm760_vm4, %v978_v25, -inf  ;;  %v7462_v25 = vpop.f32.mrb[16].mxu0 }
 0x154   : > { %v2062_v21 = vrot.slane %v2061_v31, 1  ;;  %v2068_v60 = vmax.f32 %v2066_v12, %v2067_v41  ;;  %v2075_v24 = vmax.f32 %v2073_v7, %v2074_v36  ;;  %v1743_v22 = vrot.slane %v1742_v53, 4  ;;  %8924 = vst [vmem:[#allocation7_spill] sm:$0xff] %v7462_v25 }
 0x155   : > { %v2056_v56 = vmax.f32 %v2054_v16, %v2055_v62  ;;  %v987_v27 = vcombine.high %v985_v20, %v985_v20  ;;  %v1749_v28 = vsel %vm760_vm4, %v986_v40, -inf  ;;  %v1756_v29 = vsel %vm760_vm4, %v985_v20, -inf }
 0x156   : > { %v2063_v18 = vmax.f32 %v2061_v31, %v2062_v21  ;;  %v2069_v63 = vrot.slane %v2068_v60, 1  ;;  %v2076_v33 = vrot.slane %v2075_v24, 1  ;;  %v1744_v34 = vmax.f32 %v1742_v53, %v1743_v22 }
 0x157   : > { %v7445_v10 = vsel %vm758_vm5, %v2056_v56, -inf  ;;  %v1750_v51 = vrot.slane %v1749_v28, 4  ;;  %v1757_v57 = vrot.slane %v1756_v29, 4  ;;  %v1763_v13 = vsel %vm760_vm4, %v987_v27, -inf }
 0x158   : > { %v2070_v58 = vmax.f32 %v2068_v60, %v2069_v63  ;;  %v2077_v55 = vmax.f32 %v2075_v24, %v2076_v33  ;;  %v7449_v45 = vsel %vm758_vm5, %v2063_v18, -inf  ;;  %v1745_v49 = vrot.slane %v1744_v34, 2 }
 0x159   : > { %v1751_v0 = vmax.f32 %v1749_v28, %v1750_v51  ;;  %v1758_v32 = vmax.f32 %v1756_v29, %v1757_v57  ;;  %v1764_v42 = vrot.slane %v1763_v13, 4  ;;  %v1209_v44 = vcombine.high %v749_v17, %v749_v17 }
 0x15a   : > { %v7452_v46 = vsel %vm758_vm5, %v2070_v58, -inf  ;;  %v7455_v50 = vsel %vm758_vm5, %v2077_v55, -inf  ;;  %v1746_v5 = vmax.f32 %v1744_v34, %v1745_v49  ;;  %v1216_v11 = vrot.slane %v749_v17, %v7155_v43 }
 0x15b   : > { %v1752_v47 = vrot.slane %v1751_v0, 2  ;;  %v1759_v38 = vrot.slane %v1758_v32, 2  ;;  %v1765_v54 = vmax.f32 %v1763_v13, %v1764_v42  ;;  %v1223_v6 = vrot.slane %v1209_v44, %v7155_v43  ;;  %v7478_v42 = vpop.f32.mrb[17].mxu0 }
 0x15c   : > { %v1747_v12 = vrot.slane %v1746_v5, 1  ;;  %v1224_v7 = vcombine.high %v1216_v11, %v1216_v11  ;;  %v2134_v16 = vsel %vm760_vm4, %v1216_v11, -inf  ;;  %v954_v48 = vcombine.high %v7438_v14, %v7438_v14  ;;  %8925 = vst [vmem:[#allocation8_spill] sm:$0xff] %v7478_v42 }
 0x15d   : > { %v1753_v31 = vmax.f32 %v1751_v0, %v1752_v47  ;;  %v1760_v41 = vmax.f32 %v1758_v32, %v1759_v38  ;;  %v1766_v36 = vrot.slane %v1765_v54, 2  ;;  %v1225_v62 = vcombine.high %v1223_v6, %v1223_v6 }
 0x15e   : > { %v1748_v20 = vmax.f32 %v1746_v5, %v1747_v12  ;;  %v2135_v17 = vrot.slane %v2134_v16, 4  ;;  %v2141_v40 = vsel %vm760_vm4, %v1224_v7, -inf  ;;  %v2148_v53 = vsel %vm760_vm4, %v1223_v6, -inf }
 0x15f   : > { %v1754_v21 = vrot.slane %v1753_v31, 1  ;;  %v1761_v60 = vrot.slane %v1760_v41, 1  ;;  %v1767_v24 = vmax.f32 %v1765_v54, %v1766_v36  ;;  %v2142_v22 = vrot.slane %v2141_v40, 4 }
 0x160   : > { %v7467_v56 = vsel %vm758_vm5, %v1748_v20, -inf  ;;  %v2136_v27 = vmax.f32 %v2134_v16, %v2135_v17  ;;  %v2149_v28 = vrot.slane %v2148_v53, 4  ;;  %v2155_v29 = vsel %vm760_vm4, %v1225_v62, -inf }
 0x161   : > { %v1755_v18 = vmax.f32 %v1753_v31, %v1754_v21  ;;  %v1762_v63 = vmax.f32 %v1760_v41, %v1761_v60  ;;  %v1768_v33 = vrot.slane %v1767_v24, 1  ;;  %v2143_v34 = vmax.f32 %v2141_v40, %v2142_v22 }
 0x162   : > { %v2137_v51 = vrot.slane %v2136_v27, 2  ;;  %v2150_v57 = vmax.f32 %v2148_v53, %v2149_v28  ;;  %v2156_v13 = vrot.slane %v2155_v29, 4  ;;  %v961_v58 = vrot.slane %v7438_v14, %v7155_v43 }
 0x163   : > { %v1769_v55 = vmax.f32 %v1767_v24, %v1768_v33  ;;  %v7473_v49 = vsel %vm758_vm5, %v1755_v18, -inf  ;;  %v7476_v0 = vsel %vm758_vm5, %v1762_v63, -inf  ;;  %v2144_v32 = vrot.slane %v2143_v34, 2 }
 0x164   : > { %v2138_v44 = vmax.f32 %v2136_v27, %v2137_v51  ;;  %v2151_v5 = vrot.slane %v2150_v57, 2  ;;  %v2157_v11 = vmax.f32 %v2155_v29, %v2156_v13  ;;  %v968_v47 = vrot.slane %v954_v48, %v7155_v43 }
 0x165   : > { %v7482_v38 = vsel %vm758_vm5, %v1769_v55, -inf  ;;  %v2145_v54 = vmax.f32 %v2143_v34, %v2144_v32  ;;  %v969_v14 = vcombine.high %v961_v58, %v961_v58  ;;  %v1714_v6 = vsel %vm760_vm4, %v961_v58, -inf }
 0x166   : > { %v2139_v12 = vrot.slane %v2138_v44, 1  ;;  %v2152_v7 = vmax.f32 %v2150_v57, %v2151_v5  ;;  %v2158_v16 = vrot.slane %v2157_v11, 2  ;;  %v970_v31 = vcombine.high %v968_v47, %v968_v47 }
 0x167   : > { %v2146_v41 = vrot.slane %v2145_v54, 1  ;;  %v1715_v36 = vrot.slane %v1714_v6, 4  ;;  %v1721_v62 = vsel %vm760_vm4, %v969_v14, -inf  ;;  %v1728_v20 = vsel %vm760_vm4, %v968_v47, -inf  ;;  %v7509_v14 = vld [vmem:[%s8910_s2] ss:$0 sm:$0xff] }
 0x168   : > { %v2140_v17 = vmax.f32 %v2138_v44, %v2139_v12  ;;  %v2153_v40 = vrot.slane %v2152_v7, 1  ;;  %v2159_v48 = vmax.f32 %v2157_v11, %v2158_v16  ;;  %v1722_v53 = vrot.slane %v1721_v62, 4 }
 0x169   : > { %v2147_v21 = vmax.f32 %v2145_v54, %v2146_v41  ;;  %v1716_v60 = vmax.f32 %v1714_v6, %v1715_v36  ;;  %v1729_v24 = vrot.slane %v1728_v20, 4  ;;  %v1735_v22 = vsel %vm760_vm4, %v970_v31, -inf }
 0x16a   : > { %v2154_v27 = vmax.f32 %v2152_v7, %v2153_v40  ;;  %v2160_v28 = vrot.slane %v2159_v48, 1  ;;  %v7489_v29 = vsel %vm758_vm5, %v2140_v17, -inf  ;;  %v1723_v18 = vmax.f32 %v1721_v62, %v1722_v53 }
 0x16b   : > { %v7494_v33 = vsel %vm758_vm5, %v2147_v21, -inf  ;;  %v1717_v34 = vrot.slane %v1716_v60, 2  ;;  %v1730_v51 = vmax.f32 %v1728_v20, %v1729_v24  ;;  %v1736_v11 = vrot.slane %v1735_v22, 4 }
 0x16c   : > { %v2161_v57 = vmax.f32 %v2159_v48, %v2160_v28  ;;  %v7499_v58 = vsel %vm758_vm5, %v2154_v27, -inf  ;;  %v1724_v55 = vrot.slane %v1723_v18, 2  ;;  %v678_v6 = vadd.f32 %v7509_v14, %v7176_v3 }
 0x16d   : > { %v1718_v44 = vmax.f32 %v1716_v60, %v1717_v34  ;;  %v1731_v5 = vrot.slane %v1730_v51, 2  ;;  %v623_v12 = vadd.f32 %v7509_v14, %v7201_v9  ;;  %v1737_v41 = vmax.f32 %v1735_v22, %v1736_v11  ;;  %v7526_v22 = vpop.f32.mrb[18].mxu0 }
 0x16e   : > { %v7504_v47 = vsel %vm758_vm5, %v2161_v57, -inf  ;;  %v1725_v54 = vmax.f32 %v1723_v18, %v1724_v55  ;;  %v748_v62 = vmax.f32 %v678_v6, 0.0  ;;  %v7519_v17 = vadd.f32 %v7509_v14, %v7206_v15  ;;  %8926 = vst [vmem:[#allocation9_spill] sm:$0xff] %v7526_v22 }
 0x16f   : > { %v1719_v16 = vrot.slane %v1718_v44, 1  ;;  %v1732_v31 = vmax.f32 %v1730_v51, %v1731_v5  ;;  %v737_v20 = vmax.f32 %v623_v12, 0.0  ;;  %v1738_v53 = vrot.slane %v1737_v41, 2 }
 0x170   : > { %v1726_v36 = vrot.slane %v1725_v54, 1  ;;  %v7523_v3 = vadd.f32 %v7509_v14, %v7242_v52  ;;  %v1192_v21 = vcombine.high %v748_v62, %v748_v62  ;;  %v1199_v60 = vrot.slane %v748_v62, %v7155_v43 }
 0x171   : > { %v1720_v40 = vmax.f32 %v1718_v44, %v1719_v16  ;;  %v1733_v48 = vrot.slane %v1732_v31, 1  ;;  %v1005_v24 = vcombine.high %v737_v20, %v737_v20  ;;  %v1739_v28 = vmax.f32 %v1737_v41, %v1738_v53 }
 0x172   : > { %v1727_v9 = vmax.f32 %v1725_v54, %v1726_v36  ;;  %v1012_v15 = vrot.slane %v737_v20, %v7155_v43  ;;  %v1206_v52 = vrot.slane %v1192_v21, %v7155_v43  ;;  %v1207_v51 = vcombine.high %v1199_v60, %v1199_v60 }
 0x173   : > { %v1734_v27 = vmax.f32 %v1732_v31, %v1733_v48  ;;  %v7529_v18 = vsel %vm758_vm5, %v1720_v40, -inf  ;;  %v2106_v57 = vsel %vm760_vm4, %v1199_v60, -inf  ;;  %v1740_v55 = vrot.slane %v1739_v28, 1 }
 0x174   : > { %v7533_v34 = vsel %vm758_vm5, %v1727_v9, -inf  ;;  %v2107_v5 = vrot.slane %v2106_v57, 4  ;;  %v1019_v11 = vrot.slane %v1005_v24, %v7155_v43  ;;  %v1208_v54 = vcombine.high %v1206_v52, %v1206_v52 }
 0x175   : > { %v7538_v44 = vsel %vm758_vm5, %v1734_v27, -inf  ;;  %v2113_v6 = vsel %vm760_vm4, %v1207_v51, -inf  ;;  %v2120_v12 = vsel %vm760_vm4, %v1206_v52, -inf  ;;  %v1020_v16 = vcombine.high %v1012_v15, %v1012_v15  ;;  %v7549_v27 = vpop.f32.mrb[19].mxu0 }
 0x176   : > { %v1741_v31 = vmax.f32 %v1739_v28, %v1740_v55  ;;  %v2108_v41 = vmax.f32 %v2106_v57, %v2107_v5  ;;  %v2114_v36 = vrot.slane %v2113_v6, 4  ;;  %v2121_v62 = vrot.slane %v2120_v12, 4  ;;  %8927 = vst [vmem:[#allocation10_spill] sm:$0xff] %v7549_v27 }
 0x177   : > { %v2127_v20 = vsel %vm760_vm4, %v1208_v54, -inf  ;;  %v1021_v40 = vcombine.high %v1019_v11, %v1019_v11  ;;  %v1798_v48 = vsel %vm760_vm4, %v1012_v15, -inf  ;;  %v1805_v53 = vsel %vm760_vm4, %v1020_v16, -inf }
 0x178   : > { %v7547_v9 = vsel %vm758_vm5, %v1741_v31, -inf  ;;  %v2109_v21 = vrot.slane %v2108_v41, 2  ;;  %v2115_v60 = vmax.f32 %v2113_v6, %v2114_v36  ;;  %v2122_v24 = vmax.f32 %v2120_v12, %v2121_v62 }
 0x179   : > { %v2128_v52 = vrot.slane %v2127_v20, 4  ;;  %v1799_v28 = vrot.slane %v1798_v48, 4  ;;  %v1806_v51 = vrot.slane %v1805_v53, 4  ;;  %v1812_v57 = vsel %vm760_vm4, %v1019_v11, -inf }
 0x17a   : > { %v2110_v55 = vmax.f32 %v2108_v41, %v2109_v21  ;;  %v2116_v5 = vrot.slane %v2115_v60, 2  ;;  %v2123_v54 = vrot.slane %v2122_v24, 2  ;;  %v1813_v37 = vrot.slane %v1812_v57, 4 }
 0x17b   : > { %v2129_v15 = vmax.f32 %v2127_v20, %v2128_v52  ;;  %v1800_v7 = vmax.f32 %v1798_v48, %v1799_v28  ;;  %v1807_v16 = vmax.f32 %v1805_v53, %v1806_v51  ;;  %v1819_v31 = vsel %vm760_vm4, %v1021_v40, -inf }
 0x17c   : > { %v2111_v32 = vrot.slane %v2110_v55, 1  ;;  %v2117_v13 = vmax.f32 %v2115_v60, %v2116_v5  ;;  %v2124_v6 = vmax.f32 %v2122_v24, %v2123_v54  ;;  %v1814_v12 = vmax.f32 %v1812_v57, %v1813_v37 }
 0x17d   : > { %v2130_v36 = vrot.slane %v2129_v15, 2  ;;  %v1801_v62 = vrot.slane %v1800_v7, 2  ;;  %v1808_v63 = vrot.slane %v1807_v16, 2  ;;  %v1820_v39 = vrot.slane %v1819_v31, 4 }
 0x17e   : > { %v2112_v27 = vmax.f32 %v2110_v55, %v2111_v32  ;;  %v2118_v22 = vrot.slane %v2117_v13, 1  ;;  %v2125_v11 = vrot.slane %v2124_v6, 1  ;;  %v1815_v41 = vrot.slane %v1814_v12, 2 }
 0x17f   : > { %v2131_v21 = vmax.f32 %v2129_v15, %v2130_v36  ;;  %v1802_v42 = vmax.f32 %v1800_v7, %v1801_v62  ;;  %v1809_v25 = vmax.f32 %v1807_v16, %v1808_v63  ;;  %v1821_v20 = vmax.f32 %v1819_v31, %v1820_v39 }
 0x180   : > { %v2119_v48 = vmax.f32 %v2117_v13, %v2118_v22  ;;  %v2126_v53 = vmax.f32 %v2124_v6, %v2125_v11  ;;  %v2507_v40 = vsel %vm758_vm5, %v2112_v27, -inf  ;;  %v1816_v52 = vmax.f32 %v1814_v12, %v1815_v41 }
 0x181   : > { %v2132_v60 = vrot.slane %v2131_v21, 1  ;;  %v2508_v37 = vmax.f32 %v7445_v10, %v2507_v40  ;;  %v1803_v24 = vrot.slane %v1802_v42, 1  ;;  %v1810_v28 = vrot.slane %v1809_v25, 1 }
 0x182   : > { %v2510_v51 = vsel %vm758_vm5, %v2119_v48, -inf  ;;  %v2513_v32 = vsel %vm758_vm5, %v2126_v53, -inf  ;;  %v1817_v57 = vrot.slane %v1816_v52, 1  ;;  %v1822_v55 = vrot.slane %v1821_v20, 2 }
 0x183   : > { %v2133_v5 = vmax.f32 %v2131_v21, %v2132_v60  ;;  %v2511_v63 = vmax.f32 %v7449_v45, %v2510_v51  ;;  %v2514_v39 = vmax.f32 %v7452_v46, %v2513_v32  ;;  %v1804_v13 = vmax.f32 %v1802_v42, %v1803_v24 }
 0x184   : > { %v1811_v7 = vmax.f32 %v1809_v25, %v1810_v28  ;;  %v1818_v22 = vmax.f32 %v1816_v52, %v1817_v57  ;;  %v1823_v27 = vmax.f32 %v1821_v20, %v1822_v55  ;;  %v736_v54 = vmax.f32 %v7519_v17, 0.0 }
 0x185   : > { %v2516_v10 = vsel %vm758_vm5, %v2133_v5, -inf  ;;  %v2684_v15 = vsel %vm2642_vm6, %v2511_v63, %v2508_v37  ;;  %v7563_v16 = vsel %vm758_vm5, %v1804_v13, -inf  ;;  %v751_v31 = vmax.f32 %v7523_v3, 0.0 }
 0x186   : > { %v2517_v6 = vmax.f32 %v7455_v50, %v2516_v10  ;;  %v2685_v45 = vsel %vm2644_vm7, %v2514_v39, %v2684_v15  ;;  %v1824_v46 = vrot.slane %v1823_v27, 1  ;;  %v2448_v25 = vmax.f32 %v7467_v56, %v7563_v16 }
 0x187   : > { %v7571_v42 = vsel %vm758_vm5, %v1811_v7, -inf  ;;  %v7574_v17 = vsel %vm758_vm5, %v1818_v22, -inf  ;;  %v988_v12 = vcombine.high %v736_v54, %v736_v54  ;;  %v995_v36 = vrot.slane %v736_v54, %v7155_v43 }
 0x188   : > { %v2686_v62 = vsel %vm2646_vm8, %v2517_v6, %v2685_v45  ;;  %v1825_v3 = vmax.f32 %v1823_v27, %v1824_v46  ;;  %v2451_v50 = vmax.f32 %v7473_v49, %v7571_v42  ;;  %v2454_v11 = vmax.f32 %v7476_v0, %v7574_v17 }
 0x189   : > { %v8928_v41 = vmax.f32 %v7404_v61, %v7489_v29  ;;  %v1002_v20 = vrot.slane %v988_v12, %v7155_v43  ;;  %v1003_v48 = vcombine.high %v995_v36, %v995_v36  ;;  %v1770_v53 = vsel %vm760_vm4, %v995_v36, -inf }
 0x18a   : > { %v8929_v40 = vmax.f32 %v7413_v2, %v7494_v33  ;;  %v7593_v60 = vsel %vm758_vm5, %v1825_v3, -inf  ;;  %v1771_v37 = vrot.slane %v1770_v53, 4  ;;  %v1243_v24 = vcombine.high %v751_v31, %v751_v31 }
 0x18b   : > { %v2687_v21 = vsel %vm2648_vm9, %v8928_v41, %v2686_v62  ;;  %v8930_v61 = vmax.f32 %v7423_v8, %v7499_v58  ;;  %v2457_v28 = vmax.f32 %v7482_v38, %v7593_v60  ;;  %v1004_v51 = vcombine.high %v1002_v20, %v1002_v20 }
 0x18c   : > { %v2688_v52 = vsel %vm2650_vm10, %v8929_v40, %v2687_v21  ;;  %v1777_v32 = vsel %vm760_vm4, %v1003_v48, -inf  ;;  %v8931_v2 = vmax.f32 %v7435_v4, %v7504_v47  ;;  %v1772_v57 = vmax.f32 %v1770_v53, %v1771_v37 }
 0x18d   : > { %v2689_v29 = vsel %vm2652_vm11, %v8930_v61, %v2688_v52  ;;  %v1778_v55 = vrot.slane %v1777_v32, 4  ;;  %v1784_v5 = vsel %vm760_vm4, %v1002_v20, -inf  ;;  %v1791_v58 = vsel %vm760_vm4, %v1004_v51, -inf }
 0x18e   : > { %v2690_v33 = vsel %vm2654_vm12, %v8931_v2, %v2689_v29  ;;  %v1785_v8 = vrot.slane %v1784_v5, 4  ;;  %v1250_v63 = vrot.slane %v751_v31, %v7155_v43  ;;  %v1257_v39 = vrot.slane %v1243_v24, %v7155_v43 }
 0x18f   : > { %2719 = vst.msk [vmem:[#allocation2 + $0x61] sm:$0xff] %vm758_vm5, %v2690_v33  ;;  %v1773_v13 = vrot.slane %v1772_v57, 2  ;;  %v1779_v7 = vmax.f32 %v1777_v32, %v1778_v55  ;;  %v1792_v22 = vrot.slane %v1791_v58, 4  ;;  %v688_v4 = vadd.f32 %v7509_v14, %v7245_v59 }
 0x190   : > { %v1786_v47 = vmax.f32 %v1784_v5, %v1785_v8  ;;  %v1258_v27 = vcombine.high %v1250_v63, %v1250_v63  ;;  %v1259_v54 = vcombine.high %v1257_v39, %v1257_v39  ;;  %v2190_v10 = vsel %vm760_vm4, %v1250_v63, -inf }
 0x191   : > { %v1774_v15 = vmax.f32 %v1772_v57, %v1773_v13  ;;  %v1780_v6 = vrot.slane %v1779_v7, 2  ;;  %v1793_v45 = vmax.f32 %v1791_v58, %v1792_v22  ;;  %v2191_v46 = vrot.slane %v2190_v10, 4 }
 0x192   : > { %v1787_v12 = vrot.slane %v1786_v47, 2  ;;  %v2197_v31 = vsel %vm760_vm4, %v1258_v27, -inf  ;;  %v2204_v36 = vsel %vm760_vm4, %v1257_v39, -inf  ;;  %v2211_v62 = vsel %vm760_vm4, %v1259_v54, -inf }
 0x193   : > { %v1775_v3 = vrot.slane %v1774_v15, 1  ;;  %v1781_v41 = vmax.f32 %v1779_v7, %v1780_v6  ;;  %v1794_v21 = vrot.slane %v1793_v45, 2  ;;  %v2192_v59 = vmax.f32 %v2190_v10, %v2191_v46 }
 0x194   : > { %v1788_v20 = vmax.f32 %v1786_v47, %v1787_v12  ;;  %v2198_v48 = vrot.slane %v2197_v31, 4  ;;  %v2205_v53 = vrot.slane %v2204_v36, 4  ;;  %v2212_v40 = vrot.slane %v2211_v62, 4 }
 0x195   : > { %v1776_v52 = vmax.f32 %v1774_v15, %v1775_v3  ;;  %v1782_v37 = vrot.slane %v1781_v41, 1  ;;  %v1795_v24 = vmax.f32 %v1793_v45, %v1794_v21  ;;  %v2193_v61 = vrot.slane %v2192_v59, 2 }
 0x196   : > { %v1789_v29 = vrot.slane %v1788_v20, 1  ;;  %v2199_v51 = vmax.f32 %v2197_v31, %v2198_v48  ;;  %v2206_v32 = vmax.f32 %v2204_v36, %v2205_v53  ;;  %v2213_v2 = vmax.f32 %v2211_v62, %v2212_v40 }
 0x197   : > { %v1783_v33 = vmax.f32 %v1781_v41, %v1782_v37  ;;  %v1796_v57 = vrot.slane %v1795_v24, 1  ;;  %v2435_v55 = vsel %vm758_vm5, %v1776_v52, -inf  ;;  %v2194_v5 = vmax.f32 %v2192_v59, %v2193_v61  ;;  %v7653_v61 = vpop.f32.mrb[8].mxu1 }
 0x198   : > { %v1790_v8 = vmax.f32 %v1788_v20, %v1789_v29  ;;  %v2436_v58 = vmax.f32 %v7529_v18, %v2435_v55  ;;  %v2200_v63 = vrot.slane %v2199_v51, 2  ;;  %v2207_v39 = vrot.slane %v2206_v32, 2 }
 0x199   : > { %v1797_v13 = vmax.f32 %v1795_v24, %v1796_v57  ;;  %v2438_v7 = vsel %vm758_vm5, %v1783_v33, -inf  ;;  %v2195_v22 = vrot.slane %v2194_v5, 1  ;;  %v2214_v47 = vrot.slane %v2213_v2, 2 }
 0x19a   : > { %v2439_v27 = vmax.f32 %v7533_v34, %v2438_v7  ;;  %v2441_v54 = vsel %vm758_vm5, %v1790_v8, -inf  ;;  %v2201_v10 = vmax.f32 %v2199_v51, %v2200_v63  ;;  %v2208_v15 = vmax.f32 %v2206_v32, %v2207_v39 }
 0x19b   : > { %v2442_v6 = vmax.f32 %v7538_v44, %v2441_v54  ;;  %v2444_v45 = vsel %vm758_vm5, %v1797_v13, -inf  ;;  %v2196_v46 = vmax.f32 %v2194_v5, %v2195_v22  ;;  %v2215_v12 = vmax.f32 %v2213_v2, %v2214_v47 }
 0x19c   : > { %v2445_v18 = vmax.f32 %v7547_v9, %v2444_v45  ;;  %v2663_v31 = vsel %vm2642_vm6, %v2439_v27, %v2436_v58  ;;  %v2202_v36 = vrot.slane %v2201_v10, 1  ;;  %v2209_v62 = vrot.slane %v2208_v15, 1 }
 0x19d   : > { %v2664_v3 = vsel %vm2644_vm7, %v2442_v6, %v2663_v31  ;;  %v2216_v41 = vrot.slane %v2215_v12, 1  ;;  %v750_v34 = vmax.f32 %v688_v4, 0.0  ;;  %v633_v44 = vadd.f32 %v7509_v14, %v7281_v30 }
 0x19e   : > { %v2665_v21 = vsel %vm2646_vm8, %v2445_v18, %v2664_v3  ;;  %v2203_v59 = vmax.f32 %v2201_v10, %v2202_v36  ;;  %v2210_v20 = vmax.f32 %v2208_v15, %v2209_v62  ;;  %v7635_v48 = vsel %vm758_vm5, %v2196_v46, -inf }
 0x19f   : > { %v2666_v9 = vsel %vm2648_vm9, %v2448_v25, %v2665_v21  ;;  %v1226_v53 = vcombine.high %v750_v34, %v750_v34  ;;  %v1233_v40 = vrot.slane %v750_v34, %v7155_v43  ;;  %v2217_v52 = vmax.f32 %v2215_v12, %v2216_v41  ;;  %v7672_v34 = vpop.f32.mrb[9].mxu1 }
 0x1a0   : > { %v2667_v4 = vsel %vm2650_vm10, %v2451_v50, %v2666_v9  ;;  %v7643_v37 = vsel %vm758_vm5, %v2203_v59, -inf  ;;  %v739_v30 = vmax.f32 %v633_v44, 0.0  ;;  %v7650_v16 = vsel %vm758_vm5, %v2210_v20, -inf }
 0x1a1   : > { %v2668_v56 = vsel %vm2652_vm11, %v2454_v11, %v2667_v4  ;;  %v1240_v25 = vrot.slane %v1226_v53, %v7155_v43  ;;  %v1241_v24 = vcombine.high %v1233_v40, %v1233_v40  ;;  %v2162_v42 = vsel %vm760_vm4, %v1233_v40, -inf }
 0x1a2   : > { %v2669_v49 = vsel %vm2654_vm12, %v2457_v28, %v2668_v56  ;;  %v1039_v50 = vcombine.high %v739_v30, %v739_v30  ;;  %v1046_v0 = vrot.slane %v739_v30, %v7155_v43  ;;  %v2163_v11 = vrot.slane %v2162_v42, 4 }
 0x1a3   : > { %2716 = vst.msk [vmem:[#allocation2 + $0x31] sm:$0xff] %vm758_vm5, %v2669_v49  ;;  %v1242_v17 = vcombine.high %v1240_v25, %v1240_v25  ;;  %v2169_v29 = vsel %vm760_vm4, %v1241_v24, -inf  ;;  %v2176_v51 = vsel %vm760_vm4, %v1240_v25, -inf  ;;  %v703_v55 = vadd.f32 %v7509_v14, %v7292_v23 }
 0x1a4   : > { %v2170_v32 = vrot.slane %v2169_v29, 4  ;;  %v2177_v2 = vrot.slane %v2176_v51, 4  ;;  %v1053_v33 = vrot.slane %v1039_v50, %v7155_v43  ;;  %v1054_v38 = vcombine.high %v1046_v0, %v1046_v0 }
 0x1a5   : > { %v2164_v60 = vmax.f32 %v2162_v42, %v2163_v11  ;;  %v2183_v28 = vsel %vm760_vm4, %v1242_v17, -inf  ;;  %v1854_v57 = vsel %vm760_vm4, %v1046_v0, -inf  ;;  %v7675_v49 = vsel %vm758_vm5, %v2217_v52, -inf }
 0x1a6   : > { %v2171_v5 = vmax.f32 %v2169_v29, %v2170_v32  ;;  %v2178_v8 = vmax.f32 %v2176_v51, %v2177_v2  ;;  %v2184_v58 = vrot.slane %v2183_v28, 4  ;;  %v1055_v63 = vcombine.high %v1053_v33, %v1053_v33 }
 0x1a7   : > { %v2165_v39 = vrot.slane %v2164_v60, 2  ;;  %v1855_v13 = vrot.slane %v1854_v57, 4  ;;  %v1861_v7 = vsel %vm760_vm4, %v1054_v38, -inf  ;;  %v1868_v22 = vsel %vm760_vm4, %v1053_v33, -inf }
 0x1a8   : > { %v2172_v47 = vrot.slane %v2171_v5, 2  ;;  %v2179_v27 = vrot.slane %v2178_v8, 2  ;;  %v2185_v54 = vmax.f32 %v2183_v28, %v2184_v58  ;;  %v1862_v10 = vrot.slane %v1861_v7, 4 }
 0x1a9   : > { %v2166_v15 = vmax.f32 %v2164_v60, %v2165_v39  ;;  %v1856_v6 = vmax.f32 %v1854_v57, %v1855_v13  ;;  %v1869_v45 = vrot.slane %v1868_v22, 4  ;;  %v1875_v46 = vsel %vm760_vm4, %v1055_v63, -inf  ;;  %v7683_v60 = vpop.f32.mrb[10].mxu1 }
 0x1aa   : > { %v2173_v23 = vmax.f32 %v2171_v5, %v2172_v47  ;;  %v2180_v12 = vmax.f32 %v2178_v8, %v2179_v27  ;;  %v2186_v18 = vrot.slane %v2185_v54, 2  ;;  %v1863_v31 = vmax.f32 %v1861_v7, %v1862_v10 }
 0x1ab   : > { %v2167_v36 = vrot.slane %v2166_v15, 1  ;;  %v1857_v62 = vrot.slane %v1856_v6, 2  ;;  %v1870_v3 = vmax.f32 %v1868_v22, %v1869_v45  ;;  %v1876_v41 = vrot.slane %v1875_v46, 4  ;;  %v7712_v45 = vpop.f32.mrb[11].mxu1 }
 0x1ac   : > { %v2174_v21 = vrot.slane %v2173_v23, 1  ;;  %v2181_v59 = vrot.slane %v2180_v12, 1  ;;  %v2187_v20 = vmax.f32 %v2185_v54, %v2186_v18  ;;  %v1864_v44 = vrot.slane %v1863_v31, 2 }
 0x1ad   : > { %v2168_v9 = vmax.f32 %v2166_v15, %v2167_v36  ;;  %v1858_v53 = vmax.f32 %v1856_v6, %v1857_v62  ;;  %v1871_v40 = vrot.slane %v1870_v3, 2  ;;  %v1877_v4 = vmax.f32 %v1875_v46, %v1876_v41 }
 0x1ae   : > { %v2175_v30 = vmax.f32 %v2173_v23, %v2174_v21  ;;  %v2182_v56 = vmax.f32 %v2180_v12, %v2181_v59  ;;  %v2188_v25 = vrot.slane %v2187_v20, 1  ;;  %v1865_v24 = vmax.f32 %v1863_v31, %v1864_v44 }
 0x1af   : > { %v1859_v42 = vrot.slane %v1858_v53, 1  ;;  %v1872_v50 = vmax.f32 %v1870_v3, %v1871_v40  ;;  %v1878_v0 = vrot.slane %v1877_v4, 2  ;;  %v7678_v11 = vsel %vm758_vm5, %v2168_v9, -inf }
 0x1b0   : > { %v2189_v17 = vmax.f32 %v2187_v20, %v2188_v25  ;;  %v7681_v29 = vsel %vm758_vm5, %v2175_v30, -inf  ;;  %v1866_v51 = vrot.slane %v1865_v24, 1  ;;  %v753_v38 = vmax.f32 %v703_v55, 0.0 }
 0x1b1   : > { %v1860_v32 = vmax.f32 %v1858_v53, %v1859_v42  ;;  %v1873_v2 = vrot.slane %v1872_v50, 1  ;;  %v1879_v33 = vmax.f32 %v1877_v4, %v1878_v0  ;;  %v7686_v52 = vsel %vm758_vm5, %v2182_v56, -inf }
 0x1b2   : > { %v1867_v28 = vmax.f32 %v1865_v24, %v1866_v51  ;;  %v628_v57 = vadd.f32 %v7509_v14, %v7323_v1  ;;  %v698_v5 = vadd.f32 %v7509_v14, %v7349_v19  ;;  %v7693_v8 = vsel %vm758_vm5, %v2189_v17, -inf }
 0x1b3   : > { %v1874_v58 = vmax.f32 %v1872_v50, %v1873_v2  ;;  %v1880_v63 = vrot.slane %v1879_v33, 1  ;;  %v1277_v39 = vcombine.high %v753_v38, %v753_v38  ;;  %v7696_v55 = vsel %vm758_vm5, %v1860_v32, -inf }
 0x1b4   : > { %v7699_v13 = vsel %vm758_vm5, %v1867_v28, -inf  ;;  %v1284_v7 = vrot.slane %v753_v38, %v7155_v43  ;;  %v738_v22 = vmax.f32 %v628_v57, 0.0  ;;  %v7708_v27 = vmax.f32 %v698_v5, 0.0 }
 0x1b5   : > { %v7702_v47 = vmax.f32 %v1879_v33, %v1880_v63  ;;  %v7705_v1 = vsel %vm758_vm5, %v1874_v58, -inf  ;;  %v1291_v19 = vrot.slane %v1277_v39, %v7155_v43  ;;  %v7717_v18 = vadd.f32 %v7509_v14, %v7394_v26 }
 0x1b6   : > { %v1292_v54 = vcombine.high %v1284_v7, %v1284_v7  ;;  %v2246_v10 = vsel %vm760_vm4, %v1284_v7, -inf  ;;  %v1022_v15 = vcombine.high %v738_v22, %v738_v22  ;;  %v1029_v6 = vrot.slane %v738_v22, %v7155_v43 }
 0x1b7   : > { %v1293_v46 = vcombine.high %v1291_v19, %v1291_v19  ;;  %v2247_v23 = vrot.slane %v2246_v10, 4  ;;  %v2260_v12 = vsel %vm760_vm4, %v1291_v19, -inf }
 0x1b8   : > { %v2253_v31 = vsel %vm760_vm4, %v1292_v54, -inf  ;;  %v2261_v36 = vrot.slane %v2260_v12, 4  ;;  %v1036_v62 = vrot.slane %v1022_v15, %v7155_v43  ;;  %v1037_v3 = vcombine.high %v1029_v6, %v1029_v6 }
 0x1b9   : > { %v2248_v41 = vmax.f32 %v2246_v10, %v2247_v23  ;;  %v2254_v21 = vrot.slane %v2253_v31, 4  ;;  %v2267_v59 = vsel %vm760_vm4, %v1293_v46, -inf  ;;  %v1826_v20 = vsel %vm760_vm4, %v1029_v6, -inf }
 0x1ba   : > { %v2262_v44 = vmax.f32 %v2260_v12, %v2261_v36  ;;  %v2268_v9 = vrot.slane %v2267_v59, 4  ;;  %v1038_v53 = vcombine.high %v1036_v62, %v1036_v62  ;;  %v1827_v40 = vrot.slane %v1826_v20, 4 }
 0x1bb   : > { %v2249_v4 = vrot.slane %v2248_v41, 2  ;;  %v2255_v30 = vmax.f32 %v2253_v31, %v2254_v21  ;;  %v1833_v26 = vsel %vm760_vm4, %v1037_v3, -inf  ;;  %v1840_v56 = vsel %vm760_vm4, %v1036_v62, -inf }
 0x1bc   : > { %v2263_v25 = vrot.slane %v2262_v44, 2  ;;  %v2269_v24 = vmax.f32 %v2267_v59, %v2268_v9  ;;  %v1828_v42 = vmax.f32 %v1826_v20, %v1827_v40  ;;  %v1834_v50 = vrot.slane %v1833_v26, 4 }
 0x1bd   : > { %v2250_v0 = vmax.f32 %v2248_v41, %v2249_v4  ;;  %v2256_v17 = vrot.slane %v2255_v30, 2  ;;  %v1841_v51 = vrot.slane %v1840_v56, 4  ;;  %v1847_v32 = vsel %vm760_vm4, %v1038_v53, -inf }
 0x1be   : > { %v2264_v2 = vmax.f32 %v2262_v44, %v2263_v25  ;;  %v2270_v33 = vrot.slane %v2269_v24, 2  ;;  %v1829_v38 = vrot.slane %v1828_v42, 2  ;;  %v1835_v28 = vmax.f32 %v1833_v26, %v1834_v50 }
 0x1bf   : > { %v2251_v57 = vrot.slane %v2250_v0, 1  ;;  %v2257_v5 = vmax.f32 %v2255_v30, %v2256_v17  ;;  %v1842_v58 = vmax.f32 %v1840_v56, %v1841_v51  ;;  %v1848_v63 = vrot.slane %v1847_v32, 4 }
 0x1c0   : > { %v2265_v39 = vrot.slane %v2264_v2, 1  ;;  %v2271_v7 = vmax.f32 %v2269_v24, %v2270_v33  ;;  %v1830_v22 = vmax.f32 %v1828_v42, %v1829_v38  ;;  %v1836_v19 = vrot.slane %v1835_v28, 2 }
 0x1c1   : > { %v2252_v54 = vmax.f32 %v2250_v0, %v2251_v57  ;;  %v2258_v10 = vrot.slane %v2257_v5, 1  ;;  %v1843_v15 = vrot.slane %v1842_v58, 2  ;;  %v1849_v6 = vmax.f32 %v1847_v32, %v1848_v63  ;;  %v8932_v63 = vld [vmem:[#allocation7_spill] sm:$0xff] }
 0x1c2   : > { %v2266_v46 = vmax.f32 %v2264_v2, %v2265_v39  ;;  %v2272_v23 = vrot.slane %v2271_v7, 1  ;;  %v1831_v12 = vrot.slane %v1830_v22, 1  ;;  %v1837_v31 = vmax.f32 %v1835_v28, %v1836_v19 }
 0x1c3   : > { %v2259_v36 = vmax.f32 %v2257_v5, %v2258_v10  ;;  %v7727_v62 = vsel %vm758_vm5, %v2252_v54, -inf  ;;  %v1844_v3 = vmax.f32 %v1842_v58, %v1843_v15  ;;  %v1850_v41 = vrot.slane %v1849_v6, 2 }
 0x1c4   : > { %v2273_v21 = vmax.f32 %v2271_v7, %v2272_v23  ;;  %v2544_v59 = vmax.f32 %v7635_v48, %v7727_v62  ;;  %v7732_v20 = vsel %vm758_vm5, %v2266_v46, -inf  ;;  %v1832_v44 = vmax.f32 %v1830_v22, %v1831_v12 }
 0x1c5   : > { %v7735_v9 = vsel %vm758_vm5, %v2259_v36, -inf  ;;  %v2550_v53 = vmax.f32 %v7650_v16, %v7732_v20  ;;  %v1838_v40 = vrot.slane %v1837_v31, 1  ;;  %v1845_v4 = vrot.slane %v1844_v3, 1 }
 0x1c6   : > { %v7741_v30 = vsel %vm758_vm5, %v7702_v47, -inf  ;;  %v2547_v26 = vmax.f32 %v7643_v37, %v7735_v9  ;;  %v7746_v56 = vsel %vm758_vm5, %v2273_v21, -inf  ;;  %v1851_v25 = vmax.f32 %v1849_v6, %v1850_v41 }
 0x1c7   : > { %v2553_v24 = vmax.f32 %v7675_v49, %v7746_v56  ;;  %v1839_v42 = vmax.f32 %v1837_v31, %v1838_v40  ;;  %v1846_v50 = vmax.f32 %v1844_v3, %v1845_v4  ;;  %v1260_v0 = vcombine.high %v7708_v27, %v7708_v27 }
 0x1c8   : > { %v1852_v17 = vrot.slane %v1851_v25, 1  ;;  %v7753_v51 = vsel %vm758_vm5, %v1832_v44, -inf  ;;  %v1267_v47 = vrot.slane %v7708_v27, %v7155_v43  ;;  %v741_v32 = vmax.f32 %v7717_v18, 0.0 }
 0x1c9   : > { %v7759_v2 = vsel %vm758_vm5, %v1839_v42, -inf  ;;  %v7762_v33 = vsel %vm758_vm5, %v1846_v50, -inf  ;;  %v1274_v38 = vrot.slane %v1260_v0, %v7155_v43  ;;  %v7767_v28 = vadd.f32 %v7509_v14, %v7416_v35 }
 0x1ca   : > { %v1275_v57 = vcombine.high %v1267_v47, %v1267_v47  ;;  %v2218_v5 = vsel %vm760_vm4, %v1267_v47, -inf  ;;  %v1073_v58 = vcombine.high %v741_v32, %v741_v32  ;;  %v7772_v27 = vadd.f32 %v7509_v14, %v8932_v63 }
 0x1cb   : > { %v1276_v18 = vcombine.high %v1274_v38, %v1274_v38  ;;  %v2219_v39 = vrot.slane %v2218_v5, 4  ;;  %v2232_v7 = vsel %vm760_vm4, %v1274_v38, -inf  ;;  %v1080_v22 = vrot.slane %v741_v32, %v7155_v43 }
 0x1cc   : > { %v7776_v19 = vmax.f32 %v1851_v25, %v1852_v17  ;;  %v2225_v54 = vsel %vm760_vm4, %v1275_v57, -inf  ;;  %v2233_v35 = vrot.slane %v2232_v7, 4  ;;  %v1087_v10 = vrot.slane %v1073_v58, %v7155_v43 }
 0x1cd   : > { %v2220_v15 = vmax.f32 %v2218_v5, %v2219_v39  ;;  %v2226_v6 = vrot.slane %v2225_v54, 4  ;;  %v2239_v46 = vsel %vm760_vm4, %v1276_v18, -inf  ;;  %v1088_v23 = vcombine.high %v1080_v22, %v1080_v22 }
 0x1ce   : > { %v2234_v12 = vmax.f32 %v2232_v7, %v2233_v35  ;;  %v2240_v31 = vrot.slane %v2239_v46, 4  ;;  %v1089_v36 = vcombine.high %v1087_v10, %v1087_v10  ;;  %v1910_v3 = vsel %vm760_vm4, %v1080_v22, -inf }
 0x1cf   : > { %v2221_v41 = vrot.slane %v2220_v15, 2  ;;  %v2227_v21 = vmax.f32 %v2225_v54, %v2226_v6  ;;  %v1911_v44 = vrot.slane %v1910_v3, 4  ;;  %v1917_v40 = vsel %vm760_vm4, %v1088_v23, -inf }
 0x1d0   : > { %v2235_v4 = vrot.slane %v2234_v12, 2  ;;  %v2241_v25 = vmax.f32 %v2239_v46, %v2240_v31  ;;  %v1918_v42 = vrot.slane %v1917_v40, 4  ;;  %v1924_v50 = vsel %vm760_vm4, %v1087_v10, -inf }
 0x1d1   : > { %v2222_v0 = vmax.f32 %v2220_v15, %v2221_v41  ;;  %v2228_v17 = vrot.slane %v2227_v21, 2  ;;  %v1912_v47 = vmax.f32 %v1910_v3, %v1911_v44  ;;  %v1925_v32 = vrot.slane %v1924_v50, 4 }
 0x1d2   : > { %v2236_v38 = vmax.f32 %v2234_v12, %v2235_v4  ;;  %v2242_v57 = vrot.slane %v2241_v25, 2  ;;  %v1919_v5 = vmax.f32 %v1917_v40, %v1918_v42  ;;  %v1931_v58 = vsel %vm760_vm4, %v1089_v36, -inf }
 0x1d3   : > { %v2223_v63 = vrot.slane %v2222_v0, 1  ;;  %v2229_v18 = vmax.f32 %v2227_v21, %v2228_v17  ;;  %v1913_v39 = vrot.slane %v1912_v47, 2  ;;  %v1926_v7 = vmax.f32 %v1924_v50, %v1925_v32 }
 0x1d4   : > { %v2237_v22 = vrot.slane %v2236_v38, 1  ;;  %v2243_v54 = vmax.f32 %v2241_v25, %v2242_v57  ;;  %v1920_v35 = vrot.slane %v1919_v5, 2  ;;  %v1932_v6 = vrot.slane %v1931_v58, 4 }
 0x1d5   : > { %v2224_v46 = vmax.f32 %v2222_v0, %v2223_v63  ;;  %v2230_v23 = vrot.slane %v2229_v18, 1  ;;  %v1914_v10 = vmax.f32 %v1912_v47, %v1913_v39  ;;  %v1927_v15 = vrot.slane %v1926_v7, 2 }
 0x1d6   : > { %v2238_v31 = vmax.f32 %v2236_v38, %v2237_v22  ;;  %v2244_v3 = vrot.slane %v2243_v54, 1  ;;  %v1921_v41 = vmax.f32 %v1919_v5, %v1920_v35  ;;  %v1933_v12 = vmax.f32 %v1931_v58, %v1932_v6 }
 0x1d7   : > { %v2231_v44 = vmax.f32 %v2229_v18, %v2230_v23  ;;  %v2531_v40 = vsel %vm758_vm5, %v2224_v46, -inf  ;;  %v1915_v36 = vrot.slane %v1914_v10, 1  ;;  %v1928_v4 = vmax.f32 %v1926_v7, %v1927_v15 }
 0x1d8   : > { %v2245_v21 = vmax.f32 %v2243_v54, %v2244_v3  ;;  %v2532_v42 = vmax.f32 %v7678_v11, %v2531_v40  ;;  %v2537_v25 = vsel %vm758_vm5, %v2238_v31, -inf  ;;  %v1922_v50 = vrot.slane %v1921_v41, 1 }
 0x1d9   : > { %v2534_v0 = vsel %vm758_vm5, %v2231_v44, -inf  ;;  %v2538_v17 = vmax.f32 %v7686_v52, %v2537_v25  ;;  %v1916_v47 = vmax.f32 %v1914_v10, %v1915_v36  ;;  %v1929_v32 = vrot.slane %v1928_v4, 1 }
 0x1da   : > { %v2535_v38 = vmax.f32 %v7681_v29, %v2534_v0  ;;  %v2540_v57 = vsel %vm758_vm5, %v2245_v21, -inf  ;;  %v1923_v5 = vmax.f32 %v1921_v41, %v1922_v50  ;;  %v1934_v58 = vrot.slane %v1933_v12, 2  ;;  %v8933_v41 = vld [vmem:[#allocation8_spill] sm:$0xff] }
 0x1db   : > { %v2541_v63 = vmax.f32 %v7693_v8, %v2540_v57  ;;  %v1930_v18 = vmax.f32 %v1928_v4, %v1929_v32  ;;  %v7794_v11 = vsel %vm758_vm5, %v1916_v47, -inf  ;;  %v740_v39 = vmax.f32 %v7767_v28, 0.0 }
 0x1dc   : > { %v2691_v7 = vsel %vm2642_vm6, %v2535_v38, %v2532_v42  ;;  %v1935_v22 = vmax.f32 %v1933_v12, %v1934_v58  ;;  %v2472_v52 = vmax.f32 %v7696_v55, %v7794_v11  ;;  %v7801_v29 = vsel %vm758_vm5, %v1923_v5, -inf }
 0x1dd   : > { %v2692_v54 = vsel %vm2644_vm7, %v2538_v17, %v2691_v7  ;;  %v2475_v8 = vmax.f32 %v7699_v13, %v7801_v29  ;;  %v7807_v35 = vsel %vm758_vm5, %v1930_v18, -inf  ;;  %v1056_v6 = vcombine.high %v740_v39, %v740_v39 }
 0x1de   : > { %v2693_v28 = vsel %vm2646_vm8, %v2541_v63, %v2692_v54  ;;  %v1936_v46 = vrot.slane %v1935_v22, 1  ;;  %v2478_v23 = vmax.f32 %v7705_v1, %v7807_v35  ;;  %v1063_v10 = vrot.slane %v740_v39, %v7155_v43 }
 0x1df   : > { %v2694_v15 = vsel %vm2648_vm9, %v2544_v59, %v2693_v28  ;;  %v1070_v31 = vrot.slane %v1056_v6, %v7155_v43  ;;  %v743_v3 = vmax.f32 %v7772_v27, 0.0  ;;  %v648_v12 = vadd.f32 %v7509_v14, %v8933_v41 }
 0x1e0   : > { %v2695_v44 = vsel %vm2650_vm10, %v2547_v26, %v2694_v15  ;;  %v1937_v40 = vmax.f32 %v1935_v22, %v1936_v46  ;;  %v1071_v36 = vcombine.high %v1063_v10, %v1063_v10  ;;  %v1882_v4 = vsel %vm760_vm4, %v1063_v10, -inf }
 0x1e1   : > { %v2696_v48 = vsel %vm2652_vm11, %v2550_v53, %v2695_v44  ;;  %v1072_v62 = vcombine.high %v1070_v31, %v1070_v31  ;;  %v1883_v59 = vrot.slane %v1882_v4, 4  ;;  %v1896_v27 = vsel %vm760_vm4, %v1070_v31, -inf }
 0x1e2   : > { %v2697_v14 = vsel %vm2654_vm12, %v2553_v24, %v2696_v48  ;;  %v7836_v37 = vsel %vm758_vm5, %v1937_v40, -inf  ;;  %v1889_v9 = vsel %vm760_vm4, %v1071_v36, -inf  ;;  %v1897_v26 = vrot.slane %v1896_v27, 4 }
 0x1e3   : > { %2720 = vst.msk [vmem:[#allocation2 + $0x71] sm:$0xff] %vm758_vm5, %v2697_v14  ;;  %v2481_v16 = vmax.f32 %v7741_v30, %v7836_v37  ;;  %v1884_v20 = vmax.f32 %v1882_v4, %v1883_v59  ;;  %v1890_v53 = vrot.slane %v1889_v9, 4  ;;  %v1903_v21 = vsel %vm760_vm4, %v1072_v62, -inf  ;;  %v2743_v30 = vld [vmem:[%s8911_s3 + $0x28] sm:$0xff] }
 0x1e4   : > { %v1898_v42 = vmax.f32 %v1896_v27, %v1897_v26  ;;  %v1904_v25 = vrot.slane %v1903_v21, 4  ;;  %v1107_v49 = vcombine.high %v743_v3, %v743_v3  ;;  %v1114_v56 = vrot.slane %v743_v3, %v7155_v43 }
 0x1e5   : > { %v2467_v24 = vsel %vm758_vm5, %v7776_v19, -inf  ;;  %v1885_v50 = vrot.slane %v1884_v20, 2  ;;  %v1891_v0 = vmax.f32 %v1889_v9, %v1890_v53  ;;  %v742_v17 = vmax.f32 %v648_v12, 0.0 }
 0x1e6   : > { %v1899_v47 = vrot.slane %v1898_v42, 2  ;;  %v1905_v32 = vmax.f32 %v1903_v21, %v1904_v25  ;;  %v1121_v38 = vrot.slane %v1107_v49, %v7155_v43  ;;  %v1122_v57 = vcombine.high %v1114_v56, %v1114_v56 }
 0x1e7   : > { %v1886_v5 = vmax.f32 %v1884_v20, %v1885_v50  ;;  %v1892_v58 = vrot.slane %v1891_v0, 2  ;;  %v1966_v63 = vsel %vm760_vm4, %v1114_v56, -inf  ;;  %v1090_v18 = vcombine.high %v742_v17, %v742_v17 }
 0x1e8   : > { %v1900_v39 = vmax.f32 %v1898_v42, %v1899_v47  ;;  %v1906_v7 = vrot.slane %v1905_v32, 2  ;;  %v1123_v22 = vcombine.high %v1121_v38, %v1121_v38  ;;  %v1967_v54 = vrot.slane %v1966_v63, 4 }
 0x1e9   : > { %v1887_v6 = vrot.slane %v1886_v5, 1  ;;  %v1893_v28 = vmax.f32 %v1891_v0, %v1892_v58  ;;  %v1973_v19 = vsel %vm760_vm4, %v1122_v57, -inf  ;;  %v1980_v46 = vsel %vm760_vm4, %v1121_v38, -inf }
 0x1ea   : > { %v1901_v10 = vrot.slane %v1900_v39, 1  ;;  %v1907_v15 = vmax.f32 %v1905_v32, %v1906_v7  ;;  %v1968_v31 = vmax.f32 %v1966_v63, %v1967_v54  ;;  %v1974_v3 = vrot.slane %v1973_v19, 4 }
 0x1eb   : > { %v1888_v41 = vmax.f32 %v1886_v5, %v1887_v6  ;;  %v1894_v12 = vrot.slane %v1893_v28, 1  ;;  %v1981_v44 = vrot.slane %v1980_v46, 4  ;;  %v1987_v40 = vsel %vm760_vm4, %v1123_v22, -inf }
 0x1ec   : > { %v1902_v36 = vmax.f32 %v1900_v39, %v1901_v10  ;;  %v1908_v4 = vrot.slane %v1907_v15, 1  ;;  %v1969_v48 = vrot.slane %v1968_v31, 2  ;;  %v1975_v62 = vmax.f32 %v1973_v19, %v1974_v3 }
 0x1ed   : > { %v1895_v59 = vmax.f32 %v1893_v28, %v1894_v12  ;;  %v2459_v27 = vsel %vm758_vm5, %v1888_v41, -inf  ;;  %v1982_v14 = vmax.f32 %v1980_v46, %v1981_v44  ;;  %v1988_v9 = vrot.slane %v1987_v40, 4 }
 0x1ee   : > { %v1909_v26 = vmax.f32 %v1907_v15, %v1908_v4  ;;  %v2460_v20 = vmax.f32 %v7753_v51, %v2459_v27  ;;  %v2465_v53 = vsel %vm758_vm5, %v1902_v36, -inf  ;;  %v1970_v21 = vmax.f32 %v1968_v31, %v1969_v48  ;;  %v2742_v48 = vld [vmem:[%s8911_s3 + $0x20] sm:$0xff] }
 0x1ef   : > { %v2462_v42 = vsel %vm758_vm5, %v1895_v59, -inf  ;;  %v2466_v25 = vmax.f32 %v7762_v33, %v2465_v53  ;;  %v1976_v49 = vrot.slane %v1975_v62, 2  ;;  %v1983_v56 = vrot.slane %v1982_v14, 2  ;;  %v8935_v59 = vld [vmem:[#allocation10_spill] sm:$0xff] }
 0x1f0   : > { %v2463_v50 = vmax.f32 %v7759_v2, %v2462_v42  ;;  %v2468_v0 = vsel %vm758_vm5, %v1909_v26, -inf  ;;  %v1971_v47 = vrot.slane %v1970_v21, 1  ;;  %v1989_v32 = vmax.f32 %v1987_v40, %v1988_v9 }
 0x1f1   : > { %v2469_v38 = vmax.f32 %v2467_v24, %v2468_v0  ;;  %v1977_v57 = vmax.f32 %v1975_v62, %v1976_v49  ;;  %v1984_v5 = vmax.f32 %v1982_v14, %v1983_v56  ;;  %v1097_v51 = vrot.slane %v742_v17, %v7155_v43  ;;  %v7866_v24 = vld [vmem:[%s8910_s2] ss:$0 sm:$0xff]  ;;  %v8934_v17 = vld [vmem:[#allocation9_spill] sm:$0xff] }
 0x1f2   : > { %v2670_v58 = vsel %vm2642_vm6, %v2463_v50, %v2460_v20  ;;  %v1972_v63 = vmax.f32 %v1970_v21, %v1971_v47  ;;  %v1990_v39 = vrot.slane %v1989_v32, 2  ;;  %v1104_v7 = vrot.slane %v1090_v18, %v7155_v43 }
 0x1f3   : > { %v2671_v33 = vsel %vm2644_vm7, %v2466_v25, %v2670_v58  ;;  %v1978_v22 = vrot.slane %v1977_v57, 1  ;;  %v1985_v54 = vrot.slane %v1984_v5, 1  ;;  %v1105_v2 = vcombine.high %v1097_v51, %v1097_v51 }
 0x1f4   : > { %v2672_v6 = vsel %vm2646_vm8, %v2469_v38, %v2671_v33  ;;  %v1991_v28 = vmax.f32 %v1989_v32, %v1990_v39  ;;  %v1106_v19 = vcombine.high %v1104_v7, %v1104_v7  ;;  %v663_v46 = vadd.f32 %v7866_v24, %v8934_v17 }
 0x1f5   : > { %v2673_v18 = vsel %vm2648_vm9, %v2472_v52, %v2672_v6  ;;  %v1979_v10 = vmax.f32 %v1977_v57, %v1978_v22  ;;  %v1986_v15 = vmax.f32 %v1984_v5, %v1985_v54  ;;  %v1938_v31 = vsel %vm760_vm4, %v1097_v51, -inf }
 0x1f6   : > { %v2674_v3 = vsel %vm2650_vm10, %v2475_v8, %v2673_v18  ;;  %v1992_v41 = vrot.slane %v1991_v28, 1  ;;  %v1939_v12 = vrot.slane %v1938_v31, 4  ;;  %v1945_v44 = vsel %vm760_vm4, %v1105_v2, -inf }
 0x1f7   : > { %v2675_v55 = vsel %vm2652_vm11, %v2478_v23, %v2674_v3  ;;  %v7885_v11 = vsel %vm758_vm5, %v1972_v63, -inf  ;;  %v7888_v52 = vsel %vm758_vm5, %v1979_v10, -inf  ;;  %v1946_v40 = vrot.slane %v1945_v44, 4 }
 0x1f8   : > { %v2676_v13 = vsel %vm2654_vm12, %v2481_v16, %v2675_v55  ;;  %v7895_v29 = vsel %vm758_vm5, %v1986_v15, -inf  ;;  %v1940_v8 = vmax.f32 %v1938_v31, %v1939_v12  ;;  %v1952_v1 = vsel %vm760_vm4, %v1104_v7, -inf }
 0x1f9   : > { %2717 = vst.msk [vmem:[#allocation2 + $0x41] sm:$0xff] %vm758_vm5, %v2676_v13  ;;  %v1947_v35 = vmax.f32 %v1945_v44, %v1946_v40  ;;  %v1953_v23 = vrot.slane %v1952_v1, 4  ;;  %v1959_v36 = vsel %vm760_vm4, %v1106_v19, -inf  ;;  %v745_v4 = vmax.f32 %v663_v46, 0.0 }
 0x1fa   : > { %v1993_v37 = vmax.f32 %v1991_v28, %v1992_v41  ;;  %v1941_v16 = vrot.slane %v1940_v8, 2  ;;  %v1960_v62 = vrot.slane %v1959_v36, 4  ;;  %v658_v27 = vadd.f32 %v7866_v24, %v8935_v59 }
 0x1fb   : > { %v1948_v14 = vrot.slane %v1947_v35, 2  ;;  %v1954_v9 = vmax.f32 %v1952_v1, %v1953_v23  ;;  %v1141_v26 = vcombine.high %v745_v4, %v745_v4  ;;  %v1148_v20 = vrot.slane %v745_v4, %v7155_v43 }
 0x1fc   : > { %v1942_v53 = vmax.f32 %v1940_v8, %v1941_v16  ;;  %v1961_v21 = vmax.f32 %v1959_v36, %v1960_v62  ;;  %v744_v42 = vmax.f32 %v658_v27, 0.0  ;;  %v6655_v25 = vpack.c.bf16 %v2743_v30, %v2742_v48 }
 0x1fd   : > { %v1949_v49 = vmax.f32 %v1947_v35, %v1948_v14  ;;  %v1955_v56 = vrot.slane %v1954_v9, 2  ;;  %v1155_v50 = vrot.slane %v1141_v26, %v7155_v43  ;;  %v1156_v0 = vcombine.high %v1148_v20, %v1148_v20 }
 0x1fe   : > { %v1943_v47 = vrot.slane %v1942_v53, 1  ;;  %v1962_v32 = vrot.slane %v1961_v21, 2  ;;  %v2022_v38 = vsel %vm760_vm4, %v1148_v20, -inf  ;;  %v1124_v57 = vcombine.high %v744_v42, %v744_v42  ;;  %6656 = vmatprep.subr.bf16.mxu1 %v6655_v25 }
 0x1ff   : > { %v1950_v5 = vrot.slane %v1949_v49, 1  ;;  %v1956_v51 = vmax.f32 %v1954_v9, %v1955_v56  ;;  %v1157_v58 = vcombine.high %v1155_v50, %v1155_v50  ;;  %v2023_v63 = vrot.slane %v2022_v38, 4  ;;  %6658 = vmatpush3.bf16.msra.mxu1 %v6655_v25 }
 0x200   : > { %v1944_v39 = vmax.f32 %v1942_v53, %v1943_v47  ;;  %v1963_v7 = vmax.f32 %v1961_v21, %v1962_v32  ;;  %v2029_v33 = vsel %vm760_vm4, %v1156_v0, -inf  ;;  %v2036_v22 = vsel %vm760_vm4, %v1155_v50, -inf }
 0x201   : > { %v1951_v54 = vmax.f32 %v1949_v49, %v1950_v5  ;;  %v1957_v2 = vrot.slane %v1956_v51, 1  ;;  %v2024_v6 = vmax.f32 %v2022_v38, %v2023_v63  ;;  %v2030_v28 = vrot.slane %v2029_v33, 4 }
 0x202   : > { %v7914_v19 = vsel %vm758_vm5, %v1993_v37, -inf  ;;  %v1964_v17 = vrot.slane %v1963_v7, 1  ;;  %v2037_v46 = vrot.slane %v2036_v22, 4  ;;  %v2043_v18 = vsel %vm760_vm4, %v1157_v58, -inf }
 0x203   : > { %v1958_v10 = vmax.f32 %v1956_v51, %v1957_v2  ;;  %v7918_v15 = vsel %vm758_vm5, %v1944_v39, -inf  ;;  %v2025_v31 = vrot.slane %v2024_v6, 2  ;;  %v2031_v3 = vmax.f32 %v2029_v33, %v2030_v28  ;;  %v2745_v33 = vld [vmem:[%s8911_s3 + $0x38] sm:$0xff] }
 0x204   : > { %v7921_v41 = vsel %vm758_vm5, %v1951_v54, -inf  ;;  %v2038_v12 = vmax.f32 %v2036_v22, %v2037_v46  ;;  %v2044_v44 = vrot.slane %v2043_v18, 4  ;;  %v1131_v55 = vrot.slane %v744_v42, %v7155_v43 }
 0x205   : > { %v7924_v40 = vmax.f32 %v1963_v7, %v1964_v17  ;;  %v2026_v13 = vmax.f32 %v2024_v6, %v2025_v31  ;;  %v2032_v8 = vrot.slane %v2031_v3, 2  ;;  %v1138_v1 = vrot.slane %v1124_v57, %v7155_v43  ;;  %v2744_v7 = vld [vmem:[%s8911_s3 + $0x30] sm:$0xff]  ;;  %v2731_v31 = vld [vmem:[%s8911_s3 + $0x8] sm:$0xff] }
 0x206   : > { %v7928_v35 = vsel %vm758_vm5, %v1958_v10, -inf  ;;  %v2039_v23 = vrot.slane %v2038_v12, 2  ;;  %v2045_v36 = vmax.f32 %v2043_v18, %v2044_v44  ;;  %v1139_v4 = vcombine.high %v1131_v55, %v1131_v55  ;;  %v2730_v10 = vld [vmem:[%s8911_s3] sm:$0xff] }
 0x207   : > { %v2027_v48 = vrot.slane %v2026_v13, 1  ;;  %v2033_v30 = vmax.f32 %v2031_v3, %v2032_v8  ;;  %v1140_v37 = vcombine.high %v1138_v1, %v1138_v1  ;;  %v1994_v16 = vsel %vm760_vm4, %v1131_v55, -inf }
 0x208   : > { %v2040_v62 = vmax.f32 %v2038_v12, %v2039_v23  ;;  %v2046_v59 = vrot.slane %v2045_v36, 2  ;;  %v1995_v27 = vrot.slane %v1994_v16, 4  ;;  %v2001_v14 = vsel %vm760_vm4, %v1139_v4, -inf }
 0x209   : > { %v2028_v9 = vmax.f32 %v2026_v13, %v2027_v48  ;;  %v2034_v26 = vrot.slane %v2033_v30, 1  ;;  %v2002_v20 = vrot.slane %v2001_v14, 4  ;;  %v2008_v53 = vsel %vm760_vm4, %v1138_v1, -inf }
 0x20a   : > { %v2041_v21 = vrot.slane %v2040_v62, 1  ;;  %v2047_v42 = vmax.f32 %v2045_v36, %v2046_v59  ;;  %v1996_v25 = vmax.f32 %v1994_v16, %v1995_v27  ;;  %v2009_v49 = vrot.slane %v2008_v53, 4 }
 0x20b   : > { %v2035_v56 = vmax.f32 %v2033_v30, %v2034_v26  ;;  %v7934_v50 = vsel %vm758_vm5, %v2028_v9, -inf  ;;  %v2003_v0 = vmax.f32 %v2001_v14, %v2002_v20  ;;  %v2015_v47 = vsel %vm760_vm4, %v1140_v37, -inf }
 0x20c   : > { %v2042_v32 = vmax.f32 %v2040_v62, %v2041_v21  ;;  %v2048_v38 = vrot.slane %v2047_v42, 1  ;;  %v2496_v57 = vmax.f32 %v7885_v11, %v7934_v50  ;;  %v1997_v5 = vrot.slane %v1996_v25, 2 }
 0x20d   : > { %v7940_v51 = vsel %vm758_vm5, %v2035_v56, -inf  ;;  %v2004_v58 = vrot.slane %v2003_v0, 2  ;;  %v2010_v63 = vmax.f32 %v2008_v53, %v2009_v49  ;;  %v2016_v39 = vrot.slane %v2015_v47, 4  ;;  %v8002_v56 = vld [vmem:[#allocation2 + $0x11] sm:$0xff] }
 0x20e   : > { %v2049_v22 = vmax.f32 %v2047_v42, %v2048_v38  ;;  %v2499_v54 = vmax.f32 %v7888_v52, %v7940_v51  ;;  %v7951_v2 = vsel %vm758_vm5, %v2042_v32, -inf  ;;  %v1998_v6 = vmax.f32 %v1996_v25, %v1997_v5  ;;  %v8009_v5 = vld [vmem:[#allocation2 + $0x21] sm:$0xff] }
 0x20f   : > { %v2502_v28 = vmax.f32 %v7895_v29, %v7951_v2  ;;  %v2005_v17 = vmax.f32 %v2003_v0, %v2004_v58  ;;  %v2011_v46 = vrot.slane %v2010_v63, 2  ;;  %v2017_v18 = vmax.f32 %v2015_v47, %v2016_v39 }
 0x210   : > { %v7962_v3 = vsel %vm758_vm5, %v2049_v22, -inf  ;;  %v1999_v12 = vrot.slane %v1998_v6, 1  ;;  %v6659_v44 = vpack.c.bf16 %v2745_v33, %v2744_v7  ;;  %v6999_v23 = vmov 0.0  }
 0x211   : > { %v2505_v55 = vmax.f32 %v7914_v19, %v7962_v3  ;;  %v2006_v13 = vrot.slane %v2005_v17, 1  ;;  %v2012_v8 = vmax.f32 %v2010_v63, %v2011_v46  ;;  %v2018_v1 = vrot.slane %v2017_v18, 2  ;;  %759 = vst.msk [vmem:[#allocation2] sm:$0xff] %vm758_vm5, %v6999_v23  ;;  %763 = vst.msk [vmem:[#allocation2 + $0x90] sm:$0xff] %vm758_vm5, %v6999_v23  ;;  %v8021_v46 = vld [vmem:[#allocation2 + $0x31] sm:$0xff] }
 0x212   : > { %761 = vst.msk [vmem:[#allocation2 + $0x8] sm:$0x3] %vm760_vm4, %v6999_v23  ;;  %764 = vst.msk [vmem:[#allocation2 + $0x98] sm:$0x3] %vm760_vm4, %v6999_v23  ;;  %v2000_v36 = vmax.f32 %v1998_v6, %v1999_v12  ;;  %6660 = vmatprep.subr.bf16.mxu1 %v6659_v44  ;;  %v6663_v4 = vpack.c.bf16 %v2731_v31, %v2730_v10  ;;  %v713_v48 = vadd.f32 %v7866_v24, %v7653_v61 }
 0x213   : > { %5475 = vst [vmem:[#allocation4] sm:$0x3f] %v6999_v23  ;;  %5477 = vst [vmem:[#allocation4 + $0x28] sm:$0x3f] %v6999_v23  ;;  %v708_v30 = vadd.f32 %v7866_v24, %v7672_v34  ;;  %v2007_v37 = vmax.f32 %v2005_v17, %v2006_v13  ;;  %v2013_v16 = vrot.slane %v2012_v8, 1  ;;  %v2019_v62 = vmax.f32 %v2017_v18, %v2018_v1  ;;  %v8027_v13 = vld [vmem:[#allocation2 + $0x41] sm:$0xff] }
 0x214   : > { %5479 = vst [vmem:[#allocation4 + $0x8] sm:$0x1] %v6999_v23  ;;  %5480 = vst [vmem:[#allocation4 + $0x10] sm:$0x1] %v6999_v23  ;;  %6662 = vmatpush3.bf16.msra.mxu1 %v6659_v44  ;;  %v723_v59 = vadd.f32 %v7866_v24, %v7683_v60  ;;  %v2491_v27 = vsel %vm758_vm5, %v7924_v40, -inf  ;;  %v2483_v14 = vsel %vm758_vm5, %v2000_v36, -inf }
 0x215   : > { %5481 = vst [vmem:[#allocation4 + $0x18] sm:$0x1] %v6999_v23  ;;  %5482 = vst [vmem:[#allocation4 + $0x20] sm:$0x1] %v6999_v23  ;;  %6664 = vmatprep.subr.bf16.mxu1 %v6663_v4  ;;  %v755_v9 = vmax.f32 %v713_v48, 0.0  ;;  %v754_v26 = vmax.f32 %v708_v30, 0.0  ;;  %v2014_v20 = vmax.f32 %v2012_v8, %v2013_v16  ;;  %v2484_v53 = vmax.f32 %v7918_v15, %v2483_v14 }
 0x216   : > { %5485 = vst [vmem:[#allocation4 + $0xd] sm:$0x1] %v6999_v23  ;;  %5486 = vst [vmem:[#allocation4 + $0x15] sm:$0x1] %v6999_v23  ;;  %v2020_v61 = vrot.slane %v2019_v62, 1  ;;  %v2486_v34 = vsel %vm758_vm5, %v2007_v37, -inf }
 0x217   : > { %5487 = vst [vmem:[#allocation4 + $0x1d] sm:$0x1] %v6999_v23  ;;  %5488 = vst [vmem:[#allocation4 + $0x25] sm:$0x1] %v6999_v23  ;;  %v2487_v21 = vmax.f32 %v7921_v41, %v2486_v34  ;;  %v1311_v42 = vcombine.high %v755_v9, %v755_v9  ;;  %v1318_v25 = vrot.slane %v755_v9, %v7155_v43  ;;  %v2489_v40 = vsel %vm758_vm5, %v2014_v20, -inf }
 0x218   : > { %5478 = vst [vmem:[#allocation4] sm:$0x1] %v6999_v23  ;;  %5483 = vst [vmem:[#allocation4 + $0x28] sm:$0x1] %v6999_v23  ;;  %v1294_v60 = vcombine.high %v754_v26, %v754_v26  ;;  %v2021_v49 = vmax.f32 %v2019_v62, %v2020_v61  ;;  %v1301_v0 = vrot.slane %v754_v26, %v7155_v43  ;;  %v8005_v47 = vmax.f32 %v723_v59, 0.0 }
 0x219   : > { %5484 = vst [vmem:[#allocation4 + $0x5] sm:$0x1] %v6999_v23  ;;  %5489 = vst [vmem:[#allocation4 + $0x2d] sm:$0x1] %v6999_v23  ;;  %v2490_v32 = vmax.f32 %v7928_v35, %v2489_v40  ;;  %v2677_v15 = vsel %vm2642_vm6, %v2487_v21, %v2484_v53  ;;  %v2734_v38 = vld [vmem:[#allocation2 + $0x1] sm:$0xff]  ;;  %v1325_v41 = vrot.slane %v1311_v42, %v7155_v43  ;;  %v2302_v39 = vsel %vm760_vm4, %v1318_v25, -inf }
 0x21a   : > { %v1326_v58 = vcombine.high %v1318_v25, %v1318_v25  ;;  %v2492_v63 = vsel %vm758_vm5, %v2021_v49, -inf  ;;  %6306 = vmatprep.mubr.msk.f32.mxu1 %vm758_vm5, %v2734_v38  ;;  %v1308_v7 = vrot.slane %v1294_v60, %v7155_v43  ;;  %v1309_v33 = vcombine.high %v1301_v0, %v1301_v0  ;;  %766 = vst.msk [vmem:[#allocation2] sm:$0x1] %vm765_vm13, %v6999_v23 }
 0x21b   : > { %v2493_v22 = vmax.f32 %v2491_v27, %v2492_v63  ;;  %v2678_v35 = vsel %vm2644_vm7, %v2490_v32, %v2677_v15  ;;  %6307 = vmatmul.mubr.msk.f32.vlgmr.msra.gmra.mrb[12].mxu1 %vm758_vm5, %v8002_v56  ;;  %v1327_v6 = vcombine.high %v1325_v41, %v1325_v41  ;;  %v2303_v17 = vrot.slane %v2302_v39, 4  ;;  %767 = vst.msk [vmem:[#allocation2 + $0x10] sm:$0x1] %vm765_vm13, %v6999_v23 }
 0x21c   : > { %6309 = vmatprep.mubr.msk.f32.mxu1 %vm758_vm5, %v8009_v5  ;;  %6666 = vmatpush3.bf16.msra.mxu1 %v6663_v4  ;;  %v2309_v18 = vsel %vm760_vm4, %v1326_v58, -inf  ;;  %v2316_v10 = vsel %vm760_vm4, %v1325_v41, -inf  ;;  %v1310_v31 = vcombine.high %v1308_v7, %v1308_v7  ;;  %v2274_v12 = vsel %vm760_vm4, %v1301_v0, -inf  ;;  %768 = vst.msk [vmem:[#allocation2 + $0x20] sm:$0x1] %vm765_vm13, %v6999_v23 }
 0x21d   : > { %v2679_v44 = vsel %vm2646_vm8, %v2493_v22, %v2678_v35  ;;  %v2304_v8 = vmax.f32 %v2302_v39, %v2303_v17  ;;  %v2310_v1 = vrot.slane %v2309_v18, 4  ;;  %v2317_v36 = vrot.slane %v2316_v10, 4  ;;  %v2732_v17 = vld [vmem:[%s8911_s3 + $0x10] sm:$0xff]  ;;  %769 = vst.msk [vmem:[#allocation2 + $0x30] sm:$0x1] %vm765_vm13, %v6999_v23 }
 0x21e   : > { %v2680_v48 = vsel %vm2648_vm9, %v2496_v57, %v2679_v44  ;;  %v2323_v4 = vsel %vm760_vm4, %v1327_v6, -inf  ;;  %v2275_v30 = vrot.slane %v2274_v12, 4  ;;  %v2281_v37 = vsel %vm760_vm4, %v1309_v33, -inf  ;;  %770 = vst.msk [vmem:[#allocation2 + $0x40] sm:$0x1] %vm765_vm13, %v6999_v23 }
 0x21f   : > { %v2681_v16 = vsel %vm2650_vm10, %v2499_v54, %v2680_v48  ;;  %6310 = vmatmul.mubr.msk.f32.gmra.mrb[14].mxu1 %vm758_vm5, %v8021_v46  ;;  %v2305_v62 = vrot.slane %v2304_v8, 2  ;;  %v2311_v59 = vmax.f32 %v2309_v18, %v2310_v1  ;;  %v2318_v27 = vmax.f32 %v2316_v10, %v2317_v36  ;;  %v2733_v18 = vld [vmem:[%s8911_s3 + $0x18] sm:$0xff]  ;;  %771 = vst.msk [vmem:[#allocation2 + $0x50] sm:$0x1] %vm765_vm13, %v6999_v23 }
 0x220   : > { %v2682_v11 = vsel %vm2652_vm11, %v2502_v28, %v2681_v16  ;;  %6312 = vmatprep.mubr.msk.f32.mxu1 %vm758_vm5, %v8027_v13  ;;  %v2324_v50 = vrot.slane %v2323_v4, 4  ;;  %v2276_v57 = vmax.f32 %v2274_v12, %v2275_v30  ;;  %v2282_v14 = vrot.slane %v2281_v37, 4  ;;  %v8074_v12 = vld [vmem:[#allocation2 + $0x61] sm:$0xff]  ;;  %772 = vst.msk [vmem:[#allocation2 + $0x60] sm:$0x1] %vm765_vm13, %v6999_v23 }
 0x221   : > { %v2683_v52 = vsel %vm2654_vm12, %v2505_v55, %v2682_v11  ;;  %v2306_v51 = vmax.f32 %v2304_v8, %v2305_v62  ;;  %v2312_v54 = vrot.slane %v2311_v59, 2  ;;  %v2319_v9 = vrot.slane %v2318_v27, 2  ;;  %773 = vst.msk [vmem:[#allocation2 + $0x70] sm:$0x1] %vm765_vm13, %v6999_v23  ;;  %774 = vst.msk [vmem:[#allocation2 + $0x80] sm:$0x1] %vm765_vm13, %v6999_v23 }
 0x222   : > { %2718 = vst.msk [vmem:[#allocation2 + $0x51] sm:$0xff] %vm758_vm5, %v2683_v52  ;;  %v2325_v26 = vmax.f32 %v2323_v4, %v2324_v50  ;;  %v2277_v29 = vrot.slane %v2276_v57, 2  ;;  %v2283_v2 = vmax.f32 %v2281_v37, %v2282_v14  ;;  %v2288_v28 = vsel %vm760_vm4, %v1308_v7, -inf }
 0x223   : > { %v2307_v20 = vrot.slane %v2306_v51, 1  ;;  %v2313_v61 = vmax.f32 %v2311_v59, %v2312_v54  ;;  %v2320_v53 = vmax.f32 %v2318_v27, %v2319_v9  ;;  %v2289_v34 = vrot.slane %v2288_v28, 4  ;;  %v8090_v27 = vld [vmem:[#allocation2 + $0x71] sm:$0xff]  ;;  %775 = vst.msk [vmem:[#allocation2 + $0x90] sm:$0x1] %vm765_vm13, %v6999_v23 }
 0x224   : > { %v2326_v21 = vrot.slane %v2325_v26, 2  ;;  %v2278_v42 = vmax.f32 %v2276_v57, %v2277_v29  ;;  %v2284_v25 = vrot.slane %v2283_v2, 2  ;;  %v2295_v19 = vsel %vm760_vm4, %v1310_v31, -inf  ;;  %776 = vst.msk [vmem:[#allocation2 + $0x9] sm:$0x1] %vm765_vm13, %v6999_v23 }
 0x225   : > { %v2308_v3 = vmax.f32 %v2306_v51, %v2307_v20  ;;  %v2314_v55 = vrot.slane %v2313_v61, 1  ;;  %v2321_v60 = vrot.slane %v2320_v53, 1  ;;  %v2290_v49 = vmax.f32 %v2288_v28, %v2289_v34  ;;  %777 = vst.msk [vmem:[#allocation2 + $0x19] sm:$0x1] %vm765_vm13, %v6999_v23  ;;  %778 = vst.msk [vmem:[#allocation2 + $0x29] sm:$0x1] %vm765_vm13, %v6999_v23 }
 0x226   : > { %v2327_v40 = vmax.f32 %v2325_v26, %v2326_v21  ;;  %v2279_v0 = vrot.slane %v2278_v42, 1  ;;  %v2285_v32 = vmax.f32 %v2283_v2, %v2284_v25  ;;  %v2296_v15 = vrot.slane %v2295_v19, 4  ;;  %779 = vst.msk [vmem:[#allocation2 + $0x39] sm:$0x1] %vm765_vm13, %v6999_v23  ;;  %780 = vst.msk [vmem:[#allocation2 + $0x49] sm:$0x1] %vm765_vm13, %v6999_v23 }
 0x227   : > { %v2315_v38 = vmax.f32 %v2313_v61, %v2314_v55  ;;  %v2291_v41 = vrot.slane %v2290_v49, 2  ;;  %v718_v58 = vadd.f32 %v7866_v24, %v7712_v45  ;;  %v2322_v63 = vmax.f32 %v2320_v53, %v2321_v60  ;;  %781 = vst.msk [vmem:[#allocation2 + $0x59] sm:$0x1] %vm765_vm13, %v6999_v23  ;;  %782 = vst.msk [vmem:[#allocation2 + $0x69] sm:$0x1] %vm765_vm13, %v6999_v23 }
 0x228   : > { %v2328_v39 = vrot.slane %v2327_v40, 1  ;;  %v2286_v7 = vrot.slane %v2285_v32, 1  ;;  %v2297_v33 = vmax.f32 %v2295_v19, %v2296_v15  ;;  %v2280_v22 = vmax.f32 %v2278_v42, %v2279_v0  ;;  %783 = vst.msk [vmem:[#allocation2 + $0x79] sm:$0x1] %vm765_vm13, %v6999_v23  ;;  %784 = vst.msk [vmem:[#allocation2 + $0x89] sm:$0x1] %vm765_vm13, %v6999_v23 }
 0x229   : > { %v2292_v35 = vmax.f32 %v2290_v49, %v2291_v41  ;;  %v1345_v6 = vcombine.high %v8005_v47, %v8005_v47  ;;  %v8064_v10 = vld [vmem:[#allocation2 + $0x51] sm:$0xff]  ;;  %v8067_v45 = vsel %vm758_vm5, %v2308_v3, -inf  ;;  %v8070_v24 = vsel %vm758_vm5, %v2315_v38, -inf  ;;  %785 = vst.msk [vmem:[#allocation2 + $0x99] sm:$0x1] %vm765_vm13, %v6999_v23 }
 0x22a   : > { %v2298_v31 = vrot.slane %v2297_v33, 2  ;;  %6313 = vmatmul.mubr.msk.f32.gmra.mrb[16].mxu1 %vm758_vm5, %v8064_v10  ;;  %v2329_v44 = vmax.f32 %v2327_v40, %v2328_v39  ;;  %v1352_v8 = vrot.slane %v8005_v47, %v7155_v43  ;;  %v756_v36 = vmax.f32 %v718_v58, 0.0  ;;  %4072 = vst.msk [vmem:[#allocation3] sm:$0x3f] %vm4071_vm14, %v6999_v23  ;;  %4074 = vst.msk [vmem:[#allocation3 + $0x28] sm:$0x3f] %vm4071_vm14, %v6999_v23 }
 0x22b   : > { %v1359_v1 = vrot.slane %v1345_v6, %v7155_v43  ;;  %6315 = vmatprep.mubr.msk.f32.mxu1 %vm758_vm5, %v8074_v12  ;;  %v8082_v48 = vsel %vm758_vm5, %v2322_v63, -inf  ;;  %v8084_v4 = vmax.f32 %v2285_v32, %v2286_v7  ;;  %v2293_v30 = vrot.slane %v2292_v35, 1  ;;  %4076 = vst.msk [vmem:[#allocation3] sm:$0x1] %vm4075_vm15, %v6999_v23  ;;  %4077 = vst.msk [vmem:[#allocation3 + $0x8] sm:$0x1] %vm4075_vm15, %v6999_v23 }
 0x22c   : > { %v6667_v37 = vpack.c.bf16 %v2733_v18, %v2732_v17  ;;  %v8087_v16 = vsel %vm758_vm5, %v2280_v22, -inf  ;;  %v1360_v62 = vcombine.high %v1352_v8, %v1352_v8  ;;  %v2358_v47 = vsel %vm760_vm4, %v1352_v8, -inf  ;;  %4078 = vst.msk [vmem:[#allocation3 + $0x10] sm:$0x1] %vm4075_vm15, %v6999_v23  ;;  %4079 = vst.msk [vmem:[#allocation3 + $0x18] sm:$0x1] %vm4075_vm15, %v6999_v23 }
 0x22d   : > { %v1361_v59 = vcombine.high %v1359_v1, %v1359_v1  ;;  %v8092_v11 = vmax.f32 %v2297_v33, %v2298_v31  ;;  %v2359_v50 = vrot.slane %v2358_v47, 4  ;;  %v2372_v57 = vsel %vm760_vm4, %v1359_v1, -inf  ;;  %4080 = vst.msk [vmem:[#allocation3 + $0x20] sm:$0x1] %vm4075_vm15, %v6999_v23  ;;  %4081 = vst.msk [vmem:[#allocation3 + $0x28] sm:$0x1] %vm4075_vm15, %v6999_v23 }
 0x22e   : > { %v1328_v14 = vcombine.high %v756_v36, %v756_v36  ;;  %6668 = vmatprep.subr.bf16.mxu1 %v6667_v37  ;;  %6316 = vmatmul.mubr.msk.f32.gmra.mrb[18].mxu1 %vm758_vm5, %v8090_v27  ;;  %v8098_v52 = vsel %vm758_vm5, %v2329_v44, -inf  ;;  %v2365_v51 = vsel %vm760_vm4, %v1360_v62, -inf  ;;  %v2373_v54 = vrot.slane %v2372_v57, 4  ;;  %v2722_v62 = vld [vmem:[#allocation2] sm:$0xff]  ;;  %4082 = vst.msk [vmem:[#allocation3 + $0x5] sm:$0x1] %vm4075_vm15, %v6999_v23 }
 0x22f   : > { %v2379_v9 = vsel %vm760_vm4, %v1361_v59, -inf  ;;  %6670 = vmatpush3.bf16.msra.mxu1 %v6667_v37  ;;  %v8102_v26 = vmax.f32 %v2292_v35, %v2293_v30  ;;  %v2360_v29 = vmax.f32 %v2358_v47, %v2359_v50  ;;  %v2366_v2 = vrot.slane %v2365_v51, 4  ;;  %6326 = vmatprep.mubr.msk.f32.mxu1 %vm758_vm5, %v2722_v62  ;;  %4083 = vst.msk [vmem:[#allocation3 + $0xd] sm:$0x1] %vm4075_vm15, %v6999_v23 }
 0x230   : > { %v2380_v28 = vrot.slane %v2379_v9, 4  ;;  %v2374_v20 = vmax.f32 %v2372_v57, %v2373_v54  ;;  %v1335_v61 = vrot.slane %v756_v36, %v7155_v43  ;;  %v1342_v53 = vrot.slane %v1328_v14, %v7155_v43  ;;  %v3012_v14 = vld [vmem:[%s8911_s3 + $0x40] sm:$0xff]  ;;  %v8161_v54 = vld [vmem:[#allocation2 + $0x10] sm:$0xff]  ;;  %4084 = vst.msk [vmem:[#allocation3 + $0x15] sm:$0x1] %vm4075_vm15, %v6999_v23 }
 0x231   : > { %v2300_v34 = vrot.slane %v8092_v11, 1  ;;  %v2361_v21 = vrot.slane %v2360_v29, 2  ;;  %v2367_v42 = vmax.f32 %v2365_v51, %v2366_v2  ;;  %v3013_v51 = vld [vmem:[%s8911_s3 + $0x48] sm:$0xff]  ;;  %4085 = vst.msk [vmem:[#allocation3 + $0x1d] sm:$0x1] %vm4075_vm15, %v6999_v23 }
 0x232   : > { %v2381_v25 = vmax.f32 %v2379_v9, %v2380_v28  ;;  %v2375_v19 = vrot.slane %v2374_v20, 2  ;;  %v1343_v3 = vcombine.high %v1335_v61, %v1335_v61  ;;  %v1344_v55 = vcombine.high %v1342_v53, %v1342_v53  ;;  %6327 = vmatmul.mubr.msk.f32.vlgmr.msra.gmra.mrb[12].mxu1 %vm758_vm5, %v8161_v54  ;;  %4086 = vst.msk [vmem:[#allocation3 + $0x25] sm:$0x1] %vm4075_vm15, %v6999_v23 }
 0x233   : > { %v2330_v60 = vsel %vm760_vm4, %v1335_v61, -inf  ;;  %v2362_v49 = vmax.f32 %v2360_v29, %v2361_v21  ;;  %v2368_v40 = vrot.slane %v2367_v42, 2  ;;  %v2344_v41 = vsel %vm760_vm4, %v1342_v53, -inf  ;;  %v3014_v61 = vld [vmem:[%s8911_s3 + $0x50] sm:$0xff]  ;;  %v3015_v53 = vld [vmem:[%s8911_s3 + $0x58] sm:$0xff] }
 0x234   : > { %v2382_v0 = vrot.slane %v2381_v25, 2  ;;  %v2331_v32 = vrot.slane %v2330_v60, 4  ;;  %v2376_v15 = vmax.f32 %v2374_v20, %v2375_v19  ;;  %v2337_v38 = vsel %vm760_vm4, %v1343_v3, -inf  ;;  %v8170_v20 = vld [vmem:[#allocation2 + $0x20] sm:$0xff]  ;;  %4087 = vst.msk [vmem:[#allocation3 + $0x2d] sm:$0x1] %vm4075_vm15, %v6999_v23 }
 0x235   : > { %v2351_v58 = vsel %vm760_vm4, %v1344_v55, -inf  ;;  %v2363_v63 = vrot.slane %v2362_v49, 1  ;;  %v2369_v39 = vmax.f32 %v2367_v42, %v2368_v40  ;;  %v2338_v35 = vrot.slane %v2337_v38, 4  ;;  %6329 = vmatprep.mubr.msk.f32.mxu1 %vm758_vm5, %v8170_v20 }
 0x236   : > { %v2383_v7 = vmax.f32 %v2381_v25, %v2382_v0  ;;  %v2332_v33 = vmax.f32 %v2330_v60, %v2331_v32  ;;  %v2377_v22 = vrot.slane %v2376_v15, 1  ;;  %v2345_v6 = vrot.slane %v2344_v41, 4 }
 0x237   : > { %v2352_v17 = vrot.slane %v2351_v58, 4  ;;  %v2364_v18 = vmax.f32 %v2362_v49, %v2363_v63  ;;  %v2370_v31 = vrot.slane %v2369_v39, 1  ;;  %v2339_v36 = vmax.f32 %v2337_v38, %v2338_v35  ;;  %v8196_v63 = vld [vmem:[#allocation2 + $0x40] sm:$0xff] }
 0x238   : > { %v2384_v44 = vrot.slane %v2383_v7, 1  ;;  %v2333_v8 = vrot.slane %v2332_v33, 2  ;;  %v2378_v1 = vmax.f32 %v2376_v15, %v2377_v22  ;;  %v2346_v30 = vmax.f32 %v2344_v41, %v2345_v6  ;;  %v8192_v15 = vld [vmem:[#allocation2 + $0x30] sm:$0xff] }
 0x239   : > { %v2353_v37 = vmax.f32 %v2351_v58, %v2352_v17  ;;  %v2371_v59 = vmax.f32 %v2369_v39, %v2370_v31  ;;  %v8152_v50 = vsel %vm758_vm5, %v2364_v18, -inf  ;;  %v2340_v2 = vrot.slane %v2339_v36, 2  ;;  %6330 = vmatmul.mubr.msk.f32.gmra.mrb[14].mxu1 %vm758_vm5, %v8192_v15  ;;  %v3162_v39 = vld [vmem:[%s8911_s3 + $0x68] sm:$0xff] }
 0x23a   : > { %v2385_v47 = vmax.f32 %v2383_v7, %v2384_v44  ;;  %v2334_v57 = vmax.f32 %v2332_v33, %v2333_v8  ;;  %v2568_v9 = vmax.f32 %v8067_v45, %v8152_v50  ;;  %v8166_v29 = vsel %vm758_vm5, %v2378_v1, -inf  ;;  %6332 = vmatprep.mubr.msk.f32.mxu1 %vm758_vm5, %v8196_v63  ;;  %v8221_v1 = vld [vmem:[#allocation2 + $0x60] sm:$0xff] }
 0x23b   : > { %v2347_v28 = vrot.slane %v2346_v30, 2  ;;  %v8179_v21 = vsel %vm758_vm5, %v2371_v59, -inf  ;;  %v2574_v42 = vmax.f32 %v8082_v48, %v8166_v29  ;;  %v2341_v60 = vmax.f32 %v2339_v36, %v2340_v2  ;;  %v8273_v48 = vld [vmem:[#allocation2 + $0x42] sm:$0xff]  ;;  %v8277_v29 = vld [vmem:[#allocation2 + $0x52] sm:$0xff] }
 0x23c   : > { %v8184_v25 = vsel %vm758_vm5, %v2385_v47, -inf  ;;  %v2335_v19 = vrot.slane %v2334_v57, 1  ;;  %v2571_v3 = vmax.f32 %v8070_v24, %v8179_v21  ;;  %v2354_v0 = vrot.slane %v2353_v37, 2  ;;  %v3161_v24 = vld [vmem:[%s8911_s3 + $0x60] sm:$0xff]  ;;  %v8228_v47 = vld [vmem:[#allocation2 + $0x70] sm:$0xff] }
 0x23d   : > { %v2577_v55 = vmax.f32 %v8098_v52, %v8184_v25  ;;  %v2348_v49 = vmax.f32 %v2346_v30, %v2347_v28  ;;  %v6671_v32 = vpack.c.bf16 %v3013_v51, %v3012_v14  ;;  %v6675_v38 = vpack.c.bf16 %v3015_v53, %v3014_v61  ;;  %v3164_v14 = vld [vmem:[%s8911_s3 + $0x78] sm:$0xff]  ;;  %v8281_v52 = vld [vmem:[#allocation2 + $0x62] sm:$0xff]  ;;  %v3312_v25 = vld [vmem:[%s8911_s3 + $0x90] sm:$0xff] }
 0x23e   : > { %v2336_v40 = vmax.f32 %v2334_v57, %v2335_v19  ;;  %v2342_v41 = vrot.slane %v2341_v60, 1  ;;  %v2301_v7 = vmax.f32 %v8092_v11, %v2300_v34  ;;  %v2557_v33 = vsel %vm758_vm5, %v8084_v4, -inf  ;;  %v8215_v11 = vld [vmem:[#allocation2 + $0x50] sm:$0xff]  ;;  %v3310_v19 = vld [vmem:[%s8911_s3 + $0x80] sm:$0xff] }
 0x23f   : > { %v2349_v58 = vrot.slane %v2348_v49, 1  ;;  %v2355_v22 = vmax.f32 %v2353_v37, %v2354_v0  ;;  %6672 = vmatprep.subr.bf16.mxu1 %v6671_v32  ;;  %v2560_v6 = vsel %vm758_vm5, %v8102_v26, -inf  ;;  %v6679_v4 = vpack.c.bf16 %v3162_v39, %v3161_v24  ;;  %6333 = vmatmul.mubr.msk.f32.gmra.mrb[16].mxu1 %vm758_vm5, %v8215_v11  ;;  %v3004_v37 = vld [vmem:[#allocation2 + $0x2] sm:$0xff]  ;;  %v3163_v57 = vld [vmem:[%s8911_s3 + $0x70] sm:$0xff]  ;;  %v3462_v24 = vld [vmem:[%s8911_s3 + $0xb8] sm:$0xff] }
 0x240   : > { %v2555_v35 = vsel %vm758_vm5, %v2336_v40, -inf  ;;  %v2343_v17 = vmax.f32 %v2341_v60, %v2342_v41  ;;  %6674 = vmatpush3.bf16.msra.mxu1 %v6671_v32  ;;  %v2563_v26 = vsel %vm758_vm5, %v2301_v7, -inf  ;;  %6335 = vmatprep.mubr.msk.f32.mxu1 %vm758_vm5, %v8221_v1  ;;  %v6683_v61 = vpack.c.bf16 %v3164_v14, %v3163_v57  ;;  %v8245_v21 = vld [vmem:[#allocation2 + $0x12] sm:$0xff]  ;;  %v3311_v60 = vld [vmem:[%s8911_s3 + $0x88] sm:$0xff]  ;;  %v3459_v32 = vld [vmem:[%s8911_s3 + $0xa0] sm:$0xff] }
 0x241   : > { %v2350_v18 = vmax.f32 %v2348_v49, %v2349_v58  ;;  %v2556_v31 = vmax.f32 %v8087_v16, %v2555_v35  ;;  %v2356_v44 = vrot.slane %v2355_v22, 1  ;;  %6676 = vmatprep.subr.bf16.mxu1 %v6675_v38  ;;  %v8256_v40 = vld [vmem:[#allocation2 + $0x22] sm:$0xff]  ;;  %v3461_v58 = vld [vmem:[%s8911_s3 + $0xb0] sm:$0xff]  ;;  %v4599_v57 = vld [vmem:[%s8913_s5 + $0x78] sm:$0xff]  ;;  %vm5717_vm4 = vcmask 130048  }
 0x242   : > { %v2558_v34 = vsel %vm758_vm5, %v2343_v17, -inf  ;;  %v6699_v39 = vpack.c.bf16 %v3462_v24, %v3461_v58  ;;  %v3609_v7 = vld [vmem:[%s8911_s3 + $0xc0] sm:$0xff]  ;;  %v3611_v35 = vld [vmem:[%s8911_s3 + $0xd0] sm:$0xff] }
 0x243   : > { %v2561_v8 = vsel %vm758_vm5, %v2350_v18, -inf  ;;  %v2357_v36 = vmax.f32 %v2355_v22, %v2356_v44  ;;  %v2559_v30 = vmax.f32 %v2557_v33, %v2558_v34  ;;  %6336 = vmatmul.mubr.msk.f32.gmra.mrb[18].mxu1 %vm758_vm5, %v8228_v47  ;;  %v3610_v33 = vld [vmem:[%s8911_s3 + $0xc8] sm:$0xff]  ;;  %v3758_v18 = vld [vmem:[%s8911_s3 + $0xe0] sm:$0xff]  ;;  %v3760_v34 = vld [vmem:[%s8911_s3 + $0xf0] sm:$0xff] }
 0x244   : > { %v2562_v16 = vmax.f32 %v2560_v6, %v2561_v8  ;;  %6678 = vmatpush3.bf16.msra.mxu1 %v6675_v38  ;;  %6346 = vmatprep.mubr.msk.f32.mxu1 %vm758_vm5, %v3004_v37  ;;  %v3460_v38 = vld [vmem:[%s8911_s3 + $0xa8] sm:$0xff]  ;;  %v6703_v22 = vpack.c.bf16 %v3610_v33, %v3609_v7  ;;  %v3612_v6 = vld [vmem:[%s8911_s3 + $0xd8] sm:$0xff] }
 0x245   : > { %v2564_v62 = vsel %vm758_vm5, %v2357_v36, -inf  ;;  %v2698_v59 = vsel %vm2642_vm6, %v2559_v30, %v2556_v31  ;;  %6680 = vmatprep.subr.bf16.mxu1 %v6679_v4  ;;  %v6695_v41 = vpack.c.bf16 %v3460_v38, %v3459_v32  ;;  %v6707_v17 = vpack.c.bf16 %v3612_v6, %v3611_v35  ;;  %v3759_v31 = vld [vmem:[%s8911_s3 + $0xe8] sm:$0xff]  ;;  %v3761_v8 = vld [vmem:[%s8911_s3 + $0xf8] sm:$0xff]  ;;  %v3907_v36 = vld [vmem:[%s8911_s3 + $0x100] sm:$0xff] }
 0x246   : > { %v2565_v51 = vmax.f32 %v2563_v26, %v2564_v62  ;;  %v2699_v2 = vsel %vm2644_vm7, %v2562_v16, %v2698_v59  ;;  %v6711_v44 = vpack.c.bf16 %v3759_v31, %v3758_v18  ;;  %v6715_v26 = vpack.c.bf16 %v3761_v8, %v3760_v34  ;;  %v3908_v30 = vld [vmem:[%s8911_s3 + $0x108] sm:$0xff]  ;;  %v4596_v62 = vld [vmem:[%s8913_s5 + $0x60] sm:$0xff] }
 0x247   : > { %6347 = vmatmul.mubr.msk.f32.vlgmr.msra.gmra.mrb[12].mxu1 %vm758_vm5, %v8245_v21  ;;  %v6719_v16 = vpack.c.bf16 %v3908_v30, %v3907_v36  ;;  %v4597_v59 = vld [vmem:[%s8913_s5 + $0x68] sm:$0xff] }
 0x248   : > { %v2700_v28 = vsel %vm2646_vm8, %v2565_v51, %v2699_v2  ;;  %6682 = vmatpush3.bf16.msra.mxu1 %v6679_v4  ;;  %6349 = vmatprep.mubr.msk.f32.mxu1 %vm758_vm5, %v8256_v40  ;;  %v4580_v51 = vld [vmem:[%s8913_s5] sm:$0xff]  ;;  %v4581_v2 = vld [vmem:[%s8913_s5 + $0x8] sm:$0xff] }
 0x249   : > { %v2701_v53 = vsel %vm2648_vm9, %v2568_v9, %v2700_v28  ;;  %6684 = vmatprep.subr.bf16.mxu1 %v6683_v61  ;;  %v6687_v9 = vpack.c.bf16 %v3311_v60, %v3310_v19  ;;  %v8475_v28 = vpack.c.bf16 %v4581_v2, %v4580_v51 }
 0x24a   : > { %v2702_v49 = vsel %vm2650_vm10, %v2571_v3, %v2701_v53  ;;  %v8269_v3 = vld [vmem:[#allocation2 + $0x32] sm:$0xff] }
 0x24b   : > { %v2703_v45 = vsel %vm2652_vm11, %v2574_v42, %v2702_v49  ;;  %6350 = vmatmul.mubr.msk.f32.gmra.mrb[14].mxu1 %vm758_vm5, %v8269_v3  ;;  %v8285_v42 = vld [vmem:[#allocation2 + $0x72] sm:$0xff] }
 0x24c   : > { %v2704_v50 = vsel %vm2654_vm12, %v2577_v55, %v2703_v45  ;;  %6352 = vmatprep.mubr.msk.f32.mxu1 %vm758_vm5, %v8273_v48  ;;  %6686 = vmatpush3.bf16.msra.mxu1 %v6683_v61  ;;  %v3313_v55 = vld [vmem:[%s8911_s3 + $0x98] sm:$0xff]  ;;  %v8481_v61 = vld [vmem:[%s8912_s4] ss:$0 sm:$0xff] }
 0x24d   : > { %2721 = vst.msk [vmem:[#allocation2 + $0x81] sm:$0xff] %vm758_vm5, %v2704_v50  ;;  %6688 = vmatprep.subr.bf16.mxu1 %v6687_v9  ;;  %v6691_v0 = vpack.c.bf16 %v3313_v55, %v3312_v25 }
 0x24f   : > { %6353 = vmatmul.mubr.msk.f32.gmra.mrb[16].mxu1 %vm758_vm5, %v8277_v29 }
 0x250   : > { %6355 = vmatprep.mubr.msk.f32.mxu1 %vm758_vm5, %v8281_v52 }
 0x253   : > { %6356 = vmatmul.mubr.msk.f32.gmra.mrb[18].mxu1 %vm758_vm5, %v8285_v42 }
 0x254   : > { %6366 = vmatprep.mubr.msk.f32.mxu1 %vm758_vm5, %v8161_v54  ;;  %v3160_v54 = vld [vmem:[#allocation2 + $0x80] sm:$0xff] }
 0x255   : > { %v3458_v4 = vld [vmem:[#allocation2 + $0x82] sm:$0xff] }
 0x257   : > { %6367 = vmatmul.mubr.msk.f32.vlgmr.msra.gmra.mrb[12].mxu1 %vm758_vm5, %v8170_v20 }
 0x258   : > { %6690 = vmatpush3.bf16.msra.mxu1 %v6687_v9  ;;  %6369 = vmatprep.mubr.msk.f32.mxu1 %vm758_vm5, %v8192_v15 }
 0x259   : > { %6692 = vmatprep.subr.bf16.mxu1 %v6691_v0 }
 0x25b   : > { %6370 = vmatmul.mubr.msk.f32.gmra.mrb[14].mxu1 %vm758_vm5, %v8196_v63 }
 0x25c   : > { %6372 = vmatprep.mubr.msk.f32.mxu1 %vm758_vm5, %v8215_v11  ;;  %6694 = vmatpush3.bf16.msra.mxu1 %v6691_v0 }
 0x25d   : > { %6696 = vmatprep.subr.bf16.mxu1 %v6695_v41 }
 0x25f   : > { %6373 = vmatmul.mubr.msk.f32.gmra.mrb[16].mxu1 %vm758_vm5, %v8221_v1 }
 0x260   : > { %6375 = vmatprep.mubr.msk.f32.mxu1 %vm758_vm5, %v8228_v47 }
 0x263   : > { %6376 = vmatmul.mubr.msk.f32.gmra.mrb[18].mxu1 %vm758_vm5, %v3160_v54 }
 0x264   : > { %6386 = vmatprep.mubr.msk.f32.mxu1 %vm758_vm5, %v8002_v56  ;;  %v3309_v56 = vld [vmem:[#allocation2 + $0x81] sm:$0xff] }
 0x267   : > { %6387 = vmatmul.mubr.msk.f32.vlgmr.msra.gmra.mrb[12].mxu1 %vm758_vm5, %v8009_v5 }
 0x268   : > { %6698 = vmatpush3.bf16.msra.mxu1 %v6695_v41  ;;  %6389 = vmatprep.mubr.msk.f32.mxu1 %vm758_vm5, %v8021_v46 }
 0x269   : > { %6700 = vmatprep.subr.bf16.mxu1 %v6699_v39 }
 0x26b   : > { %6390 = vmatmul.mubr.msk.f32.gmra.mrb[14].mxu1 %vm758_vm5, %v8027_v13 }
 0x26c   : > { %6392 = vmatprep.mubr.msk.f32.mxu1 %vm758_vm5, %v8064_v10  ;;  %6702 = vmatpush3.bf16.msra.mxu1 %v6699_v39 }
 0x26d   : > { %6704 = vmatprep.subr.bf16.mxu1 %v6703_v22 }
 0x26f   : > { %6393 = vmatmul.mubr.msk.f32.gmra.mrb[16].mxu1 %vm758_vm5, %v8074_v12 }
 0x270   : > { %6395 = vmatprep.mubr.msk.f32.mxu1 %vm758_vm5, %v8090_v27 }
 0x273   : > { %6396 = vmatmul.mubr.msk.f32.gmra.mrb[18].mxu1 %vm758_vm5, %v3309_v56 }
 0x274   : > { %6406 = vmatprep.mubr.msk.f32.mxu1 %vm758_vm5, %v8245_v21 }
 0x277   : > { %6407 = vmatmul.mubr.msk.f32.vlgmr.msra.gmra.mrb[12].mxu1 %vm758_vm5, %v8256_v40 }
 0x278   : > { %6706 = vmatpush3.bf16.msra.mxu1 %v6703_v22  ;;  %6409 = vmatprep.mubr.msk.f32.mxu1 %vm758_vm5, %v8269_v3 }
 0x279   : > { %6708 = vmatprep.subr.bf16.mxu1 %v6707_v17 }
 0x27b   : > { %6410 = vmatmul.mubr.msk.f32.gmra.mrb[14].mxu1 %vm758_vm5, %v8273_v48 }
 0x27c   : > { %6412 = vmatprep.mubr.msk.f32.mxu1 %vm758_vm5, %v8277_v29  ;;  %6710 = vmatpush3.bf16.msra.mxu1 %v6707_v17 }
 0x27d   : > { %6712 = vmatprep.subr.bf16.mxu1 %v6711_v44 }
 0x27f   : > { %6413 = vmatmul.mubr.msk.f32.gmra.mrb[16].mxu1 %vm758_vm5, %v8281_v52 }
 0x280   : > { %6415 = vmatprep.mubr.msk.f32.mxu1 %vm758_vm5, %v8285_v42 }
 0x283   : > { %6416 = vmatmul.mubr.msk.f32.gmra.mrb[18].mxu1 %vm758_vm5, %v3458_v4 }
 0x284   : > { %6426 = vmatprep.mubr.msk.f32.mxu1 %vm758_vm5, %v8170_v20  ;;  %v3608_v20 = vld [vmem:[#allocation2 + $0x90] sm:$0xff] }
 0x287   : > { %6427 = vmatmul.mubr.msk.f32.vlgmr.msra.gmra.mrb[12].mxu1 %vm758_vm5, %v8192_v15  ;;  %v3909_v15 = vld [vmem:[%s8911_s3 + $0x110] sm:$0xff] }
 0x288   : > { %6714 = vmatpush3.bf16.msra.mxu1 %v6711_v44  ;;  %6429 = vmatprep.mubr.msk.f32.mxu1 %vm758_vm5, %v8196_v63  ;;  %v3910_v63 = vld [vmem:[%s8911_s3 + $0x118] sm:$0xff] }
 0x289   : > { %6716 = vmatprep.subr.bf16.mxu1 %v6715_v26 }
 0x28b   : > { %6430 = vmatmul.mubr.msk.f32.gmra.mrb[14].mxu1 %vm758_vm5, %v8215_v11  ;;  %v6723_v11 = vpack.c.bf16 %v3910_v63, %v3909_v15 }
 0x28c   : > { %6432 = vmatprep.mubr.msk.f32.mxu1 %vm758_vm5, %v8221_v1  ;;  %6718 = vmatpush3.bf16.msra.mxu1 %v6715_v26  ;;  %v4595_v1 = vld [vmem:[%s8913_s5 + $0x58] sm:$0xff] }
 0x28d   : > { %6720 = vmatprep.subr.bf16.mxu1 %v6719_v16 }
 0x28f   : > { %6433 = vmatmul.mubr.msk.f32.gmra.mrb[16].mxu1 %vm758_vm5, %v8228_v47  ;;  %v4598_v47 = vld [vmem:[%s8913_s5 + $0x70] sm:$0xff] }
 0x290   : > { %6435 = vmatprep.mubr.msk.f32.mxu1 %vm758_vm5, %v3160_v54  ;;  %v6739_v14 = vpack.c.bf16 %v4599_v57, %v4598_v47 }
 0x293   : > { %6436 = vmatmul.mubr.msk.f32.gmra.mrb[18].mxu1 %vm758_vm5, %v3608_v20 }
 0x294   : > { %6446 = vmatprep.mubr.msk.f32.mxu1 %vm758_vm5, %v8009_v5  ;;  %v3757_v5 = vld [vmem:[#allocation2 + $0x91] sm:$0xff] }
 0x297   : > { %6447 = vmatmul.mubr.msk.f32.vlgmr.msra.gmra.mrb[12].mxu1 %vm758_vm5, %v8021_v46  ;;  %v3906_v46 = vld [vmem:[#allocation2 + $0x92] sm:$0xff] }
 0x298   : > { %6722 = vmatpush3.bf16.msra.mxu1 %v6719_v16  ;;  %6449 = vmatprep.mubr.msk.f32.mxu1 %vm758_vm5, %v8027_v13  ;;  %v4592_v13 = vld [vmem:[%s8913_s5 + $0x40] sm:$0xff] }
 0x299   : > { %6724 = vmatprep.subr.bf16.mxu1 %v6723_v11 }
 0x29b   : > { %6450 = vmatmul.mubr.msk.f32.gmra.mrb[14].mxu1 %vm758_vm5, %v8064_v10  ;;  %v4593_v10 = vld [vmem:[%s8913_s5 + $0x48] sm:$0xff] }
 0x29c   : > { %6452 = vmatprep.mubr.msk.f32.mxu1 %vm758_vm5, %v8074_v12  ;;  %6726 = vmatpush3.bf16.msra.mxu1 %v6723_v11  ;;  %v6727_v12 = vpack.c.bf16 %v4593_v10, %v4592_v13 }
 0x29e   : > { %6728 = vmatprep.subr.bf16.mxu0 %v6727_v12 }
 0x29f   : > { %6453 = vmatmul.mubr.msk.f32.gmra.mrb[16].mxu1 %vm758_vm5, %v8090_v27  ;;  %6730 = vmatpush3.bf16.msra.mxu0 %v6727_v12  ;;  %v4594_v27 = vld [vmem:[%s8913_s5 + $0x50] sm:$0xff] }
 0x2a0   : > { %6455 = vmatprep.mubr.msk.f32.mxu1 %vm758_vm5, %v3309_v56  ;;  %v6731_v37 = vpack.c.bf16 %v4595_v1, %v4594_v27 }
 0x2a2   : > { %6732 = vmatprep.subr.bf16.mxu0 %v6731_v37 }
 0x2a3   : > { %6456 = vmatmul.mubr.msk.f32.gmra.mrb[18].mxu1 %vm758_vm5, %v3757_v5  ;;  %6734 = vmatpush3.bf16.msra.mxu0 %v6731_v37 }
 0x2a4   : > { %6466 = vmatprep.mubr.msk.f32.mxu1 %vm758_vm5, %v8256_v40 }
 0x2a7   : > { %6467 = vmatmul.mubr.msk.f32.vlgmr.msra.gmra.mrb[12].mxu1 %vm758_vm5, %v8269_v3 }
 0x2a8   : > { %6469 = vmatprep.mubr.msk.f32.mxu1 %vm758_vm5, %v8273_v48 }
 0x2ab   : > { %6470 = vmatmul.mubr.msk.f32.gmra.mrb[14].mxu1 %vm758_vm5, %v8277_v29 }
 0x2ac   : > { %6472 = vmatprep.mubr.msk.f32.mxu1 %vm758_vm5, %v8281_v52 }
 0x2af   : > { %6473 = vmatmul.mubr.msk.f32.gmra.mrb[16].mxu1 %vm758_vm5, %v8285_v42 }
 0x2b0   : > { %6475 = vmatprep.mubr.msk.f32.mxu1 %vm758_vm5, %v3458_v4 }
 0x2b3   : > { %6476 = vmatmul.mubr.msk.f32.gmra.mrb[18].mxu1 %vm758_vm5, %v3906_v46 }
 0x2b4   : > { %5784 = vmatprep.mubr.f32.mxu1 %v6999_v23  ;;  %v6735_v23 = vpack.c.bf16 %v4597_v59, %v4596_v62 }
 0x2b6   : > { %6736 = vmatprep.subr.bf16.mxu0 %v6735_v23 }
 0x2b7   : > { %6738 = vmatpush3.bf16.msra.mxu0 %v6735_v23 }
 0x2b8   : > { %6740 = vmatprep.subr.bf16.mxu0 %v6739_v14 }
 0x2bb   : > { %6742 = vmatpush3.bf16.msra.mxu0 %v6739_v14 }
 0x2bc   : > { %6744 = vmatprep.subr.bf16.mxu0 %v8475_v28 }
 0x37a   : > { %v6468_v53 = vpop.f32.mrb[12].mxu1 }
 0x37b   : > { %v4056_v21 = vadd.f32 %v6468_v53, %v8481_v61  ;;  %v4001_v19 = vpop.f32.mrb[13].mxu1 }
 0x37c   : > { %v4055_v60 = vadd.f32 %v8481_v61, %v4001_v19 }
 0x37d   : > { %v4064_v49 = vmax.f32 %v4056_v21, 0.0 }
 0x37e   : > { %v4063_v40 = vmax.f32 %v4055_v60, 0.0  ;;  %v6471_v45 = vpop.f32.mrb[14].mxu1 }
 0x37f   : > { %v4113_v50 = vcombine.high %v4064_v49, %v4064_v49  ;;  %v4120_v9 = vrot.slane %v4064_v49, %v7155_v43  ;;  %v4058_v3 = vadd.f32 %v6471_v45, %v8481_v61  ;;  %v4011_v48 = vpop.f32.mrb[15].mxu1 }
 0x380   : > { %v4096_v29 = vcombine.high %v4063_v40, %v4063_v40  ;;  %v4103_v52 = vrot.slane %v4063_v40, %v7155_v43  ;;  %v8489_v42 = vadd.f32 %v8481_v61, %v4011_v48 }
 0x381   : > { %v4127_v25 = vrot.slane %v4113_v50, %v7155_v43  ;;  %v4128_v55 = vcombine.high %v4120_v9, %v4120_v9  ;;  %v4293_v0 = vsel %vm4264_vm0, %v4120_v9, -inf  ;;  %v8493_v32 = vmax.f32 %v4058_v3, 0.0 }
 0x382   : > { %v4294_v38 = vrot.slane %v4293_v0, 4  ;;  %v4110_v41 = vrot.slane %v4096_v29, %v7155_v43  ;;  %v4111_v54 = vcombine.high %v4103_v52, %v4103_v52  ;;  %v4265_v58 = vsel %vm4264_vm0, %v4103_v52, -inf  ;;  %v8497_v24 = vpop.f32.mrb[16].mxu1 }
 0x383   : > { %v4129_v39 = vcombine.high %v4127_v25, %v4127_v25  ;;  %v4300_v7 = vsel %vm4264_vm0, %v4128_v55, -inf  ;;  %v4307_v33 = vsel %vm4264_vm0, %v4127_v25, -inf  ;;  %v4266_v22 = vrot.slane %v4265_v58, 4  ;;  %v8501_v56 = vpop.f32.mrb[17].mxu1 }
 0x384   : > { %v4295_v35 = vmax.f32 %v4293_v0, %v4294_v38  ;;  %v4301_v6 = vrot.slane %v4300_v7, 4  ;;  %v4308_v17 = vrot.slane %v4307_v33, 4  ;;  %v4112_v18 = vcombine.high %v4110_v41, %v4110_v41 }
 0x385   : > { %v4314_v31 = vsel %vm4264_vm0, %v4129_v39, -inf  ;;  %v4267_v44 = vmax.f32 %v4265_v58, %v4266_v22  ;;  %v4272_v4 = vsel %vm4264_vm0, %v4111_v54, -inf  ;;  %v4279_v34 = vsel %vm4264_vm0, %v4110_v41, -inf }
 0x386   : > { %v4296_v8 = vrot.slane %v4295_v35, 2  ;;  %v4302_v26 = vmax.f32 %v4300_v7, %v4301_v6  ;;  %v4309_v36 = vmax.f32 %v4307_v33, %v4308_v17  ;;  %v4315_v30 = vrot.slane %v4314_v31, 4  ;;  %v8506_v16 = vpop.f32.mrb[18].mxu1 }
 0x387   : > { %v4268_v20 = vrot.slane %v4267_v44, 2  ;;  %v4273_v15 = vrot.slane %v4272_v4, 4  ;;  %v4280_v63 = vrot.slane %v4279_v34, 4  ;;  %v4286_v11 = vsel %vm4264_vm0, %v4112_v18, -inf  ;;  %v8509_v5 = vpop.f32.mrb[19].mxu1 }
 0x388   : > { %v4297_v46 = vmax.f32 %v4295_v35, %v4296_v8  ;;  %v4303_v13 = vrot.slane %v4302_v26, 2  ;;  %v4310_v10 = vrot.slane %v4309_v36, 2  ;;  %v4316_v12 = vmax.f32 %v4314_v31, %v4315_v30 }
 0x389   : > { %v4269_v27 = vmax.f32 %v4267_v44, %v4268_v20  ;;  %v4274_v1 = vmax.f32 %v4272_v4, %v4273_v15  ;;  %v4281_v37 = vmax.f32 %v4279_v34, %v4280_v63  ;;  %v4287_v62 = vrot.slane %v4286_v11, 4 }
 0x38a   : > { %v4298_v59 = vrot.slane %v4297_v46, 1  ;;  %v4304_v23 = vmax.f32 %v4302_v26, %v4303_v13  ;;  %v4311_v47 = vmax.f32 %v4309_v36, %v4310_v10  ;;  %v4317_v57 = vrot.slane %v4316_v12, 2 }
 0x38b   : > { %v4270_v14 = vrot.slane %v4269_v27, 1  ;;  %v4275_v51 = vrot.slane %v4274_v1, 2  ;;  %v4282_v2 = vrot.slane %v4281_v37, 2  ;;  %v4288_v53 = vmax.f32 %v4286_v11, %v4287_v62 }
 0x38c   : > { %v4299_v21 = vmax.f32 %v4297_v46, %v4298_v59  ;;  %v4305_v19 = vrot.slane %v4304_v23, 1  ;;  %v4312_v60 = vrot.slane %v4311_v47, 1  ;;  %v4318_v49 = vmax.f32 %v4316_v12, %v4317_v57 }
 0x38d   : > { %v4271_v40 = vmax.f32 %v4269_v27, %v4270_v14  ;;  %v4276_v45 = vmax.f32 %v4274_v1, %v4275_v51  ;;  %v4283_v50 = vmax.f32 %v4281_v37, %v4282_v2  ;;  %v4289_v9 = vrot.slane %v4288_v53, 2 }
 0x38e   : > { %v4306_v3 = vmax.f32 %v4304_v23, %v4305_v19  ;;  %v4313_v48 = vmax.f32 %v4311_v47, %v4312_v60  ;;  %v4319_v29 = vrot.slane %v4318_v49, 1  ;;  %v4491_v52 = vsel %vm4489_vm1, %v4299_v21, -inf }
 0x38f   : > { %v4277_v25 = vrot.slane %v4276_v45, 1  ;;  %v4284_v55 = vrot.slane %v4283_v50, 1  ;;  %v4290_v0 = vmax.f32 %v4288_v53, %v4289_v9  ;;  %v4490_v38 = vsel %vm4489_vm1, %v4271_v40, -inf }
 0x390   : > { %v4320_v41 = vmax.f32 %v4318_v49, %v4319_v29  ;;  %v4494_v54 = vsel %vm4489_vm1, %v4306_v3, -inf  ;;  %v4497_v58 = vsel %vm4489_vm1, %v4313_v48, -inf  ;;  %v4492_v39 = vmax.f32 %v4490_v38, %v4491_v52 }
 0x391   : > { %v4278_v7 = vmax.f32 %v4276_v45, %v4277_v25  ;;  %v4285_v33 = vmax.f32 %v4283_v50, %v4284_v55  ;;  %v4291_v22 = vrot.slane %v4290_v0, 1  ;;  %v4147_v35 = vcombine.high %v8493_v32, %v8493_v32 }
 0x392   : > { %v4500_v6 = vsel %vm4489_vm1, %v4320_v41, -inf  ;;  %v4154_v17 = vrot.slane %v8493_v32, %v7155_v43  ;;  %v4065_v18 = vmax.f32 %v8489_v42, 0.0  ;;  %v4060_v31 = vadd.f32 %v8497_v24, %v8481_v61 }
 0x393   : > { %v4292_v44 = vmax.f32 %v4290_v0, %v4291_v22  ;;  %v4493_v4 = vsel %vm4489_vm1, %v4278_v7, -inf  ;;  %v4496_v34 = vsel %vm4489_vm1, %v4285_v33, -inf  ;;  %v4161_v8 = vrot.slane %v4147_v35, %v7155_v43 }
 0x394   : > { %v4495_v26 = vmax.f32 %v4493_v4, %v4494_v54  ;;  %v4498_v36 = vmax.f32 %v4496_v34, %v4497_v58  ;;  %v4162_v30 = vcombine.high %v4154_v17, %v4154_v17  ;;  %v4349_v20 = vsel %vm4264_vm0, %v4154_v17, -inf }
 0x395   : > { %v4499_v15 = vsel %vm4489_vm1, %v4292_v44, -inf  ;;  %v4163_v32 = vcombine.high %v4161_v8, %v4161_v8  ;;  %v4350_v63 = vrot.slane %v4349_v20, 4  ;;  %v4363_v42 = vsel %vm4264_vm0, %v4161_v8, -inf }
 0x396   : > { %v4501_v11 = vmax.f32 %v4499_v15, %v4500_v6  ;;  %v4554_v24 = vsel %vm2642_vm6, %v4495_v26, %v4492_v39  ;;  %v4356_v46 = vsel %vm4264_vm0, %v4162_v30, -inf  ;;  %v4364_v13 = vrot.slane %v4363_v42, 4 }
 0x397   : > { %v4555_v10 = vsel %vm2644_vm7, %v4498_v36, %v4554_v24  ;;  %v4351_v12 = vmax.f32 %v4349_v20, %v4350_v63  ;;  %v4357_v27 = vrot.slane %v4356_v46, 4  ;;  %v4370_v1 = vsel %vm4264_vm0, %v4163_v32, -inf }
 0x398   : > { %v4556_v37 = vsel %vm2646_vm8, %v4501_v11, %v4555_v10  ;;  %v4365_v62 = vmax.f32 %v4363_v42, %v4364_v13  ;;  %v4371_v59 = vrot.slane %v4370_v1, 4  ;;  %v4130_v23 = vcombine.high %v4065_v18, %v4065_v18 }
 0x399   : > { %4572 = vst.msk [vmem:[#allocation3 + $0x9] sm:$0xf] %vm4571_vm2, %v4556_v37  ;;  %v4352_v47 = vrot.slane %v4351_v12, 2  ;;  %v4358_v57 = vmax.f32 %v4356_v46, %v4357_v27  ;;  %v4137_v14 = vrot.slane %v4065_v18, %v7155_v43  ;;  %v4068_v51 = vmax.f32 %v4060_v31, 0.0 }
 0x39a   : > { %v4366_v2 = vrot.slane %v4365_v62, 2  ;;  %v4372_v53 = vmax.f32 %v4370_v1, %v4371_v59  ;;  %v4144_v21 = vrot.slane %v4130_v23, %v7155_v43  ;;  %v4059_v19 = vadd.f32 %v8481_v61, %v8501_v56 }
 0x39b   : > { %v4353_v60 = vmax.f32 %v4351_v12, %v4352_v47  ;;  %v4359_v49 = vrot.slane %v4358_v57, 2  ;;  %v4145_v40 = vcombine.high %v4137_v14, %v4137_v14  ;;  %v4321_v45 = vsel %vm4264_vm0, %v4137_v14, -inf }
 0x39c   : > { %v4367_v50 = vmax.f32 %v4365_v62, %v4366_v2  ;;  %v4373_v9 = vrot.slane %v4372_v53, 2  ;;  %v4146_v3 = vcombine.high %v4144_v21, %v4144_v21  ;;  %v4322_v48 = vrot.slane %v4321_v45, 4 }
 0x39d   : > { %v4354_v29 = vrot.slane %v4353_v60, 1  ;;  %v4360_v52 = vmax.f32 %v4358_v57, %v4359_v49  ;;  %v4328_v25 = vsel %vm4264_vm0, %v4145_v40, -inf  ;;  %v4335_v55 = vsel %vm4264_vm0, %v4144_v21, -inf }
 0x39e   : > { %v4368_v0 = vrot.slane %v4367_v50, 1  ;;  %v4374_v38 = vmax.f32 %v4372_v53, %v4373_v9  ;;  %v4323_v41 = vmax.f32 %v4321_v45, %v4322_v48  ;;  %v4329_v54 = vrot.slane %v4328_v25, 4 }
 0x39f   : > { %v4355_v56 = vmax.f32 %v4353_v60, %v4354_v29  ;;  %v4361_v58 = vrot.slane %v4360_v52, 1  ;;  %v4336_v39 = vrot.slane %v4335_v55, 4  ;;  %v4342_v7 = vsel %vm4264_vm0, %v4146_v3, -inf }
 0x3a0   : > { %v4369_v33 = vmax.f32 %v4367_v50, %v4368_v0  ;;  %v4375_v22 = vrot.slane %v4374_v38, 1  ;;  %v4324_v35 = vrot.slane %v4323_v41, 2  ;;  %v4330_v6 = vmax.f32 %v4328_v25, %v4329_v54  ;;  %v6969_v17 = vld [vmem:[#allocation3 + $0x1] ss:$8 sps:$4 sm:$0xff]  }
 0x3a1   : > { %v4362_v18 = vmax.f32 %v4360_v52, %v4361_v58  ;;  %v4503_v31 = vsel %vm4489_vm1, %v4355_v56, -inf  ;;  %v4337_v44 = vmax.f32 %v4335_v55, %v4336_v39  ;;  %v4343_v4 = vrot.slane %v4342_v7, 4  ;;  %6494 = vmatprep.mubr.msk.f32.mxu0 %vm4489_vm1, %v6969_v17 }
 0x3a2   : > { %v4376_v34 = vmax.f32 %v4374_v38, %v4375_v22  ;;  %v4509_v8 = vsel %vm4489_vm1, %v4369_v33, -inf  ;;  %v4325_v26 = vmax.f32 %v4323_v41, %v4324_v35  ;;  %v4331_v36 = vrot.slane %v4330_v6, 2 }
 0x3a3   : > { %v4506_v30 = vsel %vm4489_vm1, %v4362_v18, -inf  ;;  %v4338_v20 = vrot.slane %v4337_v44, 2  ;;  %v4344_v15 = vmax.f32 %v4342_v7, %v4343_v4  ;;  %v4181_v32 = vcombine.high %v4068_v51, %v4068_v51 }
 0x3a4   : > { %v4512_v63 = vsel %vm4489_vm1, %v4376_v34, -inf  ;;  %v4326_v42 = vrot.slane %v4325_v26, 1  ;;  %v4332_v11 = vmax.f32 %v4330_v6, %v4331_v36  ;;  %v4188_v24 = vrot.slane %v4068_v51, %v7155_v43 }
 0x3a5   : > { %v4339_v46 = vmax.f32 %v4337_v44, %v4338_v20  ;;  %v4345_v13 = vrot.slane %v4344_v15, 2  ;;  %v4195_v10 = vrot.slane %v4181_v32, %v7155_v43  ;;  %v4067_v12 = vmax.f32 %v4059_v19, 0.0 }
 0x3a6   : > { %v4327_v27 = vmax.f32 %v4325_v26, %v4326_v42  ;;  %v4333_v1 = vrot.slane %v4332_v11, 1  ;;  %v4196_v37 = vcombine.high %v4188_v24, %v4188_v24  ;;  %v4405_v62 = vsel %vm4264_vm0, %v4188_v24, -inf }
 0x3a7   : > { %v4340_v59 = vrot.slane %v4339_v46, 1  ;;  %v4346_v23 = vmax.f32 %v4344_v15, %v4345_v13  ;;  %v4197_v47 = vcombine.high %v4195_v10, %v4195_v10  ;;  %v4406_v57 = vrot.slane %v4405_v62, 4 }
 0x3a8   : > { %v4334_v14 = vmax.f32 %v4332_v11, %v4333_v1  ;;  %v4502_v2 = vsel %vm4489_vm1, %v4327_v27, -inf  ;;  %v4412_v53 = vsel %vm4264_vm0, %v4196_v37, -inf  ;;  %v4419_v51 = vsel %vm4264_vm0, %v4195_v10, -inf }
 0x3a9   : > { %v4341_v21 = vmax.f32 %v4339_v46, %v4340_v59  ;;  %v4347_v60 = vrot.slane %v4346_v23, 1  ;;  %v4504_v49 = vmax.f32 %v4502_v2, %v4503_v31  ;;  %v4407_v19 = vmax.f32 %v4405_v62, %v4406_v57 }
 0x3aa   : > { %v4505_v40 = vsel %vm4489_vm1, %v4334_v14, -inf  ;;  %v4413_v45 = vrot.slane %v4412_v53, 4  ;;  %v4420_v50 = vrot.slane %v4419_v51, 4  ;;  %v4426_v9 = vsel %vm4264_vm0, %v4197_v47, -inf }
 0x3ab   : > { %v4348_v3 = vmax.f32 %v4346_v23, %v4347_v60  ;;  %v4507_v48 = vmax.f32 %v4505_v40, %v4506_v30  ;;  %v4508_v29 = vsel %vm4489_vm1, %v4341_v21, -inf  ;;  %v4408_v52 = vrot.slane %v4407_v19, 2 }
 0x3ac   : > { %v4510_v25 = vmax.f32 %v4508_v29, %v4509_v8  ;;  %v4414_v55 = vmax.f32 %v4412_v53, %v4413_v45  ;;  %v4421_v0 = vmax.f32 %v4419_v51, %v4420_v50  ;;  %v4427_v38 = vrot.slane %v4426_v9, 4 }
 0x3ad   : > { %v4511_v41 = vsel %vm4489_vm1, %v4348_v3, -inf  ;;  %v4557_v54 = vsel %vm2642_vm6, %v4507_v48, %v4504_v49  ;;  %v4409_v56 = vmax.f32 %v4407_v19, %v4408_v52  ;;  %v4164_v58 = vcombine.high %v4067_v12, %v4067_v12 }
 0x3ae   : > { %v4513_v39 = vmax.f32 %v4511_v41, %v4512_v63  ;;  %v4558_v7 = vsel %vm2644_vm7, %v4510_v25, %v4557_v54  ;;  %v4415_v33 = vrot.slane %v4414_v55, 2  ;;  %v4422_v22 = vrot.slane %v4421_v0, 2 }
 0x3af   : > { %v4410_v35 = vrot.slane %v4409_v56, 1  ;;  %v4428_v6 = vmax.f32 %v4426_v9, %v4427_v38  ;;  %v4171_v17 = vrot.slane %v4067_v12, %v7155_v43  ;;  %v4178_v18 = vrot.slane %v4164_v58, %v7155_v43 }
 0x3b0   : > { %v4559_v31 = vsel %vm2646_vm8, %v4513_v39, %v4558_v7  ;;  %v4416_v44 = vmax.f32 %v4414_v55, %v4415_v33  ;;  %v4423_v4 = vmax.f32 %v4421_v0, %v4422_v22  ;;  %v4062_v34 = vadd.f32 %v8506_v16, %v8481_v61 }
 0x3b1   : > { %4573 = vst.msk [vmem:[#allocation3 + $0x11] sm:$0xf] %vm4571_vm2, %v4559_v31  ;;  %v4411_v8 = vmax.f32 %v4409_v56, %v4410_v35  ;;  %v4429_v26 = vrot.slane %v4428_v6, 2  ;;  %v4179_v36 = vcombine.high %v4171_v17, %v4171_v17  ;;  %v4180_v30 = vcombine.high %v4178_v18, %v4178_v18 }
 0x3b2   : > { %v4417_v20 = vrot.slane %v4416_v44, 1  ;;  %v4424_v15 = vrot.slane %v4423_v4, 1  ;;  %v4377_v32 = vsel %vm4264_vm0, %v4171_v17, -inf  ;;  %v4391_v63 = vsel %vm4264_vm0, %v4178_v18, -inf }
 0x3b3   : > { %v4430_v42 = vmax.f32 %v4428_v6, %v4429_v26  ;;  %v4378_v11 = vrot.slane %v4377_v32, 4  ;;  %v4384_v24 = vsel %vm4264_vm0, %v4179_v36, -inf  ;;  %v4392_v10 = vrot.slane %v4391_v63, 4 }
 0x3b4   : > { %v4418_v46 = vmax.f32 %v4416_v44, %v4417_v20  ;;  %v4385_v13 = vrot.slane %v4384_v24, 4  ;;  %v4398_v27 = vsel %vm4264_vm0, %v4180_v30, -inf  ;;  %v4070_v1 = vmax.f32 %v4062_v34, 0.0 }
 0x3b5   : > { %v4431_v16 = vrot.slane %v4430_v42, 1  ;;  %v4379_v12 = vmax.f32 %v4377_v32, %v4378_v11  ;;  %v4425_v37 = vmax.f32 %v4423_v4, %v4424_v15  ;;  %v4515_v62 = vsel %vm4489_vm1, %v4411_v8, -inf }
 0x3b6   : > { %v4386_v59 = vmax.f32 %v4384_v24, %v4385_v13  ;;  %v4393_v23 = vmax.f32 %v4391_v63, %v4392_v10  ;;  %v4518_v47 = vsel %vm4489_vm1, %v4418_v46, -inf  ;;  %v4399_v14 = vrot.slane %v4398_v27, 4 }
 0x3b7   : > { %v4380_v57 = vrot.slane %v4379_v12, 2  ;;  %v4215_v2 = vcombine.high %v4070_v1, %v4070_v1  ;;  %v4222_v21 = vrot.slane %v4070_v1, %v7155_v43  ;;  %v4061_v60 = vadd.f32 %v8481_v61, %v8509_v5 }
 0x3b8   : > { %v4387_v53 = vrot.slane %v4386_v59, 2  ;;  %v4394_v51 = vrot.slane %v4393_v23, 2  ;;  %v4432_v49 = vmax.f32 %v4430_v42, %v4431_v16  ;;  %v4400_v40 = vmax.f32 %v4398_v27, %v4399_v14 }
 0x3b9   : > { %v4381_v19 = vmax.f32 %v4379_v12, %v4380_v57  ;;  %v4229_v45 = vrot.slane %v4215_v2, %v7155_v43  ;;  %v4230_v3 = vcombine.high %v4222_v21, %v4222_v21  ;;  %v4461_v48 = vsel %vm4264_vm0, %v4222_v21, -inf }
 0x3ba   : > { %v4388_v50 = vmax.f32 %v4386_v59, %v4387_v53  ;;  %v4395_v9 = vmax.f32 %v4393_v23, %v4394_v51  ;;  %v4401_v52 = vrot.slane %v4400_v40, 2  ;;  %v4462_v55 = vrot.slane %v4461_v48, 4 }
 0x3bb   : > { %v4382_v29 = vrot.slane %v4381_v19, 1  ;;  %v4231_v25 = vcombine.high %v4229_v45, %v4229_v45  ;;  %v4468_v41 = vsel %vm4264_vm0, %v4230_v3, -inf  ;;  %v4475_v61 = vsel %vm4264_vm0, %v4229_v45, -inf }
 0x3bc   : > { %v4389_v0 = vrot.slane %v4388_v50, 1  ;;  %v4396_v38 = vrot.slane %v4395_v9, 1  ;;  %v4521_v5 = vsel %vm4489_vm1, %v4425_v37, -inf  ;;  %v4402_v56 = vmax.f32 %v4400_v40, %v4401_v52 }
 0x3bd   : > { %v4383_v54 = vmax.f32 %v4381_v19, %v4382_v29  ;;  %v4469_v58 = vrot.slane %v4468_v41, 4  ;;  %v4524_v39 = vsel %vm4489_vm1, %v4432_v49, -inf  ;;  %v4476_v22 = vrot.slane %v4475_v61, 4 }
 0x3be   : > { %v4390_v7 = vmax.f32 %v4388_v50, %v4389_v0  ;;  %v4397_v33 = vmax.f32 %v4395_v9, %v4396_v38  ;;  %v4403_v35 = vrot.slane %v4402_v56, 1  ;;  %v4463_v17 = vmax.f32 %v4461_v48, %v4462_v55  ;;  %v4583_v50 = vld [vmem:[%s8913_s5 + $0x18] sm:$0xff]  ;;  %v4584_v55 = vld [vmem:[%s8913_s5 + $0x20] sm:$0xff] }
 0x3bf   : > { %v4514_v6 = vsel %vm4489_vm1, %v4383_v54, -inf  ;;  %v4482_v18 = vsel %vm4264_vm0, %v4231_v25, -inf  ;;  %v4470_v34 = vmax.f32 %v4468_v41, %v4469_v58  ;;  %v4477_v30 = vmax.f32 %v4475_v61, %v4476_v22 }
 0x3c0   : > { %v4516_v31 = vmax.f32 %v4514_v6, %v4515_v62  ;;  %v4517_v44 = vsel %vm4489_vm1, %v4390_v7, -inf  ;;  %v4520_v4 = vsel %vm4489_vm1, %v4397_v33, -inf  ;;  %v4404_v8 = vmax.f32 %v4402_v56, %v4403_v35  ;;  %v4585_v7 = vld [vmem:[%s8913_s5 + $0x28] sm:$0xff] }
 0x3c1   : > { %v4519_v26 = vmax.f32 %v4517_v44, %v4518_v47  ;;  %v4522_v36 = vmax.f32 %v4520_v4, %v4521_v5  ;;  %v4483_v20 = vrot.slane %v4482_v18, 4  ;;  %v4069_v15 = vmax.f32 %v4061_v60, 0.0 }
 0x3c2   : > { %v4523_v32 = vsel %vm4489_vm1, %v4404_v8, -inf  ;;  %v4464_v42 = vrot.slane %v4463_v17, 2  ;;  %v4471_v46 = vrot.slane %v4470_v34, 2  ;;  %v4478_v13 = vrot.slane %v4477_v30, 2 }
 0x3c3   : > { %v4560_v63 = vsel %vm2642_vm6, %v4519_v26, %v4516_v31  ;;  %v4525_v11 = vmax.f32 %v4523_v32, %v4524_v39  ;;  %v4484_v10 = vmax.f32 %v4482_v18, %v4483_v20  ;;  %v4198_v16 = vcombine.high %v4069_v15, %v4069_v15  ;;  %v6971_v39 = vld [vmem:[#allocation3] ss:$8 sps:$4 sm:$0xff]   ;;  %v4586_v31 = vld [vmem:[%s8913_s5 + $0x30] sm:$0xff]  ;;  %v4587_v26 = vld [vmem:[%s8913_s5 + $0x38] sm:$0xff] }
 0x3c4   : > { %v4561_v24 = vsel %vm2644_vm7, %v4522_v36, %v4560_v63  ;;  %v4205_v12 = vrot.slane %v4069_v15, %v7155_v43  ;;  %v4465_v1 = vmax.f32 %v4463_v17, %v4464_v42  ;;  %v4472_v23 = vmax.f32 %v4470_v34, %v4471_v46 }
 0x3c5   : > { %v4562_v27 = vsel %vm2646_vm8, %v4525_v11, %v4561_v24  ;;  %v4485_v37 = vrot.slane %v4484_v10, 2  ;;  %v4212_v62 = vrot.slane %v4198_v16, %v7155_v43  ;;  %v4479_v57 = vmax.f32 %v4477_v30, %v4478_v13  ;;  %v4582_v43 = vld [vmem:[%s8913_s5 + $0x10] sm:$0xff] }
 0x3c6   : > { %4574 = vst.msk [vmem:[#allocation3 + $0x19] sm:$0xf] %vm4571_vm2, %v4562_v27  ;;  %v4213_v59 = vcombine.high %v4205_v12, %v4205_v12  ;;  %v4433_v47 = vsel %vm4264_vm0, %v4205_v12, -inf  ;;  %v4466_v49 = vrot.slane %v4465_v1, 1  ;;  %v4473_v9 = vrot.slane %v4472_v23, 1 }
 0x3c7   : > { %v4214_v14 = vcombine.high %v4212_v62, %v4212_v62  ;;  %v4434_v2 = vrot.slane %v4433_v47, 4  ;;  %v4486_v51 = vmax.f32 %v4484_v10, %v4485_v37  ;;  %v4447_v60 = vsel %vm4264_vm0, %v4212_v62, -inf  ;;  %v4775_v37 = vld [vmem:[%s8913_s5 + $0x88] sm:$0xff] }
 0x3c8   : > { %v4440_v53 = vsel %vm4264_vm0, %v4213_v59, -inf  ;;  %v4448_v40 = vrot.slane %v4447_v60, 4  ;;  %v4480_v29 = vrot.slane %v4479_v57, 1  ;;  %v6747_v5 = vpack.c.bf16 %v4583_v50, %v4582_v43  ;;  %v4780_v43 = vld [vmem:[%s8913_s5 + $0xb0] sm:$0xff]  ;;  %v4781_v50 = vld [vmem:[%s8913_s5 + $0xb8] sm:$0xff] }
 0x3c9   : > { %v4441_v21 = vrot.slane %v4440_v53, 4  ;;  %v4435_v19 = vmax.f32 %v4433_v47, %v4434_v2  ;;  %v4454_v45 = vsel %vm4264_vm0, %v4214_v14, -inf  ;;  %v4487_v0 = vrot.slane %v4486_v51, 1 }
 0x3ca   : > { %v4455_v48 = vrot.slane %v4454_v45, 4  ;;  %v4449_v25 = vmax.f32 %v4447_v60, %v4448_v40  ;;  %v4467_v54 = vmax.f32 %v4465_v1, %v4466_v49  ;;  %v4474_v33 = vmax.f32 %v4472_v23, %v4473_v9  ;;  %v4774_v1 = vld [vmem:[%s8913_s5 + $0x80] sm:$0xff]  ;;  %v4779_v40 = vld [vmem:[%s8913_s5 + $0xa8] sm:$0xff] }
 0x3cb   : > { %v4442_v3 = vmax.f32 %v4440_v53, %v4441_v21  ;;  %v4436_v52 = vrot.slane %v4435_v19, 2  ;;  %v4481_v6 = vmax.f32 %v4479_v57, %v4480_v29  ;;  %v4488_v44 = vmax.f32 %v4486_v51, %v4487_v0  ;;  %v4776_v53 = vld [vmem:[%s8913_s5 + $0x90] sm:$0xff]  ;;  %v4777_v51 = vld [vmem:[%s8913_s5 + $0x98] sm:$0xff]  ;;  %v6973_v49 = vld [vmem:[#allocation3 + $0x2] ss:$8 sps:$4 sm:$0xff]  }
 0x3cc   : > { %v4456_v41 = vmax.f32 %v4454_v45, %v4455_v48  ;;  %v4450_v58 = vrot.slane %v4449_v25, 2  ;;  %v6751_v8 = vpack.c.bf16 %v4585_v7, %v4584_v55  ;;  %v4527_v36 = vsel %vm4489_vm1, %v4467_v54, -inf  ;;  %v4874_v48 = vld [vmem:[%s8913_s5 + $0xc8] sm:$0xff]  ;;  %v4879_v54 = vld [vmem:[%s8913_s5 + $0xf0] sm:$0xff] }
 0x3cd   : > { %v4443_v38 = vrot.slane %v4442_v3, 2  ;;  %v6970_v61 = vld [vmem:[#allocation3 + $0x11] ss:$8 sps:$4 sm:$0xff]   ;;  %v4437_v56 = vmax.f32 %v4435_v19, %v4436_v52  ;;  %v4533_v63 = vsel %vm4489_vm1, %v4481_v6, -inf  ;;  %v6755_v24 = vpack.c.bf16 %v4587_v26, %v4586_v31  ;;  %v4778_v19 = vld [vmem:[%s8913_s5 + $0xa0] sm:$0xff]  ;;  %v4973_v7 = vld [vmem:[%s8913_s5 + $0x108] sm:$0xff] }
 0x3ce   : > { %v4457_v35 = vrot.slane %v4456_v41, 2  ;;  %6495 = vmatmul.mubr.msk.f32.vlgmr.msra.gmra.mrb[20].mxu0 %vm4489_vm1, %v6970_v61  ;;  %v4451_v18 = vmax.f32 %v4449_v25, %v4450_v58  ;;  %v4536_v46 = vsel %vm4489_vm1, %v4488_v44, -inf  ;;  %v6759_v14 = vpack.c.bf16 %v4775_v37, %v4774_v1  ;;  %v6972_v21 = vld [vmem:[#allocation3 + $0x10] ss:$8 sps:$4 sm:$0xff]   ;;  %v4878_v61 = vld [vmem:[%s8913_s5 + $0xe8] sm:$0xff]  ;;  %v4976_v31 = vld [vmem:[%s8913_s5 + $0x120] sm:$0xff] }
 0x3cf   : > { %v4444_v22 = vmax.f32 %v4442_v3, %v4443_v38  ;;  %v4438_v17 = vrot.slane %v4437_v56, 1  ;;  %6746 = vmatpush3.bf16.msra.mxu0 %v8475_v28  ;;  %6513 = vmatprep.mubr.msk.f32.mxu0 %vm4489_vm1, %v6971_v39  ;;  %v4530_v28 = vsel %vm4489_vm1, %v4474_v33, -inf  ;;  %v6763_v60 = vpack.c.bf16 %v4777_v51, %v4776_v53  ;;  %v4873_v3 = vld [vmem:[%s8913_s5 + $0xc0] sm:$0xff]  ;;  %v4875_v52 = vld [vmem:[%s8913_s5 + $0xd0] sm:$0xff]  ;;  %v4876_v25 = vld [vmem:[%s8913_s5 + $0xd8] sm:$0xff] }
 0x3d0   : > { %v4458_v34 = vmax.f32 %v4456_v41, %v4457_v35  ;;  %6748 = vmatprep.subr.bf16.mxu0 %v6747_v5  ;;  %v4452_v20 = vrot.slane %v4451_v18, 1  ;;  %v6767_v45 = vpack.c.bf16 %v4779_v40, %v4778_v19  ;;  %v6771_v9 = vpack.c.bf16 %v4781_v50, %v4780_v43  ;;  %v6974_v55 = vld [vmem:[#allocation3 + $0x12] ss:$8 sps:$4 sm:$0xff]   ;;  %v4877_v41 = vld [vmem:[%s8913_s5 + $0xe0] sm:$0xff]  ;;  %v4977_v44 = vld [vmem:[%s8913_s5 + $0x128] sm:$0xff] }
 0x3d1   : > { %v4445_v4 = vrot.slane %v4444_v22, 1  ;;  %v4439_v30 = vmax.f32 %v4437_v56, %v4438_v17  ;;  %v6775_v29 = vpack.c.bf16 %v4874_v48, %v4873_v3  ;;  %v6779_v0 = vpack.c.bf16 %v4876_v25, %v4875_v52  ;;  %v6975_v38 = vld [vmem:[#allocation3 + $0x8] ss:$8 sps:$4 sm:$0xff]   ;;  %v4880_v56 = vld [vmem:[%s8913_s5 + $0xf8] sm:$0xff]  ;;  %v4972_v39 = vld [vmem:[%s8913_s5 + $0x100] sm:$0xff] }
 0x3d2   : > { %v4459_v32 = vrot.slane %v4458_v34, 1  ;;  %v4453_v42 = vmax.f32 %v4451_v18, %v4452_v20  ;;  %v6787_v58 = vpack.c.bf16 %v4880_v56, %v4879_v54  ;;  %v6791_v33 = vpack.c.bf16 %v4973_v7, %v4972_v39  ;;  %v4975_v35 = vld [vmem:[%s8913_s5 + $0x118] sm:$0xff]  ;;  %v6977_v18 = vld [vmem:[#allocation3 + $0x9] ss:$8 sps:$4 sm:$0xff]   ;;  %v5274_v3 = vld [vmem:[%s8913_s5 + $0x1e0] sm:$0xff] }
 0x3d3   : > { %v4446_v15 = vmax.f32 %v4444_v22, %v4445_v4  ;;  %v4526_v11 = vsel %vm4489_vm1, %v4439_v30, -inf  ;;  %6750 = vmatpush3.bf16.msra.mxu0 %v6747_v5  ;;  %v6783_v5 = vpack.c.bf16 %v4878_v61, %v4877_v41  ;;  %v4974_v22 = vld [vmem:[%s8913_s5 + $0x110] sm:$0xff]  ;;  %v6799_v4 = vpack.c.bf16 %v4977_v44, %v4976_v31  ;;  %v5072_v30 = vld [vmem:[%s8913_s5 + $0x148] sm:$0xff]  ;;  %v5178_v51 = vld [vmem:[%s8913_s5 + $0x1b8] sm:$0xff] }
 0x3d4   : > { %v4460_v13 = vmax.f32 %v4458_v34, %v4459_v32  ;;  %v4528_v10 = vmax.f32 %v4526_v11, %v4527_v36  ;;  %6752 = vmatprep.subr.bf16.mxu0 %v6751_v8  ;;  %v4532_v27 = vsel %vm4489_vm1, %v4453_v42, -inf  ;;  %v6795_v17 = vpack.c.bf16 %v4975_v35, %v4974_v22  ;;  %v4978_v34 = vld [vmem:[%s8913_s5 + $0x130] sm:$0xff]  ;;  %v5071_v36 = vld [vmem:[%s8913_s5 + $0x140] sm:$0xff]  ;;  %v5275_v48 = vld [vmem:[%s8913_s5 + $0x1e8] sm:$0xff] }
 0x3d5   : > { %v4529_v16 = vsel %vm4489_vm1, %v4446_v15, -inf  ;;  %v4534_v62 = vmax.f32 %v4532_v27, %v4533_v63  ;;  %v6807_v20 = vpack.c.bf16 %v5072_v30, %v5071_v36  ;;  %v5074_v15 = vld [vmem:[%s8913_s5 + $0x158] sm:$0xff]  ;;  %v6979_v42 = vld [vmem:[#allocation3 + $0xa] ss:$8 sps:$4 sm:$0xff]   ;;  %v5075_v11 = vld [vmem:[%s8913_s5 + $0x160] sm:$0xff] }
 0x3d6   : > { %v4531_v12 = vmax.f32 %v4529_v16, %v4530_v28  ;;  %v4535_v59 = vsel %vm4489_vm1, %v4460_v13, -inf  ;;  %v5073_v28 = vld [vmem:[%s8913_s5 + $0x150] sm:$0xff]  ;;  %v5172_v27 = vld [vmem:[%s8913_s5 + $0x188] sm:$0xff]  ;;  %v5277_v25 = vld [vmem:[%s8913_s5 + $0x1f8] sm:$0xff] }
 0x3d7   : > { %v4537_v23 = vmax.f32 %v4535_v59, %v4536_v46  ;;  %6754 = vmatpush3.bf16.msra.mxu0 %v6751_v8  ;;  %v4979_v8 = vld [vmem:[%s8913_s5 + $0x138] sm:$0xff]  ;;  %v6811_v63 = vpack.c.bf16 %v5074_v15, %v5073_v28  ;;  %v5077_v13 = vld [vmem:[%s8913_s5 + $0x170] sm:$0xff]  ;;  %v5373_v39 = vld [vmem:[%s8913_s5 + $0x220] sm:$0xff] }
 0x3d8   : > { %v4563_v47 = vsel %vm2642_vm6, %v4531_v12, %v4528_v10  ;;  %6756 = vmatprep.subr.bf16.mxu0 %v6755_v24  ;;  %v6803_v26 = vpack.c.bf16 %v4979_v8, %v4978_v34  ;;  %v5078_v10 = vld [vmem:[%s8913_s5 + $0x178] sm:$0xff]  ;;  %v5171_v12 = vld [vmem:[%s8913_s5 + $0x180] sm:$0xff]  ;;  %v5173_v37 = vld [vmem:[%s8913_s5 + $0x190] sm:$0xff] }
 0x3d9   : > { %v4564_v57 = vsel %vm2644_vm7, %v4534_v62, %v4563_v47  ;;  %v6819_v16 = vpack.c.bf16 %v5078_v10, %v5077_v13  ;;  %v6823_v1 = vpack.c.bf16 %v5172_v27, %v5171_v12  ;;  %v5174_v62 = vld [vmem:[%s8913_s5 + $0x198] sm:$0xff]  ;;  %v5177_v53 = vld [vmem:[%s8913_s5 + $0x1b0] sm:$0xff]  ;;  %v5374_v7 = vld [vmem:[%s8913_s5 + $0x228] sm:$0xff] }
 0x3da   : > { %v4565_v2 = vsel %vm2646_vm8, %v4537_v23, %v4564_v57  ;;  %v6827_v23 = vpack.c.bf16 %v5174_v62, %v5173_v37  ;;  %v6981_v47 = vld [vmem:[#allocation3 + $0x10] ss:$8 sps:$4 sm:$0xff]   ;;  %v5175_v57 = vld [vmem:[%s8913_s5 + $0x1a0] sm:$0xff] }
 0x3db   : > { %4575 = vst.msk [vmem:[#allocation3 + $0x21] sm:$0xf] %vm4571_vm2, %v4565_v2  ;;  %6758 = vmatpush3.bf16.msra.mxu0 %v6755_v24  ;;  %v5076_v24 = vld [vmem:[%s8913_s5 + $0x168] sm:$0xff]  ;;  %v5272_v40 = vld [vmem:[%s8913_s5 + $0x1d0] sm:$0xff]  ;;  %v5376_v35 = vld [vmem:[%s8913_s5 + $0x238] sm:$0xff] }
 0x3dc   : > { %6760 = vmatprep.subr.bf16.mxu0 %v6759_v14  ;;  %v6815_v46 = vpack.c.bf16 %v5076_v24, %v5075_v11  ;;  %v5276_v52 = vld [vmem:[%s8913_s5 + $0x1f0] sm:$0xff]  ;;  %v5701_v31 = vld [vmem:[%s8917_s9 + $0x18] sm:$0xff]  ;;  %v5698_v44 = vld [vmem:[%s8917_s9] sm:$0xff] }
 0x3dd   : > { %v5371_v61 = vld [vmem:[%s8913_s5 + $0x210] sm:$0xff]  ;;  %v6003_v27 = vld [vmem:[%s8915_s7 + $0x2] ss:$0 sm:$0xff] }
 0x3de   : > { %6514 = vmatmul.mubr.msk.f32.vlgmr.msra.gmra.mrb[20].mxu0 %vm4489_vm1, %v6972_v21  ;;  %v6835_v21 = vpack.c.bf16 %v5178_v51, %v5177_v53  ;;  %v5375_v22 = vld [vmem:[%s8913_s5 + $0x230] sm:$0xff] }
 0x3df   : > { %6762 = vmatpush3.bf16.msra.mxu0 %v6759_v14  ;;  %6532 = vmatprep.mubr.msk.f32.mxu0 %vm4489_vm1, %v6973_v49  ;;  %v5176_v14 = vld [vmem:[%s8913_s5 + $0x1a8] sm:$0xff]  ;;  %v5700_v34 = vld [vmem:[%s8917_s9 + $0x10] sm:$0xff] }
 0x3e0   : > { %6764 = vmatprep.subr.bf16.mxu0 %v6763_v60  ;;  %v6831_v2 = vpack.c.bf16 %v5176_v14, %v5175_v57  ;;  %v5271_v49 = vld [vmem:[%s8913_s5 + $0x1c8] sm:$0xff]  ;;  %v6873_v8 = vpack.c.bf16 %v5700_v34, %v5698_v44  ;;  %v5501_v28 = vld [vmem:[#allocation4] sm:$0xf]  ;;  %v8842_v57 = vld [vmem:[%s8915_s7 + $0x4] ss:$0 sm:$0xff] }
 0x3e1   : > { %v5541_v12 = vld [vmem:[#allocation4 + $0x2] sm:$0xf]  ;;  %v8847_v14 = vld [vmem:[%s8915_s7 + $0x5] ss:$0 sm:$0xff] }
 0x3e2   : > { %v6976_v6 = vld [vmem:[#allocation3 + $0x18] ss:$8 sps:$4 sm:$0xff]   ;;  %v5553_v37 = vmul.f32 %v6003_v27, %v5541_v12 }
 0x3e3   : > { %6766 = vmatpush3.bf16.msra.mxu0 %v6763_v60  ;;  %v6978_v32 = vld [vmem:[#allocation3 + $0x19] ss:$8 sps:$4 sm:$0xff]  }
 0x3e4   : > { %6768 = vmatprep.subr.bf16.mxu0 %v6767_v45  ;;  %v6980_v59 = vld [vmem:[#allocation3 + $0x1a] ss:$8 sps:$4 sm:$0xff]  }
 0x3e5   : > { %v5270_v60 = vld [vmem:[%s8913_s5 + $0x1c0] sm:$0xff] }
 0x3e6   : > { %v6839_v19 = vpack.c.bf16 %v5271_v49, %v5270_v60  ;;  %v6982_v43 = vld [vmem:[#allocation3 + $0x20] ss:$8 sps:$4 sm:$0xff]  }
 0x3e7   : > { %6770 = vmatpush3.bf16.msra.mxu0 %v6767_v45  ;;  %v5273_v45 = vld [vmem:[%s8913_s5 + $0x1d8] sm:$0xff]  ;;  %v6984_v54 = vld [vmem:[#allocation3 + $0x21] ss:$8 sps:$4 sm:$0xff]  }
 0x3e8   : > { %6772 = vmatprep.subr.bf16.mxu0 %v6771_v9  ;;  %v6843_v50 = vpack.c.bf16 %v5273_v45, %v5272_v40 }
 0x3eb   : > { %6774 = vmatpush3.bf16.msra.mxu0 %v6771_v9  ;;  %v6983_v9 = vld [vmem:[#allocation3 + $0x11] ss:$8 sps:$4 sm:$0xff]  }
 0x3ec   : > { %6776 = vmatprep.subr.bf16.mxu0 %v6775_v29 }
 0x3ee   : > { %6533 = vmatmul.mubr.msk.f32.vlgmr.msra.gmra.mrb[20].mxu0 %vm4489_vm1, %v6974_v55  ;;  %v6851_v55 = vpack.c.bf16 %v5277_v25, %v5276_v52 }
 0x3ef   : > { %6778 = vmatpush3.bf16.msra.mxu0 %v6775_v29  ;;  %6551 = vmatprep.mubr.msk.f32.mxu0 %vm4489_vm1, %v6975_v38  ;;  %v6847_v29 = vpack.c.bf16 %v5275_v48, %v5274_v3  ;;  %v5370_v38 = vld [vmem:[%s8913_s5 + $0x208] sm:$0xff]  ;;  %v5591_v48 = vcombine.high %v8842_v57, %v8842_v57 }
 0x3f0   : > { %6780 = vmatprep.subr.bf16.mxu0 %v6779_v0 }
 0x3f3   : > { %6782 = vmatpush3.bf16.msra.mxu0 %v6779_v0  ;;  %v5369_v0 = vld [vmem:[%s8913_s5 + $0x200] sm:$0xff] }
 0x3f4   : > { %6784 = vmatprep.subr.bf16.mxu0 %v6783_v5  ;;  %v6855_v41 = vpack.c.bf16 %v5370_v38, %v5369_v0  ;;  %v8868_v38 = vcombine.high %v8847_v14, %v8847_v14 }
 0x3f7   : > { %6786 = vmatpush3.bf16.msra.mxu0 %v6783_v5  ;;  %v5372_v5 = vld [vmem:[%s8913_s5 + $0x218] sm:$0xff] }
 0x3f8   : > { %6788 = vmatprep.subr.bf16.mxu0 %v6787_v58  ;;  %v6859_v56 = vpack.c.bf16 %v5372_v5, %v5371_v61 }
 0x3fb   : > { %6790 = vmatpush3.bf16.msra.mxu0 %v6787_v58  ;;  %v6985_v58 = vld [vmem:[#allocation3 + $0x12] ss:$8 sps:$4 sm:$0xff]  }
 0x3fc   : > { %6792 = vmatprep.subr.bf16.mxu0 %v6791_v33 }
 0x3fe   : > { %6552 = vmatmul.mubr.msk.f32.vlgmr.msra.gmra.mrb[20].mxu0 %vm4489_vm1, %v6976_v6  ;;  %v6867_v6 = vpack.c.bf16 %v5376_v35, %v5375_v22 }
 0x3ff   : > { %6794 = vmatpush3.bf16.msra.mxu0 %v6791_v33  ;;  %6570 = vmatprep.mubr.msk.f32.mxu0 %vm4489_vm1, %v6977_v18  ;;  %v6863_v33 = vpack.c.bf16 %v5374_v7, %v5373_v39  ;;  %v5699_v18 = vld [vmem:[%s8917_s9 + $0x8] sm:$0xff] }
 0x400   : > { %6796 = vmatprep.subr.bf16.mxu0 %v6795_v17 }
 0x403   : > { %6798 = vmatpush3.bf16.msra.mxu0 %v6795_v17  ;;  %v6986_v17 = vld [vmem:[#allocation3 + $0x22] ss:$8 sps:$4 sm:$0xff]  }
 0x404   : > { %6800 = vmatprep.subr.bf16.mxu0 %v6799_v4 }
 0x407   : > { %6802 = vmatpush3.bf16.msra.mxu0 %v6799_v4  ;;  %v6871_v4 = vpack.c.bf16 %v5701_v31, %v5699_v18 }
 0x408   : > { %6804 = vmatprep.subr.bf16.mxu0 %v6803_v26 }
 0x409   : > { %6872 = vmatprep.subr.bf16.mxu1 %v6871_v4 }
 0x40a   : > { %6874 = vmatpush1.bf16.msra.mxu1 %v6873_v8 }
 0x40b   : > { %6806 = vmatpush3.bf16.msra.mxu0 %v6803_v26  ;;  %v6000_v26 = vld [vmem:[%s8914_s6] ss:$0 sm:$0xff] }
 0x40c   : > { %6808 = vmatprep.subr.bf16.mxu0 %v6807_v20 }
 0x40e   : > { %6571 = vmatmul.mubr.msk.f32.vlgmr.msra.gmra.mrb[20].mxu0 %vm4489_vm1, %v6978_v32  ;;  %v6001_v32 = vld [vmem:[%s8915_s7] ss:$0 sm:$0xff] }
 0x40f   : > { %6810 = vmatpush3.bf16.msra.mxu0 %v6807_v20  ;;  %6589 = vmatprep.mubr.msk.f32.mxu0 %vm4489_vm1, %v6979_v42  ;;  %v6002_v42 = vld [vmem:[%s8915_s7 + $0x1] ss:$0 sm:$0xff]  ;;  %v5513_v13 = vmul.f32 %v6001_v32, %v5501_v28  ;;  %v5511_v62 = vcombine.high %v6001_v32, %v6001_v32 }
 0x410   : > { %6812 = vmatprep.subr.bf16.mxu0 %v6811_v63 }
 0x413   : > { %6814 = vmatpush3.bf16.msra.mxu0 %v6811_v63  ;;  %v5521_v63 = vld [vmem:[#allocation4 + $0x1] sm:$0xf] }
 0x414   : > { %6816 = vmatprep.subr.bf16.mxu0 %v6815_v46  ;;  %v5533_v10 = vmul.f32 %v6002_v42, %v5521_v63 }
 0x417   : > { %6818 = vmatpush3.bf16.msra.mxu0 %v6815_v46 }
 0x418   : > { %6820 = vmatprep.subr.bf16.mxu0 %v6819_v16 }
 0x41b   : > { %6822 = vmatpush3.bf16.msra.mxu0 %v6819_v16 }
 0x41c   : > { %6824 = vmatprep.subr.bf16.mxu0 %v6823_v1 }
 0x41e   : > { %6590 = vmatmul.mubr.msk.f32.vlgmr.msra.gmra.mrb[20].mxu0 %vm4489_vm1, %v6980_v59  ;;  %v5531_v59 = vcombine.high %v6002_v42, %v6002_v42 }
 0x41f   : > { %6826 = vmatpush3.bf16.msra.mxu0 %v6823_v1  ;;  %6608 = vmatprep.mubr.msk.f32.mxu0 %vm4489_vm1, %v6981_v47  ;;  %v5537_v1 = vadd.f32 %v5533_v10, %v5513_v13  ;;  %v5551_v47 = vcombine.high %v6003_v27, %v6003_v27 }
 0x420   : > { %6828 = vmatprep.subr.bf16.mxu0 %v6827_v23 }
 0x421   : > { %v5557_v60 = vadd.f32 %v5553_v37, %v5537_v1 }
 0x423   : > { %6830 = vmatpush3.bf16.msra.mxu0 %v6827_v23  ;;  %v6004_v23 = vld [vmem:[%s8915_s7 + $0x3] ss:$0 sm:$0xff] }
 0x424   : > { %6832 = vmatprep.subr.bf16.mxu0 %v6831_v2  ;;  %v5571_v49 = vcombine.high %v6004_v23, %v6004_v23 }
 0x427   : > { %6834 = vmatpush3.bf16.msra.mxu0 %v6831_v2  ;;  %v8852_v2 = vld [vmem:[%s8915_s7 + $0x6] ss:$0 sm:$0xff] }
 0x428   : > { %6836 = vmatprep.subr.bf16.mxu0 %v6835_v21  ;;  %v8872_v61 = vcombine.high %v8852_v2, %v8852_v2 }
 0x42b   : > { %6838 = vmatpush3.bf16.msra.mxu0 %v6835_v21 }
 0x42c   : > { %6840 = vmatprep.subr.bf16.mxu0 %v6839_v19 }
 0x42e   : > { %6609 = vmatmul.mubr.msk.f32.vlgmr.msra.gmra.mrb[20].mxu0 %vm4489_vm1, %v6982_v43 }
 0x42f   : > { %6842 = vmatpush3.bf16.msra.mxu0 %v6839_v19  ;;  %6627 = vmatprep.mubr.msk.f32.mxu0 %vm4489_vm1, %v6983_v9 }
 0x430   : > { %6844 = vmatprep.subr.bf16.mxu0 %v6843_v50 }
 0x433   : > { %6846 = vmatpush3.bf16.msra.mxu0 %v6843_v50  ;;  %v8857_v50 = vld [vmem:[%s8915_s7 + $0x7] ss:$0 sm:$0xff] }
 0x434   : > { %6848 = vmatprep.subr.bf16.mxu0 %v6847_v29 }
 0x437   : > { %6850 = vmatpush3.bf16.msra.mxu0 %v6847_v29  ;;  %v8864_v29 = vld [vmem:[%s8915_s7 + $0x8] ss:$0 sm:$0xff] }
 0x438   : > { %6852 = vmatprep.subr.bf16.mxu0 %v6851_v55 }
 0x43b   : > { %6854 = vmatpush3.bf16.msra.mxu0 %v6851_v55 }
 0x43c   : > { %6856 = vmatprep.subr.bf16.mxu0 %v6855_v41 }
 0x43e   : > { %6628 = vmatmul.mubr.msk.f32.vlgmr.msra.gmra.mrb[20].mxu0 %vm4489_vm1, %v6984_v54 }
 0x43f   : > { %6858 = vmatpush3.bf16.msra.mxu0 %v6855_v41  ;;  %6646 = vmatprep.mubr.msk.f32.mxu0 %vm4489_vm1, %v6985_v58  ;;  %v8877_v58 = vcombine.high %v8857_v50, %v8857_v50 }
 0x440   : > { %6860 = vmatprep.subr.bf16.mxu0 %v6859_v56 }
 0x443   : > { %6862 = vmatpush3.bf16.msra.mxu0 %v6859_v56 }
 0x444   : > { %6864 = vmatprep.subr.bf16.mxu0 %v6863_v33 }
 0x447   : > { %6866 = vmatpush3.bf16.msra.mxu0 %v6863_v33 }
 0x448   : > { %6868 = vmatprep.subr.bf16.mxu0 %v6867_v6 }
 0x44b   : > { %6870 = vmatpush3.bf16.msra.mxu0 %v6867_v6 }
 0x44e   : > { %6647 = vmatmul.mubr.msk.f32.vlgmr.msra.gmra.mrb[20].mxu0 %vm4489_vm1, %v6986_v17 }
 0x521   : > { %v6648_v36 = vpop.f32.mrb[20].mxu0 }
 0x522   : > { %v5472_v30 = vadd.f32 %v6648_v36, %v6000_v26  ;;  %v5453_v20 = vpop.f32.mrb[21].mxu0 }
 0x523   : > { %v5471_v15 = vadd.f32 %v6000_v26, %v5453_v20  ;;  %v5672_v26 = vcombine.high %v8864_v29, %v8864_v29 }
 0x524   : > { %v5474_v11 = vmax.f32 %v5472_v30, 0.0 }
 0x525   : > { %v5473_v24 = vmax.f32 %v5471_v15, 0.0 }
 0x526   : > { %v5493_v46 = vcombine.high %v5474_v11, %v5474_v11  ;;  %5499 = vst [vmem:[#allocation4 + $0x19] sm:$0xf] %v5474_v11 }
 0x527   : > { %v5492_v16 = vcombine.high %v5473_v24, %v5473_v24  ;;  %5497 = vst [vmem:[#allocation4 + $0x9] sm:$0xf] %v5473_v24 }
 0x528   : > { %5500 = vst [vmem:[#allocation4 + $0x21] sm:$0xf] %v5493_v46 }
 0x529   : > { %5498 = vst [vmem:[#allocation4 + $0x11] sm:$0xf] %v5492_v16 }
 0x52d   : > { %v5504_v7 = vld [vmem:[#allocation4 + $0x18] sm:$0xf] }
 0x52e   : > { %v5502_v53 = vld [vmem:[#allocation4 + $0x8] sm:$0xf]  ;;  %v5516_v6 = vmul.f32 %v5511_v62, %v5504_v7  ;;  %v5524_v17 = vld [vmem:[#allocation4 + $0x19] sm:$0xf] }
 0x52f   : > { %v5522_v51 = vld [vmem:[#allocation4 + $0x9] sm:$0xf]  ;;  %v5514_v19 = vmul.f32 %v5511_v62, %v5502_v53  ;;  %v5544_v44 = vld [vmem:[#allocation4 + $0x1a] sm:$0xf]  ;;  %v5536_v36 = vmul.f32 %v5531_v59, %v5524_v17  ;;  %v5584_v53 = vld [vmem:[#allocation4 + $0x21] sm:$0xf] }
 0x530   : > { %v5542_v21 = vld [vmem:[#allocation4 + $0xa] sm:$0xf]  ;;  %v5534_v40 = vmul.f32 %v5531_v59, %v5522_v51  ;;  %v5562_v9 = vld [vmem:[#allocation4 + $0x10] sm:$0xf]  ;;  %v5563_v30 = vld [vmem:[#allocation4 + $0x18] sm:$0xf]  ;;  %v5556_v10 = vmul.f32 %v5551_v47, %v5544_v44 }
 0x531   : > { %v5561_v45 = vld [vmem:[#allocation4 + $0x8] sm:$0xf]  ;;  %v5554_v25 = vmul.f32 %v5551_v47, %v5542_v21  ;;  %v5582_v55 = vld [vmem:[#allocation4 + $0x11] sm:$0xf]  ;;  %v5574_v5 = vmul.f32 %v5571_v49, %v5562_v9  ;;  %v5623_v15 = vld [vmem:[#allocation4 + $0x18] sm:$0xf]  ;;  %v5540_v13 = vadd.f32 %v5536_v36, %v5516_v6  ;;  %v5575_v59 = vmul.f32 %v6004_v23, %v5563_v30 }
 0x532   : > { %v5581_v43 = vld [vmem:[#allocation4 + $0x9] sm:$0xf]  ;;  %v5573_v3 = vmul.f32 %v6004_v23, %v5561_v45  ;;  %v5538_v52 = vadd.f32 %v5534_v40, %v5514_v19  ;;  %v5622_v41 = vld [vmem:[#allocation4 + $0x10] sm:$0xf]  ;;  %v5594_v28 = vmul.f32 %v5591_v48, %v5582_v55  ;;  %v5583_v16 = vld [vmem:[#allocation4 + $0x19] sm:$0xf]  ;;  %v5635_v51 = vmul.f32 %v8872_v61, %v5623_v15 }
 0x533   : > { %v5601_v0 = vld [vmem:[#allocation4 + $0xa] sm:$0xf]  ;;  %v5593_v56 = vmul.f32 %v8842_v57, %v5581_v43  ;;  %v5503_v39 = vld [vmem:[#allocation4 + $0x10] sm:$0xf]  ;;  %v5643_v37 = vld [vmem:[#allocation4 + $0x19] sm:$0xf]  ;;  %v5595_v47 = vmul.f32 %v8842_v57, %v5583_v16 }
 0x534   : > { %v5577_v54 = vadd.f32 %v5573_v3, %v5557_v60  ;;  %v5523_v33 = vld [vmem:[#allocation4 + $0x11] sm:$0xf]  ;;  %v5558_v22 = vadd.f32 %v5554_v25, %v5538_v52  ;;  %v5515_v35 = vmul.f32 %v6001_v32, %v5503_v39  ;;  %v5613_v8 = vmul.f32 %v8847_v14, %v5601_v0  ;;  %v5564_v32 = vld [vmem:[#allocation4 + $0x20] sm:$0xf]  ;;  %v5603_v19 = vld [vmem:[#allocation4 + $0x1a] sm:$0xf] }
 0x535   : > { %v5535_v18 = vmul.f32 %v6002_v42, %v5523_v33  ;;  %v5543_v31 = vld [vmem:[#allocation4 + $0x12] sm:$0xf]  ;;  %v5634_v42 = vmul.f32 %v8852_v2, %v5622_v41  ;;  %v5560_v60 = vadd.f32 %v5556_v10, %v5540_v13  ;;  %v5663_v43 = vld [vmem:[#allocation4 + $0x1a] sm:$0xf]  ;;  %v5604_v3 = vld [vmem:[#allocation4 + $0x22] sm:$0xf]  ;;  %v5655_v25 = vmul.f32 %v8877_v58, %v5643_v37 }
 0x536   : > { %v5597_v4 = vadd.f32 %v5593_v56, %v5577_v54  ;;  %v5602_v34 = vld [vmem:[#allocation4 + $0x12] sm:$0xf]  ;;  %v5578_v20 = vadd.f32 %v5574_v5, %v5558_v22  ;;  %v5555_v11 = vmul.f32 %v6003_v27, %v5543_v31  ;;  %v5576_v27 = vmul.f32 %v5571_v49, %v5564_v32  ;;  %v5625_v52 = vld [vmem:[#allocation4 + $0x28] sm:$0xf]  ;;  %v5624_v41 = vld [vmem:[#allocation4 + $0x20] sm:$0xf] }
 0x537   : > { %v5539_v63 = vadd.f32 %v5535_v18, %v5515_v35  ;;  %v5642_v46 = vld [vmem:[#allocation4 + $0x11] sm:$0xf]  ;;  %v5614_v1 = vmul.f32 %v8868_v38, %v5602_v34  ;;  %v5596_v0 = vmul.f32 %v5591_v48, %v5584_v53  ;;  %v5615_v49 = vmul.f32 %v8847_v14, %v5603_v19  ;;  %v5645_v39 = vld [vmem:[#allocation4 + $0x29] sm:$0xf]  ;;  %v5644_v35 = vld [vmem:[#allocation4 + $0x21] sm:$0xf] }
 0x538   : > { %v5617_v24 = vadd.f32 %v5613_v8, %v5597_v4  ;;  %v5598_v12 = vadd.f32 %v5594_v28, %v5578_v20  ;;  %v5654_v45 = vmul.f32 %v8857_v50, %v5642_v46  ;;  %v5662_v55 = vld [vmem:[#allocation4 + $0x12] sm:$0xf]  ;;  %v5580_v23 = vadd.f32 %v5576_v27, %v5560_v60  ;;  %v5665_v31 = vld [vmem:[#allocation4 + $0x2a] sm:$0xf]  ;;  %v5664_v34 = vld [vmem:[#allocation4 + $0x22] sm:$0xf] }
 0x539   : > { %v5559_v62 = vadd.f32 %v5555_v11, %v5539_v63  ;;  %v5675_v7 = vmul.f32 %v5672_v26, %v5663_v43  ;;  %v5616_v22 = vmul.f32 %v8868_v38, %v5604_v3  ;;  %v5637_v57 = vmul.f32 %v8872_v61, %v5625_v52  ;;  %v8937_v10 = vld [vmem:[#allocation6_spill] sm:$0xff] }
 0x53a   : > { %v5638_v21 = vadd.f32 %v5634_v42, %v5617_v24  ;;  %v5618_v40 = vadd.f32 %v5614_v1, %v5598_v12  ;;  %v5600_v33 = vadd.f32 %v5596_v0, %v5580_v23  ;;  %v5674_v17 = vmul.f32 %v8864_v29, %v5662_v55 }
 0x53b   : > { %v5579_v9 = vadd.f32 %v5575_v59, %v5559_v62  ;;  %v5636_v48 = vmul.f32 %v8852_v2, %v5624_v41  ;;  %v5657_v4 = vmul.f32 %v8877_v58, %v5645_v39  ;;  %v5656_v30 = vmul.f32 %v8857_v50, %v5644_v35 }
 0x53c   : > { %v5639_v5 = vadd.f32 %v5635_v51, %v5618_v40  ;;  %v5658_v54 = vadd.f32 %v5654_v45, %v5638_v21  ;;  %v5620_v44 = vadd.f32 %v5616_v22, %v5600_v33  ;;  %v5677_v20 = vmul.f32 %v5672_v26, %v5665_v31 }
 0x53d   : > { %v5599_v56 = vadd.f32 %v5595_v47, %v5579_v9  ;;  %v5676_v15 = vmul.f32 %v8864_v29, %v5664_v34  ;;  %v8936_v58 = vlaneseq  ;;  %v5695_v13 = vstv %s5694_s29 }
 0x53e   : > { %v5659_v6 = vadd.f32 %v5655_v25, %v5639_v5  ;;  %v5678_v14 = vadd.f32 %v5674_v17, %v5658_v54  ;;  %v5641_v38 = vadd.f32 %v5637_v57, %v5620_v44  ;;  %v7000_v59 = vmov 1966171168  }
 0x53f   : > { %v5619_v18 = vadd.f32 %v5615_v49, %v5599_v56  ;;  %v5705_v24 = vand.u32 127, %v8936_v58  ;;  %v5795_v53 = vunpack.c.l.s4 %v7000_v59  ;;  %vm5811_vm5 = vcmp.lt.s32.totalorder %v8936_v58, 256 }
 0x540   : > { %v5679_v8 = vadd.f32 %v5675_v7, %v5659_v6  ;;  %v5661_v63 = vadd.f32 %v5657_v4, %v5641_v38 }
 0x541   : > { %v5640_v36 = vadd.f32 %v5636_v48, %v5619_v18  ;;  %v5710_v46 = vadd.s32 4294967288, %v5705_v24  ;;  %v5708_v50 = vsub.s32 %v5705_v24, %v8937_v10  ;;  %v5796_v51 = vunpack.c.0.s8 %v5795_v53 }
 0x542   : > { %v5686_v61 = vcombine.low %v5678_v14, %v5679_v8  ;;  %v5681_v2 = vadd.f32 %v5677_v20, %v5661_v63 }
 0x543   : > { %v5660_v28 = vadd.f32 %v5656_v30, %v5640_v36  ;;  %v5713_v26 = vsub.s32 %v5710_v46, %v8937_v10  ;;  %v5799_v60 = vsub.s32 %v5796_v51, %v8937_v10 }
 0x544   : > { %5690 = vadd.xlane.f32.xlu0 %v5686_v61 }
 0x545   : > { %v5680_v11 = vadd.f32 %v5676_v15, %v5660_v28 }
 0x547   : > { %v5687_v32 = vcombine.low %v5680_v11, %v5681_v2 }
 0x549   : > { %5692 = vadd.xlane.f32.xlu0 %v5687_v32 }
 0x5d1   : > { %v5691_v42 = vpop.xlane.xlu0 %5690 }
 0x5d2   : > { %v5696_v16 = vadd.f32 %v5695_v13, %v5691_v42 }
 0x5d4   : > { %v5709_v1 = vrot.slane %v5696_v16, %v5708_v50 }
 0x5d6   : > { %v5693_v12 = vpop.xlane.xlu0 %5692 }
 0x5d7   : > { %v5697_v29 = vadd.f32 %v5695_v13, %v5693_v12 }
 0x5d9   : > { %v5714_v37 = vrot.slane %v5697_v29, %v5713_v26 }
 0x5db   : > { %v5716_v62 = vsel %vm5715_vm3, %v5714_v37, %v5709_v1 }
 0x5dc   : > { %6010 = vmatmul.mubr.msk.f32.vlgmr.msra.gmra.mrb[20].mxu1 %vm5717_vm4, %v5716_v62 }
 0x6af   : > { %v5786_v21 = vpop.f32.mrb[20].mxu1 }
 0x6b0   : > { %v5788_v27 = vpop.f32.mrb[21].mxu1 }
 0x6b1   : > { %v5793_v19 = vcombine.low %v5786_v21, %v5788_v27 }
 0x6b3   : > { %v5800_v40 = vrot.slane %v5793_v19, %v5799_v60 }
 0x6b5   : > { %v5807_v45 = vrot.slane %v5800_v40, %v5799_v60 }
 0x6b7   : > { %5813 = vst.msk [vmem:[%s358_s13] sm:$0x3] %vm5811_vm5, %v5807_v45 }
 0x6b8 PF: > { %s21_s15 = sadd.s32 1, %s6995_s15  }
 0x6b9   : > { %p18_p4 = scmp.ge.s32.totalorder %s21_s15, 4  }
 0x6bb   :  { %20 = sbr.rel (!%p18_p4) target bundleno = 2 (0x2), region = 99 }

</bundles_post_ra>
